<compile_context>
chip_gen: v6e
topology: v6e:2x2x1
jax: 0.10.0
libtpu: 0.0.40
codegen_flags: <defaults>
</compile_context>

<pallas_src>
import functools

import jax
import jax.numpy as jnp
from jax import lax
from jax.experimental import pallas as pl
from jax.experimental.pallas import tpu as pltpu


def _round_up(x, m):
    return (x + m - 1) // m * m


def _gru_chunk_kernel(emb_ref, wih_ref, whh_ref, bih_ref, bhn_ref,
                      out_ref, hid_ref, h_ref, gi_ref,
                      *, n_sub, t_valid_last):
    # emb_ref: (TCHUNK, Bt, E)    time-major embeddings for this (batch-tile, chunk)
    # wih_ref: (E,  3*Hp)         weight_ih_l0.T, gate slots [r|z|n] padded to Hp
    # whh_ref: (Hp, 3*Hp)         weight_hh_l0.T, padded
    # bih_ref: (1, 3*Hp) f32      b_ih with the r/z halves of b_hh folded in
    # bhn_ref: (1, Hp)   f32      n-gate slice of b_hh (must stay inside r*(...))
    # out_ref: (Bt, TCHUNK, Hp)   batch-first output block for this chunk
    # hid_ref: (Bt, Hp)           final hidden state (resident across the time axis)
    # h_ref:   (Bt, Hp) f32       VMEM scratch: hidden-state carry across chunks
    # gi_ref:  (TCHUNK, Bt, 3Hp)  VMEM scratch: hoisted input-side gates
    tchunk, Bt, E = emb_ref.shape
    Hp = h_ref.shape[-1]
    GH = 3 * Hp
    SUB = Bt // n_sub
    ci = pl.program_id(1)

    @pl.when(ci == 0)
    def _():
        h_ref[...] = jnp.zeros_like(h_ref)

    # Input-side gates for the whole chunk: one MXU matmul (tchunk*Bt rows), hoisted
    # out of the serial recurrence and parked in VMEM scratch (not held in vregs).
    x2d = emb_ref[...].reshape(tchunk * Bt, E)
    gi = jnp.dot(x2d, wih_ref[...], preferred_element_type=jnp.float32)
    gi_ref[...] = (gi + bih_ref[...]).reshape(tchunk, Bt, GH)

    whh = whh_ref[...]
    mxu_dtype = whh.dtype
    # Hoisted broadcast of the n-gate hidden bias (JAX does not CSE broadcasts).
    bhn_b = jnp.broadcast_to(bhn_ref[...], (SUB, Hp))

    # Zero-padded tail steps (only possible in the last chunk) must not advance h.
    not_last_chunk = ci != (pl.num_programs(1) - 1)

    # Independent per-sub-tile hidden carries -> independent serial chains that the
    # scheduler can interleave (tile s's matmul overlaps tile s''s gate math).
    hs = [h_ref[pl.ds(s * SUB, SUB), :] for s in range(n_sub)]

    for tt in range(tchunk):                    # fully unrolled, static trip count
        for s in range(n_sub):
            h = hs[s]
            gi_t = gi_ref[tt, pl.ds(s * SUB, SUB), :]                  # (SUB, 3Hp) f32
            gh = jnp.dot(h.astype(mxu_dtype), whh,
                         preferred_element_type=jnp.float32)           # (SUB, 3Hp) f32
            i_r, i_z, i_n = gi_t[:, :Hp], gi_t[:, Hp:2 * Hp], gi_t[:, 2 * Hp:]
            h_r, h_z, h_n = gh[:, :Hp], gh[:, Hp:2 * Hp], gh[:, 2 * Hp:]
            r = jax.nn.sigmoid(i_r + h_r)
            z = jax.nn.sigmoid(i_z + h_z)
            n = jnp.tanh(i_n + r * (h_n + bhn_b))
            h_new = (1.0 - z) * n + z * h
            if tt >= t_valid_last:              # static check; last chunk only
                h_new = jnp.where(not_last_chunk, h_new, h)
            hs[s] = h_new
            # Per-step store keeps vreg live ranges short at production H (a single
            # dense block store would keep all tchunk step outputs live in vregs).
            out_ref[pl.ds(s * SUB, SUB), tt, :] = h_new.astype(out_ref.dtype)

    for s in range(n_sub):
        h_ref[pl.ds(s * SUB, SUB), :] = hs[s]
        hid_ref[pl.ds(s * SUB, SUB), :] = hs[s].astype(hid_ref.dtype)


def encoder_rnn_forward(src, emb_table, w_ih, w_hh, b_ih, b_hh,
                        *, mxu_dtype=jnp.float32, tchunk=16):
    """Pallas equivalent of EncoderRNN.forward (batch_first GRU, h0 = 0).

    src: (B,T) int32; emb_table: (V,E); w_ih: (3H,E); w_hh: (3H,H); b_*: (3H,)
    returns (output (B,T,H), hidden (1,B,H)), float32.
    NOTE: out-of-range token ids are clipped by the gather (torch.nn.Embedding raises).
    """
    B, T = src.shape
    V, E = emb_table.shape
    H = w_hh.shape[1]

    # --- tiling -------------------------------------------------------------
    Bp0 = _round_up(B, 8)                   # sublane alignment
    Bt = min(Bp0, 64)                       # per-core batch tile (rows of per-step matmul)
    Bp = _round_up(Bp0, Bt)
    n_btiles = Bp // Bt                     # "parallel" grid axis (v7x: 2 TCs split it)
    Hp = _round_up(H, 128)                  # lane alignment per gate slot
    GH = 3 * Hp
    Tp = _round_up(T, tchunk)               # pad T; never fall back to tchunk = T
    n_chunks = Tp // tchunk
    t_valid_last = T - (n_chunks - 1) * tchunk   # valid steps in the last chunk

    # 1, 2 or 4 independent batch sub-tiles interleaved inside the unrolled loop.
    sub8 = Bt // 8
    n_sub = 4 if sub8 % 4 == 0 else (2 if sub8 % 2 == 0 else 1)

    # --- embedding gather (XLA), time-major directly, pad fused --------------
    emb = jnp.take(emb_table.astype(mxu_dtype), src.T.astype(jnp.int32), axis=0)  # (T,B,E)
    emb = jnp.pad(emb, ((0, Tp - T), (0, Bp - B), (0, 0)))                          # (Tp,Bp,E)

    # --- weights: gate slots [r|z|n] padded H -> Hp; MXU operands in mxu_dtype
    def pad_gate_cols(w):
        rows = w.shape[0]
        out = jnp.zeros((rows, GH), jnp.float32)
        for g in range(3):
            out = out.at[:, g * Hp:g * Hp + H].set(w[:, g * H:(g + 1) * H])
        return out

    wih_p = pad_gate_cols(jnp.transpose(w_ih).astype(jnp.float32)).astype(mxu_dtype)  # (E,GH)
    whh_p = jnp.pad(pad_gate_cols(jnp.transpose(w_hh).astype(jnp.float32)),
                    ((0, Hp - H), (0, 0))).astype(mxu_dtype)                           # (Hp,GH)
    # Fold r/z halves of b_hh into b_ih; the n-gate b_hh stays inside r*(...).
    b_fold = jnp.concatenate([b_ih[:H] + b_hh[:H],
                              b_ih[H:2 * H] + b_hh[H:2 * H],
                              b_ih[2 * H:3 * H]]).astype(jnp.float32)
    bih_p = pad_gate_cols(b_fold.reshape(1, 3 * H))                                     # (1,GH) f32
    bhn_p = jnp.zeros((1, Hp), jnp.float32).at[:, :H].set(b_hh[2 * H:3 * H])            # (1,Hp) f32

    kernel = functools.partial(_gru_chunk_kernel, n_sub=n_sub,
                               t_valid_last=t_valid_last)

    grid_spec = pltpu.PrefetchScalarGridSpec(
        num_scalar_prefetch=0,
        grid=(n_btiles, n_chunks),
        in_specs=[
            pl.BlockSpec((tchunk, Bt, E), lambda bi, ci: (ci, bi, 0)),   # per-chunk embeddings
            pl.BlockSpec((E, GH), lambda bi, ci: (0, 0)),                # resident weights
            pl.BlockSpec((Hp, GH), lambda bi, ci: (0, 0)),
            pl.BlockSpec((1, GH), lambda bi, ci: (0, 0)),
            pl.BlockSpec((1, Hp), lambda bi, ci: (0, 0)),
        ],
        out_specs=(
            pl.BlockSpec((Bt, tchunk, Hp), lambda bi, ci: (bi, ci, 0)),  # batch-first output
            pl.BlockSpec((Bt, Hp), lambda bi, ci: (bi, 0)),              # final hidden (resident)
        ),
        scratch_shapes=[
            pltpu.VMEM((Bt, Hp), jnp.float32),           # hidden-state carry
            pltpu.VMEM((tchunk, Bt, GH), jnp.float32),   # hoisted input-side gates
        ],
    )

    out_p, hid_p = pl.pallas_call(
        kernel,
        out_shape=(jax.ShapeDtypeStruct((Bp, Tp, Hp), jnp.float32),
                   jax.ShapeDtypeStruct((Bp, Hp), jnp.float32)),
        grid_spec=grid_spec,
        compiler_params=pltpu.CompilerParams(
            dimension_semantics=("parallel", "arbitrary"),   # batch tiles ||, time carried
            vmem_limit_bytes=64 * 1024 * 1024),
    )(emb, wih_p, whh_p, bih_p, bhn_p)

    output = out_p[:B, :T, :H]             # (B, T, H) batch_first, no extra transpose pass
    hidden = hid_p[:B, :H][None, :, :]     # (1, B, H)
    return output, hidden


def _reference_forward(src, emb_table, w_ih, w_hh, b_ih, b_hh):
    """Pure-JAX reference matching torch.nn.GRU(batch_first=True) semantics."""
    emb = emb_table[src]                                    # (B, T, E)
    B = src.shape[0]
    H = w_hh.shape[1]

    def cell(h, x):
        gi = x @ w_ih.T + b_ih
        gh = h @ w_hh.T + b_hh
        i_r, i_z, i_n = jnp.split(gi, 3, axis=-1)
        h_r, h_z, h_n = jnp.split(gh, 3, axis=-1)
        r = jax.nn.sigmoid(i_r + h_r)
        z = jax.nn.sigmoid(i_z + h_z)
        n = jnp.tanh(i_n + r * h_n)
        h_new = (1.0 - z) * n + z * h
        return h_new, h_new

    h0 = jnp.zeros((B, H), jnp.float32)
    h_final, outs = lax.scan(cell, h0, jnp.transpose(emb, (1, 0, 2)))
    return jnp.transpose(outs, (1, 0, 2)), h_final[None]


if __name__ == "__main__":
    VOCAB, EMB, HIDDEN = 32, 16, 32
    BATCH, SEQ = 2, 24    # SEQ=24, tchunk=16 -> 2 chunks + zero-padded tail (exercises carry + masking)

    key = jax.random.PRNGKey(0)
    k_src, k_emb, k_wih, k_whh, k_bih, k_bhh = jax.random.split(key, 6)

    src = jax.random.randint(k_src, (BATCH, SEQ), 0, VOCAB, dtype=jnp.int32)
    bound = 1.0 / jnp.sqrt(jnp.float32(HIDDEN))
    emb_table = jax.random.normal(k_emb, (VOCAB, EMB), jnp.float32)
    w_ih = jax.random.uniform(k_wih, (3 * HIDDEN, EMB), jnp.float32, -bound, bound)
    w_hh = jax.random.uniform(k_whh, (3 * HIDDEN, HIDDEN), jnp.float32, -bound, bound)
    b_ih = jax.random.uniform(k_bih, (3 * HIDDEN,), jnp.float32, -bound, bound)
    b_hh = jax.random.uniform(k_bhh, (3 * HIDDEN,), jnp.float32, -bound, bound)

    ref_out, ref_hid = _reference_forward(src, emb_table, w_ih, w_hh, b_ih, b_hh)

    # f32 MXU path (tight check).
    fwd = jax.jit(functools.partial(encoder_rnn_forward, mxu_dtype=jnp.float32))
    output, hidden = fwd(src, emb_table, w_ih, w_hh, b_ih, b_hh)
    jax.block_until_ready((output, hidden))
    assert output.shape == (BATCH, SEQ, HIDDEN)
    assert hidden.shape == (1, BATCH, HIDDEN)
    assert jnp.allclose(output, ref_out, atol=1e-4, rtol=1e-4)
    assert jnp.allclose(hidden, ref_hid, atol=1e-4, rtol=1e-4)

    # bf16 MXU-operand path (f32 accumulation, f32 hidden carry / gate math): loose check.
    fwd_bf16 = jax.jit(functools.partial(encoder_rnn_forward, mxu_dtype=jnp.bfloat16))
    out_bf, hid_bf = fwd_bf16(src, emb_table, w_ih, w_hh, b_ih, b_hh)
    jax.block_until_ready((out_bf, hid_bf))
    assert jnp.allclose(out_bf, ref_out, atol=5e-2, rtol=5e-2)
    assert jnp.allclose(hid_bf, ref_hid, atol=5e-2, rtol=5e-2)

    print("KERNEL_OK")
</pallas_src>

<mosaic_0001>
module attributes {stable_mosaic.version = 11 : i64} {
  func.func @_gru_chunk_kernel(%arg0: i32, %arg1: i32, %arg2: memref<16x8x16xf32, #tpu.memory_space<vmem>>, %arg3: memref<16x384xf32, #tpu.memory_space<vmem>>, %arg4: memref<128x384xf32, #tpu.memory_space<vmem>>, %arg5: memref<1x384xf32, #tpu.memory_space<vmem>>, %arg6: memref<1x128xf32, #tpu.memory_space<vmem>>, %arg7: memref<8x16x128xf32, #tpu.memory_space<vmem>>, %arg8: memref<8x128xf32, #tpu.memory_space<vmem>>, %arg9: memref<8x128xf32, #tpu.memory_space<vmem>>, %arg10: memref<16x8x384xf32, #tpu.memory_space<vmem>>) attributes {dimension_semantics = [#tpu.dimension_semantics<parallel>, #tpu.dimension_semantics<arbitrary>], iteration_bounds = array<i64: 1, 2>, scalar_prefetch = 0 : i64, scratch_operands = 2 : i64, tpu.core_type = #tpu.core_type<tc>, window_params = [{transform_indices = @transform_0, window_bounds = array<i64: 16, 8, 16>}, {pipeline_mode = #tpu.pipeline_mode<synchronous>, transform_indices = @transform_1, window_bounds = array<i64: 16, 384>}, {pipeline_mode = #tpu.pipeline_mode<synchronous>, transform_indices = @transform_2, window_bounds = array<i64: 128, 384>}, {pipeline_mode = #tpu.pipeline_mode<synchronous>, transform_indices = @transform_3, window_bounds = array<i64: 1, 384>}, {pipeline_mode = #tpu.pipeline_mode<synchronous>, transform_indices = @transform_4, window_bounds = array<i64: 1, 128>}, {transform_indices = @transform_5, window_bounds = array<i64: 8, 16, 128>}, {transform_indices = @transform_6, window_bounds = array<i64: 8, 128>}]} {
    %c0_i32 = arith.constant 0 : i32
    %0 = arith.cmpi eq, %arg1, %c0_i32 : i32
    %1 = arith.extui %0 : i1 to i32
    %c0_i32_0 = arith.constant 0 : i32
    %2 = arith.cmpi ne, %1, %c0_i32_0 : i32
    scf.if %2 {
      %cst_165 = arith.constant 0.000000e+00 : f32
      %556 = vector.broadcast %cst_165 : f32 to vector<8x128xf32>
      %c0_166 = arith.constant 0 : index
      %c0_167 = arith.constant 0 : index
      %557 = vector.load %arg9[%c0_166, %c0_167] : memref<8x128xf32, #tpu.memory_space<vmem>>, vector<8x128xf32>
      tpu.vector_store %arg9[%c0_166, %c0_167], %556 {strides = array<i32>} : memref<8x128xf32, #tpu.memory_space<vmem>>, vector<8x128xf32>,
    } else {
    }
    %c0 = arith.constant 0 : index
    %c0_1 = arith.constant 0 : index
    %c0_2 = arith.constant 0 : index
    %3 = vector.load %arg2[%c0, %c0_1, %c0_2] : memref<16x8x16xf32, #tpu.memory_space<vmem>>, vector<16x8x16xf32>
    %4 = vector.shape_cast %3 : vector<16x8x16xf32> to vector<128x16xf32>
    %c0_3 = arith.constant 0 : index
    %c0_4 = arith.constant 0 : index
    %5 = vector.load %arg3[%c0_3, %c0_4] : memref<16x384xf32, #tpu.memory_space<vmem>>, vector<16x384xf32>
    %cst = arith.constant dense<0.000000e+00> : vector<128x384xf32>
    %6 = tpu.matmul %4, %5, %cst {dimension_numbers = #tpu.dot_dimension_numbers<[1], [0], [0], [1], [0, 0, 1, 1], [], []>} : vector<128x16xf32>, vector<16x384xf32>, vector<128x384xf32> -> vector<128x384xf32>
    %c0_5 = arith.constant 0 : index
    %c0_6 = arith.constant 0 : index
    %7 = vector.load %arg5[%c0_5, %c0_6] : memref<1x384xf32, #tpu.memory_space<vmem>>, vector<1x384xf32>
    %8 = vector.broadcast %7 : vector<1x384xf32> to vector<128x384xf32>
    %9 = arith.addf %6, %8 : vector<128x384xf32>
    %10 = vector.shape_cast %9 : vector<128x384xf32> to vector<16x8x384xf32>
    %c0_7 = arith.constant 0 : index
    %c0_8 = arith.constant 0 : index
    %c0_9 = arith.constant 0 : index
    %11 = vector.load %arg10[%c0_7, %c0_8, %c0_9] : memref<16x8x384xf32, #tpu.memory_space<vmem>>, vector<16x8x384xf32>
    tpu.vector_store %arg10[%c0_7, %c0_8, %c0_9], %10 {strides = array<i32>} : memref<16x8x384xf32, #tpu.memory_space<vmem>>, vector<16x8x384xf32>,
    %c0_10 = arith.constant 0 : index
    %c0_11 = arith.constant 0 : index
    %12 = vector.load %arg4[%c0_10, %c0_11] : memref<128x384xf32, #tpu.memory_space<vmem>>, vector<128x384xf32>
    %c0_12 = arith.constant 0 : index
    %c0_13 = arith.constant 0 : index
    %13 = vector.load %arg6[%c0_12, %c0_13] : memref<1x128xf32, #tpu.memory_space<vmem>>, vector<1x128xf32>
    %14 = vector.shape_cast %13 : vector<1x128xf32> to vector<1x128xf32>
    %15 = vector.broadcast %14 : vector<1x128xf32> to vector<8x128xf32>
    %c1_i32 = arith.constant 1 : i32
    %16 = arith.cmpi ne, %arg1, %c1_i32 : i32
    %c0_14 = arith.constant 0 : index
    %c0_15 = arith.constant 0 : index
    %17 = vector.load %arg9[%c0_14, %c0_15] : memref<8x128xf32, #tpu.memory_space<vmem>>, vector<8x128xf32>
    %c0_16 = arith.constant 0 : index
    %c0_17 = arith.constant 0 : index
    %c0_18 = arith.constant 0 : index
    %18 = vector.load %arg10[%c0_16, %c0_17, %c0_18] : memref<16x8x384xf32, #tpu.memory_space<vmem>>, vector<1x8x384xf32>
    %19 = vector.shape_cast %18 : vector<1x8x384xf32> to vector<8x384xf32>
    %cst_19 = arith.constant dense<0.000000e+00> : vector<8x384xf32>
    %20 = tpu.matmul %17, %12, %cst_19 {dimension_numbers = #tpu.dot_dimension_numbers<[1], [0], [0], [1], [0, 0, 1, 1], [], []>} : vector<8x128xf32>, vector<128x384xf32>, vector<8x384xf32> -> vector<8x384xf32>
    %21 = vector.extract_strided_slice %19 {offsets = [0, 0], sizes = [8, 128], strides = [1, 1]} : vector<8x384xf32> to vector<8x128xf32>
    %22 = vector.extract_strided_slice %19 {offsets = [0, 128], sizes = [8, 128], strides = [1, 1]} : vector<8x384xf32> to vector<8x128xf32>
    %23 = vector.extract_strided_slice %19 {offsets = [0, 256], sizes = [8, 128], strides = [1, 1]} : vector<8x384xf32> to vector<8x128xf32>
    %24 = vector.extract_strided_slice %20 {offsets = [0, 0], sizes = [8, 128], strides = [1, 1]} : vector<8x384xf32> to vector<8x128xf32>
    %25 = vector.extract_strided_slice %20 {offsets = [0, 128], sizes = [8, 128], strides = [1, 1]} : vector<8x384xf32> to vector<8x128xf32>
    %26 = vector.extract_strided_slice %20 {offsets = [0, 256], sizes = [8, 128], strides = [1, 1]} : vector<8x384xf32> to vector<8x128xf32>
    %27 = arith.addf %21, %24 : vector<8x128xf32>
    %28 = arith.negf %27 : vector<8x128xf32>
    %29 = math.exp %28 : vector<8x128xf32>
    %cst_20 = arith.constant 1.000000e+00 : f32
    %30 = vector.broadcast %cst_20 : f32 to vector<8x128xf32>
    %31 = arith.addf %30, %29 : vector<8x128xf32>
    %32 = arith.divf %30, %31 : vector<8x128xf32>
    %33 = arith.addf %22, %25 : vector<8x128xf32>
    %34 = arith.negf %33 : vector<8x128xf32>
    %35 = math.exp %34 : vector<8x128xf32>
    %cst_21 = arith.constant 1.000000e+00 : f32
    %36 = vector.broadcast %cst_21 : f32 to vector<8x128xf32>
    %37 = arith.addf %36, %35 : vector<8x128xf32>
    %38 = arith.divf %36, %37 : vector<8x128xf32>
    %39 = arith.addf %26, %15 : vector<8x128xf32>
    %40 = arith.mulf %32, %39 : vector<8x128xf32>
    %41 = arith.addf %23, %40 : vector<8x128xf32>
    %42 = math.tanh %41 : vector<8x128xf32>
    %cst_22 = arith.constant 1.000000e+00 : f32
    %43 = vector.broadcast %cst_22 : f32 to vector<8x128xf32>
    %44 = arith.subf %43, %38 : vector<8x128xf32>
    %45 = arith.mulf %44, %42 : vector<8x128xf32>
    %46 = arith.mulf %38, %17 : vector<8x128xf32>
    %47 = arith.addf %45, %46 : vector<8x128xf32>
    %c0_23 = arith.constant 0 : index
    %c0_24 = arith.constant 0 : index
    %c0_25 = arith.constant 0 : index
    %48 = vector.load %arg7[%c0_23, %c0_24, %c0_25] : memref<8x16x128xf32, #tpu.memory_space<vmem>>, vector<8x1x128xf32>
    %49 = vector.shape_cast %48 : vector<8x1x128xf32> to vector<8x128xf32>
    %50 = vector.shape_cast %47 : vector<8x128xf32> to vector<8x1x128xf32>
    tpu.vector_store %arg7[%c0_23, %c0_24, %c0_25], %50 {strides = array<i32>} : memref<8x16x128xf32, #tpu.memory_space<vmem>>, vector<8x1x128xf32>,
    %c1 = arith.constant 1 : index
    %c0_26 = arith.constant 0 : index
    %c0_27 = arith.constant 0 : index
    %51 = vector.load %arg10[%c1, %c0_26, %c0_27] : memref<16x8x384xf32, #tpu.memory_space<vmem>>, vector<1x8x384xf32>
    %52 = vector.shape_cast %51 : vector<1x8x384xf32> to vector<8x384xf32>
    %cst_28 = arith.constant dense<0.000000e+00> : vector<8x384xf32>
    %53 = tpu.matmul %47, %12, %cst_28 {dimension_numbers = #tpu.dot_dimension_numbers<[1], [0], [0], [1], [0, 0, 1, 1], [], []>} : vector<8x128xf32>, vector<128x384xf32>, vector<8x384xf32> -> vector<8x384xf32>
    %54 = vector.extract_strided_slice %52 {offsets = [0, 0], sizes = [8, 128], strides = [1, 1]} : vector<8x384xf32> to vector<8x128xf32>
    %55 = vector.extract_strided_slice %52 {offsets = [0, 128], sizes = [8, 128], strides = [1, 1]} : vector<8x384xf32> to vector<8x128xf32>
    %56 = vector.extract_strided_slice %52 {offsets = [0, 256], sizes = [8, 128], strides = [1, 1]} : vector<8x384xf32> to vector<8x128xf32>
    %57 = vector.extract_strided_slice %53 {offsets = [0, 0], sizes = [8, 128], strides = [1, 1]} : vector<8x384xf32> to vector<8x128xf32>
    %58 = vector.extract_strided_slice %53 {offsets = [0, 128], sizes = [8, 128], strides = [1, 1]} : vector<8x384xf32> to vector<8x128xf32>
    %59 = vector.extract_strided_slice %53 {offsets = [0, 256], sizes = [8, 128], strides = [1, 1]} : vector<8x384xf32> to vector<8x128xf32>
    %60 = arith.addf %54, %57 : vector<8x128xf32>
    %61 = arith.negf %60 : vector<8x128xf32>
    %62 = math.exp %61 : vector<8x128xf32>
    %cst_29 = arith.constant 1.000000e+00 : f32
    %63 = vector.broadcast %cst_29 : f32 to vector<8x128xf32>
    %64 = arith.addf %63, %62 : vector<8x128xf32>
    %65 = arith.divf %63, %64 : vector<8x128xf32>
    %66 = arith.addf %55, %58 : vector<8x128xf32>
    %67 = arith.negf %66 : vector<8x128xf32>
    %68 = math.exp %67 : vector<8x128xf32>
    %cst_30 = arith.constant 1.000000e+00 : f32
    %69 = vector.broadcast %cst_30 : f32 to vector<8x128xf32>
    %70 = arith.addf %69, %68 : vector<8x128xf32>
    %71 = arith.divf %69, %70 : vector<8x128xf32>
    %72 = arith.addf %59, %15 : vector<8x128xf32>
    %73 = arith.mulf %65, %72 : vector<8x128xf32>
    %74 = arith.addf %56, %73 : vector<8x128xf32>
    %75 = math.tanh %74 : vector<8x128xf32>
    %cst_31 = arith.constant 1.000000e+00 : f32
    %76 = vector.broadcast %cst_31 : f32 to vector<8x128xf32>
    %77 = arith.subf %76, %71 : vector<8x128xf32>
    %78 = arith.mulf %77, %75 : vector<8x128xf32>
    %79 = arith.mulf %71, %47 : vector<8x128xf32>
    %80 = arith.addf %78, %79 : vector<8x128xf32>
    %c0_32 = arith.constant 0 : index
    %c1_33 = arith.constant 1 : index
    %c0_34 = arith.constant 0 : index
    %81 = vector.load %arg7[%c0_32, %c1_33, %c0_34] : memref<8x16x128xf32, #tpu.memory_space<vmem>>, vector<8x1x128xf32>
    %82 = vector.shape_cast %81 : vector<8x1x128xf32> to vector<8x128xf32>
    %83 = vector.shape_cast %80 : vector<8x128xf32> to vector<8x1x128xf32>
    tpu.vector_store %arg7[%c0_32, %c1_33, %c0_34], %83 {strides = array<i32>} : memref<8x16x128xf32, #tpu.memory_space<vmem>>, vector<8x1x128xf32>,
    %c2 = arith.constant 2 : index
    %c0_35 = arith.constant 0 : index
    %c0_36 = arith.constant 0 : index
    %84 = vector.load %arg10[%c2, %c0_35, %c0_36] : memref<16x8x384xf32, #tpu.memory_space<vmem>>, vector<1x8x384xf32>
    %85 = vector.shape_cast %84 : vector<1x8x384xf32> to vector<8x384xf32>
    %cst_37 = arith.constant dense<0.000000e+00> : vector<8x384xf32>
    %86 = tpu.matmul %80, %12, %cst_37 {dimension_numbers = #tpu.dot_dimension_numbers<[1], [0], [0], [1], [0, 0, 1, 1], [], []>} : vector<8x128xf32>, vector<128x384xf32>, vector<8x384xf32> -> vector<8x384xf32>
    %87 = vector.extract_strided_slice %85 {offsets = [0, 0], sizes = [8, 128], strides = [1, 1]} : vector<8x384xf32> to vector<8x128xf32>
    %88 = vector.extract_strided_slice %85 {offsets = [0, 128], sizes = [8, 128], strides = [1, 1]} : vector<8x384xf32> to vector<8x128xf32>
    %89 = vector.extract_strided_slice %85 {offsets = [0, 256], sizes = [8, 128], strides = [1, 1]} : vector<8x384xf32> to vector<8x128xf32>
    %90 = vector.extract_strided_slice %86 {offsets = [0, 0], sizes = [8, 128], strides = [1, 1]} : vector<8x384xf32> to vector<8x128xf32>
    %91 = vector.extract_strided_slice %86 {offsets = [0, 128], sizes = [8, 128], strides = [1, 1]} : vector<8x384xf32> to vector<8x128xf32>
    %92 = vector.extract_strided_slice %86 {offsets = [0, 256], sizes = [8, 128], strides = [1, 1]} : vector<8x384xf32> to vector<8x128xf32>
    %93 = arith.addf %87, %90 : vector<8x128xf32>
    %94 = arith.negf %93 : vector<8x128xf32>
    %95 = math.exp %94 : vector<8x128xf32>
    %cst_38 = arith.constant 1.000000e+00 : f32
    %96 = vector.broadcast %cst_38 : f32 to vector<8x128xf32>
    %97 = arith.addf %96, %95 : vector<8x128xf32>
    %98 = arith.divf %96, %97 : vector<8x128xf32>
    %99 = arith.addf %88, %91 : vector<8x128xf32>
    %100 = arith.negf %99 : vector<8x128xf32>
    %101 = math.exp %100 : vector<8x128xf32>
    %cst_39 = arith.constant 1.000000e+00 : f32
    %102 = vector.broadcast %cst_39 : f32 to vector<8x128xf32>
    %103 = arith.addf %102, %101 : vector<8x128xf32>
    %104 = arith.divf %102, %103 : vector<8x128xf32>
    %105 = arith.addf %92, %15 : vector<8x128xf32>
    %106 = arith.mulf %98, %105 : vector<8x128xf32>
    %107 = arith.addf %89, %106 : vector<8x128xf32>
    %108 = math.tanh %107 : vector<8x128xf32>
    %cst_40 = arith.constant 1.000000e+00 : f32
    %109 = vector.broadcast %cst_40 : f32 to vector<8x128xf32>
    %110 = arith.subf %109, %104 : vector<8x128xf32>
    %111 = arith.mulf %110, %108 : vector<8x128xf32>
    %112 = arith.mulf %104, %80 : vector<8x128xf32>
    %113 = arith.addf %111, %112 : vector<8x128xf32>
    %c0_41 = arith.constant 0 : index
    %c2_42 = arith.constant 2 : index
    %c0_43 = arith.constant 0 : index
    %114 = vector.load %arg7[%c0_41, %c2_42, %c0_43] : memref<8x16x128xf32, #tpu.memory_space<vmem>>, vector<8x1x128xf32>
    %115 = vector.shape_cast %114 : vector<8x1x128xf32> to vector<8x128xf32>
    %116 = vector.shape_cast %113 : vector<8x128xf32> to vector<8x1x128xf32>
    tpu.vector_store %arg7[%c0_41, %c2_42, %c0_43], %116 {strides = array<i32>} : memref<8x16x128xf32, #tpu.memory_space<vmem>>, vector<8x1x128xf32>,
    %c3 = arith.constant 3 : index
    %c0_44 = arith.constant 0 : index
    %c0_45 = arith.constant 0 : index
    %117 = vector.load %arg10[%c3, %c0_44, %c0_45] : memref<16x8x384xf32, #tpu.memory_space<vmem>>, vector<1x8x384xf32>
    %118 = vector.shape_cast %117 : vector<1x8x384xf32> to vector<8x384xf32>
    %cst_46 = arith.constant dense<0.000000e+00> : vector<8x384xf32>
    %119 = tpu.matmul %113, %12, %cst_46 {dimension_numbers = #tpu.dot_dimension_numbers<[1], [0], [0], [1], [0, 0, 1, 1], [], []>} : vector<8x128xf32>, vector<128x384xf32>, vector<8x384xf32> -> vector<8x384xf32>
    %120 = vector.extract_strided_slice %118 {offsets = [0, 0], sizes = [8, 128], strides = [1, 1]} : vector<8x384xf32> to vector<8x128xf32>
    %121 = vector.extract_strided_slice %118 {offsets = [0, 128], sizes = [8, 128], strides = [1, 1]} : vector<8x384xf32> to vector<8x128xf32>
    %122 = vector.extract_strided_slice %118 {offsets = [0, 256], sizes = [8, 128], strides = [1, 1]} : vector<8x384xf32> to vector<8x128xf32>
    %123 = vector.extract_strided_slice %119 {offsets = [0, 0], sizes = [8, 128], strides = [1, 1]} : vector<8x384xf32> to vector<8x128xf32>
    %124 = vector.extract_strided_slice %119 {offsets = [0, 128], sizes = [8, 128], strides = [1, 1]} : vector<8x384xf32> to vector<8x128xf32>
    %125 = vector.extract_strided_slice %119 {offsets = [0, 256], sizes = [8, 128], strides = [1, 1]} : vector<8x384xf32> to vector<8x128xf32>
    %126 = arith.addf %120, %123 : vector<8x128xf32>
    %127 = arith.negf %126 : vector<8x128xf32>
    %128 = math.exp %127 : vector<8x128xf32>
    %cst_47 = arith.constant 1.000000e+00 : f32
    %129 = vector.broadcast %cst_47 : f32 to vector<8x128xf32>
    %130 = arith.addf %129, %128 : vector<8x128xf32>
    %131 = arith.divf %129, %130 : vector<8x128xf32>
    %132 = arith.addf %121, %124 : vector<8x128xf32>
    %133 = arith.negf %132 : vector<8x128xf32>
    %134 = math.exp %133 : vector<8x128xf32>
    %cst_48 = arith.constant 1.000000e+00 : f32
    %135 = vector.broadcast %cst_48 : f32 to vector<8x128xf32>
    %136 = arith.addf %135, %134 : vector<8x128xf32>
    %137 = arith.divf %135, %136 : vector<8x128xf32>
    %138 = arith.addf %125, %15 : vector<8x128xf32>
    %139 = arith.mulf %131, %138 : vector<8x128xf32>
    %140 = arith.addf %122, %139 : vector<8x128xf32>
    %141 = math.tanh %140 : vector<8x128xf32>
    %cst_49 = arith.constant 1.000000e+00 : f32
    %142 = vector.broadcast %cst_49 : f32 to vector<8x128xf32>
    %143 = arith.subf %142, %137 : vector<8x128xf32>
    %144 = arith.mulf %143, %141 : vector<8x128xf32>
    %145 = arith.mulf %137, %113 : vector<8x128xf32>
    %146 = arith.addf %144, %145 : vector<8x128xf32>
    %c0_50 = arith.constant 0 : index
    %c3_51 = arith.constant 3 : index
    %c0_52 = arith.constant 0 : index
    %147 = vector.load %arg7[%c0_50, %c3_51, %c0_52] : memref<8x16x128xf32, #tpu.memory_space<vmem>>, vector<8x1x128xf32>
    %148 = vector.shape_cast %147 : vector<8x1x128xf32> to vector<8x128xf32>
    %149 = vector.shape_cast %146 : vector<8x128xf32> to vector<8x1x128xf32>
    tpu.vector_store %arg7[%c0_50, %c3_51, %c0_52], %149 {strides = array<i32>} : memref<8x16x128xf32, #tpu.memory_space<vmem>>, vector<8x1x128xf32>,
    %c4 = arith.constant 4 : index
    %c0_53 = arith.constant 0 : index
    %c0_54 = arith.constant 0 : index
    %150 = vector.load %arg10[%c4, %c0_53, %c0_54] : memref<16x8x384xf32, #tpu.memory_space<vmem>>, vector<1x8x384xf32>
    %151 = vector.shape_cast %150 : vector<1x8x384xf32> to vector<8x384xf32>
    %cst_55 = arith.constant dense<0.000000e+00> : vector<8x384xf32>
    %152 = tpu.matmul %146, %12, %cst_55 {dimension_numbers = #tpu.dot_dimension_numbers<[1], [0], [0], [1], [0, 0, 1, 1], [], []>} : vector<8x128xf32>, vector<128x384xf32>, vector<8x384xf32> -> vector<8x384xf32>
    %153 = vector.extract_strided_slice %151 {offsets = [0, 0], sizes = [8, 128], strides = [1, 1]} : vector<8x384xf32> to vector<8x128xf32>
    %154 = vector.extract_strided_slice %151 {offsets = [0, 128], sizes = [8, 128], strides = [1, 1]} : vector<8x384xf32> to vector<8x128xf32>
    %155 = vector.extract_strided_slice %151 {offsets = [0, 256], sizes = [8, 128], strides = [1, 1]} : vector<8x384xf32> to vector<8x128xf32>
    %156 = vector.extract_strided_slice %152 {offsets = [0, 0], sizes = [8, 128], strides = [1, 1]} : vector<8x384xf32> to vector<8x128xf32>
    %157 = vector.extract_strided_slice %152 {offsets = [0, 128], sizes = [8, 128], strides = [1, 1]} : vector<8x384xf32> to vector<8x128xf32>
    %158 = vector.extract_strided_slice %152 {offsets = [0, 256], sizes = [8, 128], strides = [1, 1]} : vector<8x384xf32> to vector<8x128xf32>
    %159 = arith.addf %153, %156 : vector<8x128xf32>
    %160 = arith.negf %159 : vector<8x128xf32>
    %161 = math.exp %160 : vector<8x128xf32>
    %cst_56 = arith.constant 1.000000e+00 : f32
    %162 = vector.broadcast %cst_56 : f32 to vector<8x128xf32>
    %163 = arith.addf %162, %161 : vector<8x128xf32>
    %164 = arith.divf %162, %163 : vector<8x128xf32>
    %165 = arith.addf %154, %157 : vector<8x128xf32>
    %166 = arith.negf %165 : vector<8x128xf32>
    %167 = math.exp %166 : vector<8x128xf32>
    %cst_57 = arith.constant 1.000000e+00 : f32
    %168 = vector.broadcast %cst_57 : f32 to vector<8x128xf32>
    %169 = arith.addf %168, %167 : vector<8x128xf32>
    %170 = arith.divf %168, %169 : vector<8x128xf32>
    %171 = arith.addf %158, %15 : vector<8x128xf32>
    %172 = arith.mulf %164, %171 : vector<8x128xf32>
    %173 = arith.addf %155, %172 : vector<8x128xf32>
    %174 = math.tanh %173 : vector<8x128xf32>
    %cst_58 = arith.constant 1.000000e+00 : f32
    %175 = vector.broadcast %cst_58 : f32 to vector<8x128xf32>
    %176 = arith.subf %175, %170 : vector<8x128xf32>
    %177 = arith.mulf %176, %174 : vector<8x128xf32>
    %178 = arith.mulf %170, %146 : vector<8x128xf32>
    %179 = arith.addf %177, %178 : vector<8x128xf32>
    %c0_59 = arith.constant 0 : index
    %c4_60 = arith.constant 4 : index
    %c0_61 = arith.constant 0 : index
    %180 = vector.load %arg7[%c0_59, %c4_60, %c0_61] : memref<8x16x128xf32, #tpu.memory_space<vmem>>, vector<8x1x128xf32>
    %181 = vector.shape_cast %180 : vector<8x1x128xf32> to vector<8x128xf32>
    %182 = vector.shape_cast %179 : vector<8x128xf32> to vector<8x1x128xf32>
    tpu.vector_store %arg7[%c0_59, %c4_60, %c0_61], %182 {strides = array<i32>} : memref<8x16x128xf32, #tpu.memory_space<vmem>>, vector<8x1x128xf32>,
    %c5 = arith.constant 5 : index
    %c0_62 = arith.constant 0 : index
    %c0_63 = arith.constant 0 : index
    %183 = vector.load %arg10[%c5, %c0_62, %c0_63] : memref<16x8x384xf32, #tpu.memory_space<vmem>>, vector<1x8x384xf32>
    %184 = vector.shape_cast %183 : vector<1x8x384xf32> to vector<8x384xf32>
    %cst_64 = arith.constant dense<0.000000e+00> : vector<8x384xf32>
    %185 = tpu.matmul %179, %12, %cst_64 {dimension_numbers = #tpu.dot_dimension_numbers<[1], [0], [0], [1], [0, 0, 1, 1], [], []>} : vector<8x128xf32>, vector<128x384xf32>, vector<8x384xf32> -> vector<8x384xf32>
    %186 = vector.extract_strided_slice %184 {offsets = [0, 0], sizes = [8, 128], strides = [1, 1]} : vector<8x384xf32> to vector<8x128xf32>
    %187 = vector.extract_strided_slice %184 {offsets = [0, 128], sizes = [8, 128], strides = [1, 1]} : vector<8x384xf32> to vector<8x128xf32>
    %188 = vector.extract_strided_slice %184 {offsets = [0, 256], sizes = [8, 128], strides = [1, 1]} : vector<8x384xf32> to vector<8x128xf32>
    %189 = vector.extract_strided_slice %185 {offsets = [0, 0], sizes = [8, 128], strides = [1, 1]} : vector<8x384xf32> to vector<8x128xf32>
    %190 = vector.extract_strided_slice %185 {offsets = [0, 128], sizes = [8, 128], strides = [1, 1]} : vector<8x384xf32> to vector<8x128xf32>
    %191 = vector.extract_strided_slice %185 {offsets = [0, 256], sizes = [8, 128], strides = [1, 1]} : vector<8x384xf32> to vector<8x128xf32>
    %192 = arith.addf %186, %189 : vector<8x128xf32>
    %193 = arith.negf %192 : vector<8x128xf32>
    %194 = math.exp %193 : vector<8x128xf32>
    %cst_65 = arith.constant 1.000000e+00 : f32
    %195 = vector.broadcast %cst_65 : f32 to vector<8x128xf32>
    %196 = arith.addf %195, %194 : vector<8x128xf32>
    %197 = arith.divf %195, %196 : vector<8x128xf32>
    %198 = arith.addf %187, %190 : vector<8x128xf32>
    %199 = arith.negf %198 : vector<8x128xf32>
    %200 = math.exp %199 : vector<8x128xf32>
    %cst_66 = arith.constant 1.000000e+00 : f32
    %201 = vector.broadcast %cst_66 : f32 to vector<8x128xf32>
    %202 = arith.addf %201, %200 : vector<8x128xf32>
    %203 = arith.divf %201, %202 : vector<8x128xf32>
    %204 = arith.addf %191, %15 : vector<8x128xf32>
    %205 = arith.mulf %197, %204 : vector<8x128xf32>
    %206 = arith.addf %188, %205 : vector<8x128xf32>
    %207 = math.tanh %206 : vector<8x128xf32>
    %cst_67 = arith.constant 1.000000e+00 : f32
    %208 = vector.broadcast %cst_67 : f32 to vector<8x128xf32>
    %209 = arith.subf %208, %203 : vector<8x128xf32>
    %210 = arith.mulf %209, %207 : vector<8x128xf32>
    %211 = arith.mulf %203, %179 : vector<8x128xf32>
    %212 = arith.addf %210, %211 : vector<8x128xf32>
    %c0_68 = arith.constant 0 : index
    %c5_69 = arith.constant 5 : index
    %c0_70 = arith.constant 0 : index
    %213 = vector.load %arg7[%c0_68, %c5_69, %c0_70] : memref<8x16x128xf32, #tpu.memory_space<vmem>>, vector<8x1x128xf32>
    %214 = vector.shape_cast %213 : vector<8x1x128xf32> to vector<8x128xf32>
    %215 = vector.shape_cast %212 : vector<8x128xf32> to vector<8x1x128xf32>
    tpu.vector_store %arg7[%c0_68, %c5_69, %c0_70], %215 {strides = array<i32>} : memref<8x16x128xf32, #tpu.memory_space<vmem>>, vector<8x1x128xf32>,
    %c6 = arith.constant 6 : index
    %c0_71 = arith.constant 0 : index
    %c0_72 = arith.constant 0 : index
    %216 = vector.load %arg10[%c6, %c0_71, %c0_72] : memref<16x8x384xf32, #tpu.memory_space<vmem>>, vector<1x8x384xf32>
    %217 = vector.shape_cast %216 : vector<1x8x384xf32> to vector<8x384xf32>
    %cst_73 = arith.constant dense<0.000000e+00> : vector<8x384xf32>
    %218 = tpu.matmul %212, %12, %cst_73 {dimension_numbers = #tpu.dot_dimension_numbers<[1], [0], [0], [1], [0, 0, 1, 1], [], []>} : vector<8x128xf32>, vector<128x384xf32>, vector<8x384xf32> -> vector<8x384xf32>
    %219 = vector.extract_strided_slice %217 {offsets = [0, 0], sizes = [8, 128], strides = [1, 1]} : vector<8x384xf32> to vector<8x128xf32>
    %220 = vector.extract_strided_slice %217 {offsets = [0, 128], sizes = [8, 128], strides = [1, 1]} : vector<8x384xf32> to vector<8x128xf32>
    %221 = vector.extract_strided_slice %217 {offsets = [0, 256], sizes = [8, 128], strides = [1, 1]} : vector<8x384xf32> to vector<8x128xf32>
    %222 = vector.extract_strided_slice %218 {offsets = [0, 0], sizes = [8, 128], strides = [1, 1]} : vector<8x384xf32> to vector<8x128xf32>
    %223 = vector.extract_strided_slice %218 {offsets = [0, 128], sizes = [8, 128], strides = [1, 1]} : vector<8x384xf32> to vector<8x128xf32>
    %224 = vector.extract_strided_slice %218 {offsets = [0, 256], sizes = [8, 128], strides = [1, 1]} : vector<8x384xf32> to vector<8x128xf32>
    %225 = arith.addf %219, %222 : vector<8x128xf32>
    %226 = arith.negf %225 : vector<8x128xf32>
    %227 = math.exp %226 : vector<8x128xf32>
    %cst_74 = arith.constant 1.000000e+00 : f32
    %228 = vector.broadcast %cst_74 : f32 to vector<8x128xf32>
    %229 = arith.addf %228, %227 : vector<8x128xf32>
    %230 = arith.divf %228, %229 : vector<8x128xf32>
    %231 = arith.addf %220, %223 : vector<8x128xf32>
    %232 = arith.negf %231 : vector<8x128xf32>
    %233 = math.exp %232 : vector<8x128xf32>
    %cst_75 = arith.constant 1.000000e+00 : f32
    %234 = vector.broadcast %cst_75 : f32 to vector<8x128xf32>
    %235 = arith.addf %234, %233 : vector<8x128xf32>
    %236 = arith.divf %234, %235 : vector<8x128xf32>
    %237 = arith.addf %224, %15 : vector<8x128xf32>
    %238 = arith.mulf %230, %237 : vector<8x128xf32>
    %239 = arith.addf %221, %238 : vector<8x128xf32>
    %240 = math.tanh %239 : vector<8x128xf32>
    %cst_76 = arith.constant 1.000000e+00 : f32
    %241 = vector.broadcast %cst_76 : f32 to vector<8x128xf32>
    %242 = arith.subf %241, %236 : vector<8x128xf32>
    %243 = arith.mulf %242, %240 : vector<8x128xf32>
    %244 = arith.mulf %236, %212 : vector<8x128xf32>
    %245 = arith.addf %243, %244 : vector<8x128xf32>
    %c0_77 = arith.constant 0 : index
    %c6_78 = arith.constant 6 : index
    %c0_79 = arith.constant 0 : index
    %246 = vector.load %arg7[%c0_77, %c6_78, %c0_79] : memref<8x16x128xf32, #tpu.memory_space<vmem>>, vector<8x1x128xf32>
    %247 = vector.shape_cast %246 : vector<8x1x128xf32> to vector<8x128xf32>
    %248 = vector.shape_cast %245 : vector<8x128xf32> to vector<8x1x128xf32>
    tpu.vector_store %arg7[%c0_77, %c6_78, %c0_79], %248 {strides = array<i32>} : memref<8x16x128xf32, #tpu.memory_space<vmem>>, vector<8x1x128xf32>,
    %c7 = arith.constant 7 : index
    %c0_80 = arith.constant 0 : index
    %c0_81 = arith.constant 0 : index
    %249 = vector.load %arg10[%c7, %c0_80, %c0_81] : memref<16x8x384xf32, #tpu.memory_space<vmem>>, vector<1x8x384xf32>
    %250 = vector.shape_cast %249 : vector<1x8x384xf32> to vector<8x384xf32>
    %cst_82 = arith.constant dense<0.000000e+00> : vector<8x384xf32>
    %251 = tpu.matmul %245, %12, %cst_82 {dimension_numbers = #tpu.dot_dimension_numbers<[1], [0], [0], [1], [0, 0, 1, 1], [], []>} : vector<8x128xf32>, vector<128x384xf32>, vector<8x384xf32> -> vector<8x384xf32>
    %252 = vector.extract_strided_slice %250 {offsets = [0, 0], sizes = [8, 128], strides = [1, 1]} : vector<8x384xf32> to vector<8x128xf32>
    %253 = vector.extract_strided_slice %250 {offsets = [0, 128], sizes = [8, 128], strides = [1, 1]} : vector<8x384xf32> to vector<8x128xf32>
    %254 = vector.extract_strided_slice %250 {offsets = [0, 256], sizes = [8, 128], strides = [1, 1]} : vector<8x384xf32> to vector<8x128xf32>
    %255 = vector.extract_strided_slice %251 {offsets = [0, 0], sizes = [8, 128], strides = [1, 1]} : vector<8x384xf32> to vector<8x128xf32>
    %256 = vector.extract_strided_slice %251 {offsets = [0, 128], sizes = [8, 128], strides = [1, 1]} : vector<8x384xf32> to vector<8x128xf32>
    %257 = vector.extract_strided_slice %251 {offsets = [0, 256], sizes = [8, 128], strides = [1, 1]} : vector<8x384xf32> to vector<8x128xf32>
    %258 = arith.addf %252, %255 : vector<8x128xf32>
    %259 = arith.negf %258 : vector<8x128xf32>
    %260 = math.exp %259 : vector<8x128xf32>
    %cst_83 = arith.constant 1.000000e+00 : f32
    %261 = vector.broadcast %cst_83 : f32 to vector<8x128xf32>
    %262 = arith.addf %261, %260 : vector<8x128xf32>
    %263 = arith.divf %261, %262 : vector<8x128xf32>
    %264 = arith.addf %253, %256 : vector<8x128xf32>
    %265 = arith.negf %264 : vector<8x128xf32>
    %266 = math.exp %265 : vector<8x128xf32>
    %cst_84 = arith.constant 1.000000e+00 : f32
    %267 = vector.broadcast %cst_84 : f32 to vector<8x128xf32>
    %268 = arith.addf %267, %266 : vector<8x128xf32>
    %269 = arith.divf %267, %268 : vector<8x128xf32>
    %270 = arith.addf %257, %15 : vector<8x128xf32>
    %271 = arith.mulf %263, %270 : vector<8x128xf32>
    %272 = arith.addf %254, %271 : vector<8x128xf32>
    %273 = math.tanh %272 : vector<8x128xf32>
    %cst_85 = arith.constant 1.000000e+00 : f32
    %274 = vector.broadcast %cst_85 : f32 to vector<8x128xf32>
    %275 = arith.subf %274, %269 : vector<8x128xf32>
    %276 = arith.mulf %275, %273 : vector<8x128xf32>
    %277 = arith.mulf %269, %245 : vector<8x128xf32>
    %278 = arith.addf %276, %277 : vector<8x128xf32>
    %c0_86 = arith.constant 0 : index
    %c7_87 = arith.constant 7 : index
    %c0_88 = arith.constant 0 : index
    %279 = vector.load %arg7[%c0_86, %c7_87, %c0_88] : memref<8x16x128xf32, #tpu.memory_space<vmem>>, vector<8x1x128xf32>
    %280 = vector.shape_cast %279 : vector<8x1x128xf32> to vector<8x128xf32>
    %281 = vector.shape_cast %278 : vector<8x128xf32> to vector<8x1x128xf32>
    tpu.vector_store %arg7[%c0_86, %c7_87, %c0_88], %281 {strides = array<i32>} : memref<8x16x128xf32, #tpu.memory_space<vmem>>, vector<8x1x128xf32>,
    %c8 = arith.constant 8 : index
    %c0_89 = arith.constant 0 : index
    %c0_90 = arith.constant 0 : index
    %282 = vector.load %arg10[%c8, %c0_89, %c0_90] : memref<16x8x384xf32, #tpu.memory_space<vmem>>, vector<1x8x384xf32>
    %283 = vector.shape_cast %282 : vector<1x8x384xf32> to vector<8x384xf32>
    %cst_91 = arith.constant dense<0.000000e+00> : vector<8x384xf32>
    %284 = tpu.matmul %278, %12, %cst_91 {dimension_numbers = #tpu.dot_dimension_numbers<[1], [0], [0], [1], [0, 0, 1, 1], [], []>} : vector<8x128xf32>, vector<128x384xf32>, vector<8x384xf32> -> vector<8x384xf32>
    %285 = vector.extract_strided_slice %283 {offsets = [0, 0], sizes = [8, 128], strides = [1, 1]} : vector<8x384xf32> to vector<8x128xf32>
    %286 = vector.extract_strided_slice %283 {offsets = [0, 128], sizes = [8, 128], strides = [1, 1]} : vector<8x384xf32> to vector<8x128xf32>
    %287 = vector.extract_strided_slice %283 {offsets = [0, 256], sizes = [8, 128], strides = [1, 1]} : vector<8x384xf32> to vector<8x128xf32>
    %288 = vector.extract_strided_slice %284 {offsets = [0, 0], sizes = [8, 128], strides = [1, 1]} : vector<8x384xf32> to vector<8x128xf32>
    %289 = vector.extract_strided_slice %284 {offsets = [0, 128], sizes = [8, 128], strides = [1, 1]} : vector<8x384xf32> to vector<8x128xf32>
    %290 = vector.extract_strided_slice %284 {offsets = [0, 256], sizes = [8, 128], strides = [1, 1]} : vector<8x384xf32> to vector<8x128xf32>
    %291 = arith.addf %285, %288 : vector<8x128xf32>
    %292 = arith.negf %291 : vector<8x128xf32>
    %293 = math.exp %292 : vector<8x128xf32>
    %cst_92 = arith.constant 1.000000e+00 : f32
    %294 = vector.broadcast %cst_92 : f32 to vector<8x128xf32>
    %295 = arith.addf %294, %293 : vector<8x128xf32>
    %296 = arith.divf %294, %295 : vector<8x128xf32>
    %297 = arith.addf %286, %289 : vector<8x128xf32>
    %298 = arith.negf %297 : vector<8x128xf32>
    %299 = math.exp %298 : vector<8x128xf32>
    %cst_93 = arith.constant 1.000000e+00 : f32
    %300 = vector.broadcast %cst_93 : f32 to vector<8x128xf32>
    %301 = arith.addf %300, %299 : vector<8x128xf32>
    %302 = arith.divf %300, %301 : vector<8x128xf32>
    %303 = arith.addf %290, %15 : vector<8x128xf32>
    %304 = arith.mulf %296, %303 : vector<8x128xf32>
    %305 = arith.addf %287, %304 : vector<8x128xf32>
    %306 = math.tanh %305 : vector<8x128xf32>
    %cst_94 = arith.constant 1.000000e+00 : f32
    %307 = vector.broadcast %cst_94 : f32 to vector<8x128xf32>
    %308 = arith.subf %307, %302 : vector<8x128xf32>
    %309 = arith.mulf %308, %306 : vector<8x128xf32>
    %310 = arith.mulf %302, %278 : vector<8x128xf32>
    %311 = arith.addf %309, %310 : vector<8x128xf32>
    %312 = arith.select %16, %311, %278 : vector<8x128xf32>
    %c0_95 = arith.constant 0 : index
    %c8_96 = arith.constant 8 : index
    %c0_97 = arith.constant 0 : index
    %313 = vector.load %arg7[%c0_95, %c8_96, %c0_97] : memref<8x16x128xf32, #tpu.memory_space<vmem>>, vector<8x1x128xf32>
    %314 = vector.shape_cast %313 : vector<8x1x128xf32> to vector<8x128xf32>
    %315 = vector.shape_cast %312 : vector<8x128xf32> to vector<8x1x128xf32>
    tpu.vector_store %arg7[%c0_95, %c8_96, %c0_97], %315 {strides = array<i32>} : memref<8x16x128xf32, #tpu.memory_space<vmem>>, vector<8x1x128xf32>,
    %c9 = arith.constant 9 : index
    %c0_98 = arith.constant 0 : index
    %c0_99 = arith.constant 0 : index
    %316 = vector.load %arg10[%c9, %c0_98, %c0_99] : memref<16x8x384xf32, #tpu.memory_space<vmem>>, vector<1x8x384xf32>
    %317 = vector.shape_cast %316 : vector<1x8x384xf32> to vector<8x384xf32>
    %cst_100 = arith.constant dense<0.000000e+00> : vector<8x384xf32>
    %318 = tpu.matmul %312, %12, %cst_100 {dimension_numbers = #tpu.dot_dimension_numbers<[1], [0], [0], [1], [0, 0, 1, 1], [], []>} : vector<8x128xf32>, vector<128x384xf32>, vector<8x384xf32> -> vector<8x384xf32>
    %319 = vector.extract_strided_slice %317 {offsets = [0, 0], sizes = [8, 128], strides = [1, 1]} : vector<8x384xf32> to vector<8x128xf32>
    %320 = vector.extract_strided_slice %317 {offsets = [0, 128], sizes = [8, 128], strides = [1, 1]} : vector<8x384xf32> to vector<8x128xf32>
    %321 = vector.extract_strided_slice %317 {offsets = [0, 256], sizes = [8, 128], strides = [1, 1]} : vector<8x384xf32> to vector<8x128xf32>
    %322 = vector.extract_strided_slice %318 {offsets = [0, 0], sizes = [8, 128], strides = [1, 1]} : vector<8x384xf32> to vector<8x128xf32>
    %323 = vector.extract_strided_slice %318 {offsets = [0, 128], sizes = [8, 128], strides = [1, 1]} : vector<8x384xf32> to vector<8x128xf32>
    %324 = vector.extract_strided_slice %318 {offsets = [0, 256], sizes = [8, 128], strides = [1, 1]} : vector<8x384xf32> to vector<8x128xf32>
    %325 = arith.addf %319, %322 : vector<8x128xf32>
    %326 = arith.negf %325 : vector<8x128xf32>
    %327 = math.exp %326 : vector<8x128xf32>
    %cst_101 = arith.constant 1.000000e+00 : f32
    %328 = vector.broadcast %cst_101 : f32 to vector<8x128xf32>
    %329 = arith.addf %328, %327 : vector<8x128xf32>
    %330 = arith.divf %328, %329 : vector<8x128xf32>
    %331 = arith.addf %320, %323 : vector<8x128xf32>
    %332 = arith.negf %331 : vector<8x128xf32>
    %333 = math.exp %332 : vector<8x128xf32>
    %cst_102 = arith.constant 1.000000e+00 : f32
    %334 = vector.broadcast %cst_102 : f32 to vector<8x128xf32>
    %335 = arith.addf %334, %333 : vector<8x128xf32>
    %336 = arith.divf %334, %335 : vector<8x128xf32>
    %337 = arith.addf %324, %15 : vector<8x128xf32>
    %338 = arith.mulf %330, %337 : vector<8x128xf32>
    %339 = arith.addf %321, %338 : vector<8x128xf32>
    %340 = math.tanh %339 : vector<8x128xf32>
    %cst_103 = arith.constant 1.000000e+00 : f32
    %341 = vector.broadcast %cst_103 : f32 to vector<8x128xf32>
    %342 = arith.subf %341, %336 : vector<8x128xf32>
    %343 = arith.mulf %342, %340 : vector<8x128xf32>
    %344 = arith.mulf %336, %312 : vector<8x128xf32>
    %345 = arith.addf %343, %344 : vector<8x128xf32>
    %346 = arith.select %16, %345, %312 : vector<8x128xf32>
    %c0_104 = arith.constant 0 : index
    %c9_105 = arith.constant 9 : index
    %c0_106 = arith.constant 0 : index
    %347 = vector.load %arg7[%c0_104, %c9_105, %c0_106] : memref<8x16x128xf32, #tpu.memory_space<vmem>>, vector<8x1x128xf32>
    %348 = vector.shape_cast %347 : vector<8x1x128xf32> to vector<8x128xf32>
    %349 = vector.shape_cast %346 : vector<8x128xf32> to vector<8x1x128xf32>
    tpu.vector_store %arg7[%c0_104, %c9_105, %c0_106], %349 {strides = array<i32>} : memref<8x16x128xf32, #tpu.memory_space<vmem>>, vector<8x1x128xf32>,
    %c10 = arith.constant 10 : index
    %c0_107 = arith.constant 0 : index
    %c0_108 = arith.constant 0 : index
    %350 = vector.load %arg10[%c10, %c0_107, %c0_108] : memref<16x8x384xf32, #tpu.memory_space<vmem>>, vector<1x8x384xf32>
    %351 = vector.shape_cast %350 : vector<1x8x384xf32> to vector<8x384xf32>
    %cst_109 = arith.constant dense<0.000000e+00> : vector<8x384xf32>
    %352 = tpu.matmul %346, %12, %cst_109 {dimension_numbers = #tpu.dot_dimension_numbers<[1], [0], [0], [1], [0, 0, 1, 1], [], []>} : vector<8x128xf32>, vector<128x384xf32>, vector<8x384xf32> -> vector<8x384xf32>
    %353 = vector.extract_strided_slice %351 {offsets = [0, 0], sizes = [8, 128], strides = [1, 1]} : vector<8x384xf32> to vector<8x128xf32>
    %354 = vector.extract_strided_slice %351 {offsets = [0, 128], sizes = [8, 128], strides = [1, 1]} : vector<8x384xf32> to vector<8x128xf32>
    %355 = vector.extract_strided_slice %351 {offsets = [0, 256], sizes = [8, 128], strides = [1, 1]} : vector<8x384xf32> to vector<8x128xf32>
    %356 = vector.extract_strided_slice %352 {offsets = [0, 0], sizes = [8, 128], strides = [1, 1]} : vector<8x384xf32> to vector<8x128xf32>
    %357 = vector.extract_strided_slice %352 {offsets = [0, 128], sizes = [8, 128], strides = [1, 1]} : vector<8x384xf32> to vector<8x128xf32>
    %358 = vector.extract_strided_slice %352 {offsets = [0, 256], sizes = [8, 128], strides = [1, 1]} : vector<8x384xf32> to vector<8x128xf32>
    %359 = arith.addf %353, %356 : vector<8x128xf32>
    %360 = arith.negf %359 : vector<8x128xf32>
    %361 = math.exp %360 : vector<8x128xf32>
    %cst_110 = arith.constant 1.000000e+00 : f32
    %362 = vector.broadcast %cst_110 : f32 to vector<8x128xf32>
    %363 = arith.addf %362, %361 : vector<8x128xf32>
    %364 = arith.divf %362, %363 : vector<8x128xf32>
    %365 = arith.addf %354, %357 : vector<8x128xf32>
    %366 = arith.negf %365 : vector<8x128xf32>
    %367 = math.exp %366 : vector<8x128xf32>
    %cst_111 = arith.constant 1.000000e+00 : f32
    %368 = vector.broadcast %cst_111 : f32 to vector<8x128xf32>
    %369 = arith.addf %368, %367 : vector<8x128xf32>
    %370 = arith.divf %368, %369 : vector<8x128xf32>
    %371 = arith.addf %358, %15 : vector<8x128xf32>
    %372 = arith.mulf %364, %371 : vector<8x128xf32>
    %373 = arith.addf %355, %372 : vector<8x128xf32>
    %374 = math.tanh %373 : vector<8x128xf32>
    %cst_112 = arith.constant 1.000000e+00 : f32
    %375 = vector.broadcast %cst_112 : f32 to vector<8x128xf32>
    %376 = arith.subf %375, %370 : vector<8x128xf32>
    %377 = arith.mulf %376, %374 : vector<8x128xf32>
    %378 = arith.mulf %370, %346 : vector<8x128xf32>
    %379 = arith.addf %377, %378 : vector<8x128xf32>
    %380 = arith.select %16, %379, %346 : vector<8x128xf32>
    %c0_113 = arith.constant 0 : index
    %c10_114 = arith.constant 10 : index
    %c0_115 = arith.constant 0 : index
    %381 = vector.load %arg7[%c0_113, %c10_114, %c0_115] : memref<8x16x128xf32, #tpu.memory_space<vmem>>, vector<8x1x128xf32>
    %382 = vector.shape_cast %381 : vector<8x1x128xf32> to vector<8x128xf32>
    %383 = vector.shape_cast %380 : vector<8x128xf32> to vector<8x1x128xf32>
    tpu.vector_store %arg7[%c0_113, %c10_114, %c0_115], %383 {strides = array<i32>} : memref<8x16x128xf32, #tpu.memory_space<vmem>>, vector<8x1x128xf32>,
    %c11 = arith.constant 11 : index
    %c0_116 = arith.constant 0 : index
    %c0_117 = arith.constant 0 : index
    %384 = vector.load %arg10[%c11, %c0_116, %c0_117] : memref<16x8x384xf32, #tpu.memory_space<vmem>>, vector<1x8x384xf32>
    %385 = vector.shape_cast %384 : vector<1x8x384xf32> to vector<8x384xf32>
    %cst_118 = arith.constant dense<0.000000e+00> : vector<8x384xf32>
    %386 = tpu.matmul %380, %12, %cst_118 {dimension_numbers = #tpu.dot_dimension_numbers<[1], [0], [0], [1], [0, 0, 1, 1], [], []>} : vector<8x128xf32>, vector<128x384xf32>, vector<8x384xf32> -> vector<8x384xf32>
    %387 = vector.extract_strided_slice %385 {offsets = [0, 0], sizes = [8, 128], strides = [1, 1]} : vector<8x384xf32> to vector<8x128xf32>
    %388 = vector.extract_strided_slice %385 {offsets = [0, 128], sizes = [8, 128], strides = [1, 1]} : vector<8x384xf32> to vector<8x128xf32>
    %389 = vector.extract_strided_slice %385 {offsets = [0, 256], sizes = [8, 128], strides = [1, 1]} : vector<8x384xf32> to vector<8x128xf32>
    %390 = vector.extract_strided_slice %386 {offsets = [0, 0], sizes = [8, 128], strides = [1, 1]} : vector<8x384xf32> to vector<8x128xf32>
    %391 = vector.extract_strided_slice %386 {offsets = [0, 128], sizes = [8, 128], strides = [1, 1]} : vector<8x384xf32> to vector<8x128xf32>
    %392 = vector.extract_strided_slice %386 {offsets = [0, 256], sizes = [8, 128], strides = [1, 1]} : vector<8x384xf32> to vector<8x128xf32>
    %393 = arith.addf %387, %390 : vector<8x128xf32>
    %394 = arith.negf %393 : vector<8x128xf32>
    %395 = math.exp %394 : vector<8x128xf32>
    %cst_119 = arith.constant 1.000000e+00 : f32
    %396 = vector.broadcast %cst_119 : f32 to vector<8x128xf32>
    %397 = arith.addf %396, %395 : vector<8x128xf32>
    %398 = arith.divf %396, %397 : vector<8x128xf32>
    %399 = arith.addf %388, %391 : vector<8x128xf32>
    %400 = arith.negf %399 : vector<8x128xf32>
    %401 = math.exp %400 : vector<8x128xf32>
    %cst_120 = arith.constant 1.000000e+00 : f32
    %402 = vector.broadcast %cst_120 : f32 to vector<8x128xf32>
    %403 = arith.addf %402, %401 : vector<8x128xf32>
    %404 = arith.divf %402, %403 : vector<8x128xf32>
    %405 = arith.addf %392, %15 : vector<8x128xf32>
    %406 = arith.mulf %398, %405 : vector<8x128xf32>
    %407 = arith.addf %389, %406 : vector<8x128xf32>
    %408 = math.tanh %407 : vector<8x128xf32>
    %cst_121 = arith.constant 1.000000e+00 : f32
    %409 = vector.broadcast %cst_121 : f32 to vector<8x128xf32>
    %410 = arith.subf %409, %404 : vector<8x128xf32>
    %411 = arith.mulf %410, %408 : vector<8x128xf32>
    %412 = arith.mulf %404, %380 : vector<8x128xf32>
    %413 = arith.addf %411, %412 : vector<8x128xf32>
    %414 = arith.select %16, %413, %380 : vector<8x128xf32>
    %c0_122 = arith.constant 0 : index
    %c11_123 = arith.constant 11 : index
    %c0_124 = arith.constant 0 : index
    %415 = vector.load %arg7[%c0_122, %c11_123, %c0_124] : memref<8x16x128xf32, #tpu.memory_space<vmem>>, vector<8x1x128xf32>
    %416 = vector.shape_cast %415 : vector<8x1x128xf32> to vector<8x128xf32>
    %417 = vector.shape_cast %414 : vector<8x128xf32> to vector<8x1x128xf32>
    tpu.vector_store %arg7[%c0_122, %c11_123, %c0_124], %417 {strides = array<i32>} : memref<8x16x128xf32, #tpu.memory_space<vmem>>, vector<8x1x128xf32>,
    %c12 = arith.constant 12 : index
    %c0_125 = arith.constant 0 : index
    %c0_126 = arith.constant 0 : index
    %418 = vector.load %arg10[%c12, %c0_125, %c0_126] : memref<16x8x384xf32, #tpu.memory_space<vmem>>, vector<1x8x384xf32>
    %419 = vector.shape_cast %418 : vector<1x8x384xf32> to vector<8x384xf32>
    %cst_127 = arith.constant dense<0.000000e+00> : vector<8x384xf32>
    %420 = tpu.matmul %414, %12, %cst_127 {dimension_numbers = #tpu.dot_dimension_numbers<[1], [0], [0], [1], [0, 0, 1, 1], [], []>} : vector<8x128xf32>, vector<128x384xf32>, vector<8x384xf32> -> vector<8x384xf32>
    %421 = vector.extract_strided_slice %419 {offsets = [0, 0], sizes = [8, 128], strides = [1, 1]} : vector<8x384xf32> to vector<8x128xf32>
    %422 = vector.extract_strided_slice %419 {offsets = [0, 128], sizes = [8, 128], strides = [1, 1]} : vector<8x384xf32> to vector<8x128xf32>
    %423 = vector.extract_strided_slice %419 {offsets = [0, 256], sizes = [8, 128], strides = [1, 1]} : vector<8x384xf32> to vector<8x128xf32>
    %424 = vector.extract_strided_slice %420 {offsets = [0, 0], sizes = [8, 128], strides = [1, 1]} : vector<8x384xf32> to vector<8x128xf32>
    %425 = vector.extract_strided_slice %420 {offsets = [0, 128], sizes = [8, 128], strides = [1, 1]} : vector<8x384xf32> to vector<8x128xf32>
    %426 = vector.extract_strided_slice %420 {offsets = [0, 256], sizes = [8, 128], strides = [1, 1]} : vector<8x384xf32> to vector<8x128xf32>
    %427 = arith.addf %421, %424 : vector<8x128xf32>
    %428 = arith.negf %427 : vector<8x128xf32>
    %429 = math.exp %428 : vector<8x128xf32>
    %cst_128 = arith.constant 1.000000e+00 : f32
    %430 = vector.broadcast %cst_128 : f32 to vector<8x128xf32>
    %431 = arith.addf %430, %429 : vector<8x128xf32>
    %432 = arith.divf %430, %431 : vector<8x128xf32>
    %433 = arith.addf %422, %425 : vector<8x128xf32>
    %434 = arith.negf %433 : vector<8x128xf32>
    %435 = math.exp %434 : vector<8x128xf32>
    %cst_129 = arith.constant 1.000000e+00 : f32
    %436 = vector.broadcast %cst_129 : f32 to vector<8x128xf32>
    %437 = arith.addf %436, %435 : vector<8x128xf32>
    %438 = arith.divf %436, %437 : vector<8x128xf32>
    %439 = arith.addf %426, %15 : vector<8x128xf32>
    %440 = arith.mulf %432, %439 : vector<8x128xf32>
    %441 = arith.addf %423, %440 : vector<8x128xf32>
    %442 = math.tanh %441 : vector<8x128xf32>
    %cst_130 = arith.constant 1.000000e+00 : f32
    %443 = vector.broadcast %cst_130 : f32 to vector<8x128xf32>
    %444 = arith.subf %443, %438 : vector<8x128xf32>
    %445 = arith.mulf %444, %442 : vector<8x128xf32>
    %446 = arith.mulf %438, %414 : vector<8x128xf32>
    %447 = arith.addf %445, %446 : vector<8x128xf32>
    %448 = arith.select %16, %447, %414 : vector<8x128xf32>
    %c0_131 = arith.constant 0 : index
    %c12_132 = arith.constant 12 : index
    %c0_133 = arith.constant 0 : index
    %449 = vector.load %arg7[%c0_131, %c12_132, %c0_133] : memref<8x16x128xf32, #tpu.memory_space<vmem>>, vector<8x1x128xf32>
    %450 = vector.shape_cast %449 : vector<8x1x128xf32> to vector<8x128xf32>
    %451 = vector.shape_cast %448 : vector<8x128xf32> to vector<8x1x128xf32>
    tpu.vector_store %arg7[%c0_131, %c12_132, %c0_133], %451 {strides = array<i32>} : memref<8x16x128xf32, #tpu.memory_space<vmem>>, vector<8x1x128xf32>,
    %c13 = arith.constant 13 : index
    %c0_134 = arith.constant 0 : index
    %c0_135 = arith.constant 0 : index
    %452 = vector.load %arg10[%c13, %c0_134, %c0_135] : memref<16x8x384xf32, #tpu.memory_space<vmem>>, vector<1x8x384xf32>
    %453 = vector.shape_cast %452 : vector<1x8x384xf32> to vector<8x384xf32>
    %cst_136 = arith.constant dense<0.000000e+00> : vector<8x384xf32>
    %454 = tpu.matmul %448, %12, %cst_136 {dimension_numbers = #tpu.dot_dimension_numbers<[1], [0], [0], [1], [0, 0, 1, 1], [], []>} : vector<8x128xf32>, vector<128x384xf32>, vector<8x384xf32> -> vector<8x384xf32>
    %455 = vector.extract_strided_slice %453 {offsets = [0, 0], sizes = [8, 128], strides = [1, 1]} : vector<8x384xf32> to vector<8x128xf32>
    %456 = vector.extract_strided_slice %453 {offsets = [0, 128], sizes = [8, 128], strides = [1, 1]} : vector<8x384xf32> to vector<8x128xf32>
    %457 = vector.extract_strided_slice %453 {offsets = [0, 256], sizes = [8, 128], strides = [1, 1]} : vector<8x384xf32> to vector<8x128xf32>
    %458 = vector.extract_strided_slice %454 {offsets = [0, 0], sizes = [8, 128], strides = [1, 1]} : vector<8x384xf32> to vector<8x128xf32>
    %459 = vector.extract_strided_slice %454 {offsets = [0, 128], sizes = [8, 128], strides = [1, 1]} : vector<8x384xf32> to vector<8x128xf32>
    %460 = vector.extract_strided_slice %454 {offsets = [0, 256], sizes = [8, 128], strides = [1, 1]} : vector<8x384xf32> to vector<8x128xf32>
    %461 = arith.addf %455, %458 : vector<8x128xf32>
    %462 = arith.negf %461 : vector<8x128xf32>
    %463 = math.exp %462 : vector<8x128xf32>
    %cst_137 = arith.constant 1.000000e+00 : f32
    %464 = vector.broadcast %cst_137 : f32 to vector<8x128xf32>
    %465 = arith.addf %464, %463 : vector<8x128xf32>
    %466 = arith.divf %464, %465 : vector<8x128xf32>
    %467 = arith.addf %456, %459 : vector<8x128xf32>
    %468 = arith.negf %467 : vector<8x128xf32>
    %469 = math.exp %468 : vector<8x128xf32>
    %cst_138 = arith.constant 1.000000e+00 : f32
    %470 = vector.broadcast %cst_138 : f32 to vector<8x128xf32>
    %471 = arith.addf %470, %469 : vector<8x128xf32>
    %472 = arith.divf %470, %471 : vector<8x128xf32>
    %473 = arith.addf %460, %15 : vector<8x128xf32>
    %474 = arith.mulf %466, %473 : vector<8x128xf32>
    %475 = arith.addf %457, %474 : vector<8x128xf32>
    %476 = math.tanh %475 : vector<8x128xf32>
    %cst_139 = arith.constant 1.000000e+00 : f32
    %477 = vector.broadcast %cst_139 : f32 to vector<8x128xf32>
    %478 = arith.subf %477, %472 : vector<8x128xf32>
    %479 = arith.mulf %478, %476 : vector<8x128xf32>
    %480 = arith.mulf %472, %448 : vector<8x128xf32>
    %481 = arith.addf %479, %480 : vector<8x128xf32>
    %482 = arith.select %16, %481, %448 : vector<8x128xf32>
    %c0_140 = arith.constant 0 : index
    %c13_141 = arith.constant 13 : index
    %c0_142 = arith.constant 0 : index
    %483 = vector.load %arg7[%c0_140, %c13_141, %c0_142] : memref<8x16x128xf32, #tpu.memory_space<vmem>>, vector<8x1x128xf32>
    %484 = vector.shape_cast %483 : vector<8x1x128xf32> to vector<8x128xf32>
    %485 = vector.shape_cast %482 : vector<8x128xf32> to vector<8x1x128xf32>
    tpu.vector_store %arg7[%c0_140, %c13_141, %c0_142], %485 {strides = array<i32>} : memref<8x16x128xf32, #tpu.memory_space<vmem>>, vector<8x1x128xf32>,
    %c14 = arith.constant 14 : index
    %c0_143 = arith.constant 0 : index
    %c0_144 = arith.constant 0 : index
    %486 = vector.load %arg10[%c14, %c0_143, %c0_144] : memref<16x8x384xf32, #tpu.memory_space<vmem>>, vector<1x8x384xf32>
    %487 = vector.shape_cast %486 : vector<1x8x384xf32> to vector<8x384xf32>
    %cst_145 = arith.constant dense<0.000000e+00> : vector<8x384xf32>
    %488 = tpu.matmul %482, %12, %cst_145 {dimension_numbers = #tpu.dot_dimension_numbers<[1], [0], [0], [1], [0, 0, 1, 1], [], []>} : vector<8x128xf32>, vector<128x384xf32>, vector<8x384xf32> -> vector<8x384xf32>
    %489 = vector.extract_strided_slice %487 {offsets = [0, 0], sizes = [8, 128], strides = [1, 1]} : vector<8x384xf32> to vector<8x128xf32>
    %490 = vector.extract_strided_slice %487 {offsets = [0, 128], sizes = [8, 128], strides = [1, 1]} : vector<8x384xf32> to vector<8x128xf32>
    %491 = vector.extract_strided_slice %487 {offsets = [0, 256], sizes = [8, 128], strides = [1, 1]} : vector<8x384xf32> to vector<8x128xf32>
    %492 = vector.extract_strided_slice %488 {offsets = [0, 0], sizes = [8, 128], strides = [1, 1]} : vector<8x384xf32> to vector<8x128xf32>
    %493 = vector.extract_strided_slice %488 {offsets = [0, 128], sizes = [8, 128], strides = [1, 1]} : vector<8x384xf32> to vector<8x128xf32>
    %494 = vector.extract_strided_slice %488 {offsets = [0, 256], sizes = [8, 128], strides = [1, 1]} : vector<8x384xf32> to vector<8x128xf32>
    %495 = arith.addf %489, %492 : vector<8x128xf32>
    %496 = arith.negf %495 : vector<8x128xf32>
    %497 = math.exp %496 : vector<8x128xf32>
    %cst_146 = arith.constant 1.000000e+00 : f32
    %498 = vector.broadcast %cst_146 : f32 to vector<8x128xf32>
    %499 = arith.addf %498, %497 : vector<8x128xf32>
    %500 = arith.divf %498, %499 : vector<8x128xf32>
    %501 = arith.addf %490, %493 : vector<8x128xf32>
    %502 = arith.negf %501 : vector<8x128xf32>
    %503 = math.exp %502 : vector<8x128xf32>
    %cst_147 = arith.constant 1.000000e+00 : f32
    %504 = vector.broadcast %cst_147 : f32 to vector<8x128xf32>
    %505 = arith.addf %504, %503 : vector<8x128xf32>
    %506 = arith.divf %504, %505 : vector<8x128xf32>
    %507 = arith.addf %494, %15 : vector<8x128xf32>
    %508 = arith.mulf %500, %507 : vector<8x128xf32>
    %509 = arith.addf %491, %508 : vector<8x128xf32>
    %510 = math.tanh %509 : vector<8x128xf32>
    %cst_148 = arith.constant 1.000000e+00 : f32
    %511 = vector.broadcast %cst_148 : f32 to vector<8x128xf32>
    %512 = arith.subf %511, %506 : vector<8x128xf32>
    %513 = arith.mulf %512, %510 : vector<8x128xf32>
    %514 = arith.mulf %506, %482 : vector<8x128xf32>
    %515 = arith.addf %513, %514 : vector<8x128xf32>
    %516 = arith.select %16, %515, %482 : vector<8x128xf32>
    %c0_149 = arith.constant 0 : index
    %c14_150 = arith.constant 14 : index
    %c0_151 = arith.constant 0 : index
    %517 = vector.load %arg7[%c0_149, %c14_150, %c0_151] : memref<8x16x128xf32, #tpu.memory_space<vmem>>, vector<8x1x128xf32>
    %518 = vector.shape_cast %517 : vector<8x1x128xf32> to vector<8x128xf32>
    %519 = vector.shape_cast %516 : vector<8x128xf32> to vector<8x1x128xf32>
    tpu.vector_store %arg7[%c0_149, %c14_150, %c0_151], %519 {strides = array<i32>} : memref<8x16x128xf32, #tpu.memory_space<vmem>>, vector<8x1x128xf32>,
    %c15 = arith.constant 15 : index
    %c0_152 = arith.constant 0 : index
    %c0_153 = arith.constant 0 : index
    %520 = vector.load %arg10[%c15, %c0_152, %c0_153] : memref<16x8x384xf32, #tpu.memory_space<vmem>>, vector<1x8x384xf32>
    %521 = vector.shape_cast %520 : vector<1x8x384xf32> to vector<8x384xf32>
    %cst_154 = arith.constant dense<0.000000e+00> : vector<8x384xf32>
    %522 = tpu.matmul %516, %12, %cst_154 {dimension_numbers = #tpu.dot_dimension_numbers<[1], [0], [0], [1], [0, 0, 1, 1], [], []>} : vector<8x128xf32>, vector<128x384xf32>, vector<8x384xf32> -> vector<8x384xf32>
    %523 = vector.extract_strided_slice %521 {offsets = [0, 0], sizes = [8, 128], strides = [1, 1]} : vector<8x384xf32> to vector<8x128xf32>
    %524 = vector.extract_strided_slice %521 {offsets = [0, 128], sizes = [8, 128], strides = [1, 1]} : vector<8x384xf32> to vector<8x128xf32>
    %525 = vector.extract_strided_slice %521 {offsets = [0, 256], sizes = [8, 128], strides = [1, 1]} : vector<8x384xf32> to vector<8x128xf32>
    %526 = vector.extract_strided_slice %522 {offsets = [0, 0], sizes = [8, 128], strides = [1, 1]} : vector<8x384xf32> to vector<8x128xf32>
    %527 = vector.extract_strided_slice %522 {offsets = [0, 128], sizes = [8, 128], strides = [1, 1]} : vector<8x384xf32> to vector<8x128xf32>
    %528 = vector.extract_strided_slice %522 {offsets = [0, 256], sizes = [8, 128], strides = [1, 1]} : vector<8x384xf32> to vector<8x128xf32>
    %529 = arith.addf %523, %526 : vector<8x128xf32>
    %530 = arith.negf %529 : vector<8x128xf32>
    %531 = math.exp %530 : vector<8x128xf32>
    %cst_155 = arith.constant 1.000000e+00 : f32
    %532 = vector.broadcast %cst_155 : f32 to vector<8x128xf32>
    %533 = arith.addf %532, %531 : vector<8x128xf32>
    %534 = arith.divf %532, %533 : vector<8x128xf32>
    %535 = arith.addf %524, %527 : vector<8x128xf32>
    %536 = arith.negf %535 : vector<8x128xf32>
    %537 = math.exp %536 : vector<8x128xf32>
    %cst_156 = arith.constant 1.000000e+00 : f32
    %538 = vector.broadcast %cst_156 : f32 to vector<8x128xf32>
    %539 = arith.addf %538, %537 : vector<8x128xf32>
    %540 = arith.divf %538, %539 : vector<8x128xf32>
    %541 = arith.addf %528, %15 : vector<8x128xf32>
    %542 = arith.mulf %534, %541 : vector<8x128xf32>
    %543 = arith.addf %525, %542 : vector<8x128xf32>
    %544 = math.tanh %543 : vector<8x128xf32>
    %cst_157 = arith.constant 1.000000e+00 : f32
    %545 = vector.broadcast %cst_157 : f32 to vector<8x128xf32>
    %546 = arith.subf %545, %540 : vector<8x128xf32>
    %547 = arith.mulf %546, %544 : vector<8x128xf32>
    %548 = arith.mulf %540, %516 : vector<8x128xf32>
    %549 = arith.addf %547, %548 : vector<8x128xf32>
    %550 = arith.select %16, %549, %516 : vector<8x128xf32>
    %c0_158 = arith.constant 0 : index
    %c15_159 = arith.constant 15 : index
    %c0_160 = arith.constant 0 : index
    %551 = vector.load %arg7[%c0_158, %c15_159, %c0_160] : memref<8x16x128xf32, #tpu.memory_space<vmem>>, vector<8x1x128xf32>
    %552 = vector.shape_cast %551 : vector<8x1x128xf32> to vector<8x128xf32>
    %553 = vector.shape_cast %550 : vector<8x128xf32> to vector<8x1x128xf32>
    tpu.vector_store %arg7[%c0_158, %c15_159, %c0_160], %553 {strides = array<i32>} : memref<8x16x128xf32, #tpu.memory_space<vmem>>, vector<8x1x128xf32>,
    %c0_161 = arith.constant 0 : index
    %c0_162 = arith.constant 0 : index
    %554 = vector.load %arg9[%c0_161, %c0_162] : memref<8x128xf32, #tpu.memory_space<vmem>>, vector<8x128xf32>
    tpu.vector_store %arg9[%c0_161, %c0_162], %550 {strides = array<i32>} : memref<8x128xf32, #tpu.memory_space<vmem>>, vector<8x128xf32>,
    %c0_163 = arith.constant 0 : index
    %c0_164 = arith.constant 0 : index
    %555 = vector.load %arg8[%c0_163, %c0_164] : memref<8x128xf32, #tpu.memory_space<vmem>>, vector<8x128xf32>
    tpu.vector_store %arg8[%c0_163, %c0_164], %550 {strides = array<i32>} : memref<8x128xf32, #tpu.memory_space<vmem>>, vector<8x128xf32>,
    return
  }
  func.func @transform_0(%arg0: i32, %arg1: i32) -> (i32, i32, i32) {
    %c0_i32 = arith.constant 0 : i32
    %c0_i32_0 = arith.constant 0 : i32
    return %arg1, %arg0, %c0_i32 : i32, i32, i32
  }
  func.func @transform_1(%arg0: i32, %arg1: i32) -> (i32, i32) {
    %c0_i32 = arith.constant 0 : i32
    %c0_i32_0 = arith.constant 0 : i32
    %c0_i32_1 = arith.constant 0 : i32
    return %c0_i32, %c0_i32_0 : i32, i32
  }
  func.func @transform_2(%arg0: i32, %arg1: i32) -> (i32, i32) {
    %c0_i32 = arith.constant 0 : i32
    %c0_i32_0 = arith.constant 0 : i32
    %c0_i32_1 = arith.constant 0 : i32
    return %c0_i32, %c0_i32_0 : i32, i32
  }
  func.func @transform_3(%arg0: i32, %arg1: i32) -> (i32, i32) {
    %c0_i32 = arith.constant 0 : i32
    %c0_i32_0 = arith.constant 0 : i32
    %c0_i32_1 = arith.constant 0 : i32
    return %c0_i32, %c0_i32_0 : i32, i32
  }
  func.func @transform_4(%arg0: i32, %arg1: i32) -> (i32, i32) {
    %c0_i32 = arith.constant 0 : i32
    %c0_i32_0 = arith.constant 0 : i32
    %c0_i32_1 = arith.constant 0 : i32
    return %c0_i32, %c0_i32_0 : i32, i32
  }
  func.func @transform_5(%arg0: i32, %arg1: i32) -> (i32, i32, i32) {
    %c0_i32 = arith.constant 0 : i32
    %c0_i32_0 = arith.constant 0 : i32
    return %arg0, %arg1, %c0_i32 : i32, i32, i32
  }
  func.func @transform_6(%arg0: i32, %arg1: i32) -> (i32, i32) {
    %c0_i32 = arith.constant 0 : i32
    %c0_i32_0 = arith.constant 0 : i32
    return %arg0, %c0_i32 : i32, i32
  }
}

</mosaic_0001>

<bundles_post_ra>
// kernel: encoder_rnn_forward.1
= control target key start
LH: loop header
LB: loop body
LE: loop exit
PB: predicated region body
PF: predicated region fallthrough
CT: control target
= control target key end

     0   :  { %s6186_s21 = smov 0   ;;  %s6188_s22 = smov 0   ;;  %s9033_s0 = inlined_call_operand.vmem [shape: f32[32,8,16], index: 0, kind: input, shape index: {}]   ;;  %s9034_s1 = inlined_call_operand.vmem [shape: f32[16,384], index: 1, kind: input, shape index: {}]   ;;  %s9035_s2 = inlined_call_operand.vmem [shape: f32[128,384], index: 2, kind: input, shape index: {}]   ;;  %s9036_s3 = inlined_call_operand.vmem [shape: f32[1,384], index: 3, kind: input, shape index: {}]   ;;  %s9037_s4 = inlined_call_operand.vmem [shape: f32[1,128], index: 4, kind: input, shape index: {}]   ;;  %s9038_s5 = inlined_call_operand.vmem [shape: f32[8,32,128], index: 5, kind: output, shape index: {0}]   ;;  %s9039_s6 = inlined_call_operand.vmem [shape: f32[8,128], index: 6, kind: output, shape index: {1}]  }
   0x1   :  { %s6190_s23 = smov 0   ;;  %s6192_s24 = smov 0  }
   0x2   :  { %s6194_s25 = smov 0  }
   0x3 LB: > { %s4729_s26 = sadd.s32 4294967295, %s6145_s25   ;;  %s26_s27 = sadd.s32 1, %s6141_s24  ;;  %s6145_s25 = sphi %s6194_s25, %s17_s25   ;;  %s6141_s24 = sphi %s6192_s24, %s9282_s24   ;;  %s6137_s23 = sphi %s6190_s23, %s9281_s23   ;;  %s6133_s22 = sphi %s6188_s22, %s9280_s22   ;;  %s6129_s21 = sphi %s6186_s21, %s9279_s21  }
   0x4   : > { %p27_p0 = scmp.ge.s32.totalorder %s26_s27, 2  ;;  %s150_s28 = sadd.s32 1, %s6133_s22 }
   0x5   : > { %p160_p1 = scmp.ne.s32.totalorder %s6133_s22, %s6129_s21  ;;  %p161_p2 = scmp.eq.s32.totalorder %s4729_s26, 1 }
   0x6   : > { %s9284_s27 = smov (%p27_p0, %s26_s27), 0  ;;  %p4733_p4 = scmp.ge.s32.totalorder %s6145_s25, 1 }
   0x7   : > { %p6215_p3 = por %p161_p2, %p160_p1  ;;  %s146_s30 = ssub.s32 %s6141_s24, %s9284_s27 }
   0x8   : > { %p235_p5 = scmp.lt.s32.totalorder %s6145_s25, 3  ;;  %p148_p6 = scmp.eq.s32.totalorder %s146_s30, 0 }
   0xa   : > { %p236_p7 = pnand %p4733_p4, %p235_p5 }
   0xb   : > { %s6224_s7 = scalar_select %p148_p6, %s6133_s22, %s150_s28  }
   0xc   : > { %239 = sbr.rel (%p236_p7) target bundleno = 4092 (0xffc), region = 40 }
  0x11   : > { %s262_s8 = sand.u32 1, %s6129_s21   ;;  %s6227_s9 = sshll.u32 %s6137_s23, 4 }
  0x12   : > { %s4734_s10 = sshll.u32 %s262_s8, 7  ;;  %p272_p8 = scmp.lt.s32.totalorder %s6227_s9, 31 }
  0x13   : > { %s6236_s16 = scalar_lea.vmem [#allocation4], %s4734_s10  ;;  %p4737_p9 = scmp.ne.s32.totalorder %s6137_s23, 0 }
  0x14   : > { %s273_s11 = scalar_select %p272_p8, %s6227_s9, 31 }
  0x15   : > { %289 = sbr.rel (%p4737_p9) target bundleno = 28 (0x1c), region = 44 }
  0x16   : > { %s4736_s12 = sshll.u32 %s273_s11, 3 }
  0x17   : > { %s6234_s15 = scalar_lea.vmem %s9033_s0, %s4736_s12 }
  0x1a   : > { %v6147_v0 = vmov 0.0  }
  0x1b   : > { %290 = vst [vmem:[#allocation2] sm:$0xff] %v6147_v0 }
  0x1c PF: > { %v311_v1 = vld [vmem:[%s9034_s1 + $0x20] sm:$0xff]  ;;  %v310_v2 = vld [vmem:[%s9034_s1 + $0x18] sm:$0xff]  ;;  %v308_v3 = vld [vmem:[%s9034_s1 + $0x8] sm:$0xff]  ;;  %v9040_v5 = vmov 0.0   ;;  %vm330_vm0 = vcmask 130048   ;;  %vm6149_vm1 = vmmov 0   ;;  %s8984_s19 = scalar_lea.vmem (%p6215_p3), %s9038_s5, %s6227_s9 }
  0x1d   : > { %5752 = vmatprep.subr.mxu1 %v311_v1  ;;  %v307_v4 = vld [vmem:[%s9034_s1] sm:$0xff]  ;;  %515 = vmatprep.mubr.f32.mxu1 %v9040_v5  ;;  %v312_v7 = vld [vmem:[%s9034_s1 + $0x28] sm:$0xff]  ;;  %v309_v8 = vld [vmem:[%s9034_s1 + $0x10] sm:$0xff]  ;;  %p788_p10 = scmp.ne.s32.totalorder %s6137_s23, 1 }
  0x1e   : > { %5754 = vmatpush1.msra.mxu1 %v310_v2  ;;  %v6253_v6 = vld [vmem:[%s6234_s15 + $0x60] sm:$0xff]  ;;  %407 = vmatprep.subr.mxu0 %v311_v1  ;;  %v6265_v9 = vld [vmem:[%s6234_s15 + $0x68] sm:$0xff]  ;;  %v6270_v10 = vld [vmem:[%s9035_s2 + $0x170] sm:$0xff] }
  0x1f   : > { %5753 = vmatprep.subr.mxu1 %v308_v3  ;;  %408 = vmatpush1.msra.mxu0 %v310_v2  ;;  %9100 = vst [vmem:[#allocation5_spill] sm:$0xff] %v6270_v10  ;;  %v291_v11 = vld [vmem:[%s6234_s15] sm:$0xff]  ;;  %v6279_v12 = vld [vmem:[%s6234_s15 + $0x70] sm:$0xff]  ;;  %v6287_v13 = vld [vmem:[%s9035_s2 + $0x178] sm:$0xff]  ;;  %s2820_s10 = scalar_select %p788_p10, 1, 0 }
  0x20   : > { %5755 = vmatpush1.msra.mxu1 %v307_v4  ;;  %409 = vmatprep.subr.mxu0 %v308_v3  ;;  %v292_v14 = vld [vmem:[%s6234_s15 + $0x8] sm:$0xff]  ;;  %v6295_v15 = vld [vmem:[%s6234_s15 + $0x78] sm:$0xff]  ;;  %v6301_v16 = vld [vmem:[%s9035_s2 + $0x160] sm:$0xff] }
  0x21   : > { %4750 = vmatmul.mubr.msk.f32.vlgmr.msra.gmra.mxu1 %vm330_vm0, %v6253_v6  ;;  %5164 = vmatprep.subr.mxu1 %v312_v7  ;;  %v6309_v17 = vld [vmem:[%s9035_s2 + $0x148] sm:$0xff]  ;;  %v293_v18 = vld [vmem:[%s6234_s15 + $0x10] sm:$0xff]  ;;  %v6332_v21 = vld [vmem:[%s9035_s2 + $0x158] sm:$0xff] }
  0x22   : > { %5165 = vmatpush3.msra.mxu1 %v312_v7  ;;  %521 = vmatprep.mubr.f32.mxu1 %v9040_v5  ;;  %v6320_v19 = vld [vmem:[%s9035_s2 + $0x130] sm:$0xff]  ;;  %v6325_v20 = vld [vmem:[%s9035_s2 + $0x168] sm:$0xff]  ;;  %v294_v23 = vld [vmem:[%s6234_s15 + $0x18] sm:$0xff] }
  0x23   : > { %5166 = vmatprep.subr.mxu1 %v309_v8  ;;  %410 = vmatpush1.msra.mxu0 %v307_v4  ;;  %v6339_v22 = vld [vmem:[%s9035_s2 + $0x150] sm:$0xff]  ;;  %v6348_v24 = vld [vmem:[%s9035_s2 + $0x140] sm:$0xff]  ;;  %v6354_v25 = vld [vmem:[%s9035_s2 + $0x138] sm:$0xff] }
  0x24   : > { %5167 = vmatpush3.msra.mxu1 %v309_v8  ;;  %443 = vmatprep.mubr.f32.mxu0 %v9040_v5  ;;  %v295_v26 = vld [vmem:[%s6234_s15 + $0x20] sm:$0xff]  ;;  %v6362_v27 = vld [vmem:[%s9035_s2 + $0x128] sm:$0xff]  ;;  %v6368_v28 = vld [vmem:[%s9035_s2 + $0x118] sm:$0xff] }
  0x25   : > { %4751 = vmatmul.mubr.msk.f32.gmra.mxu1 %vm330_vm0, %v6265_v9  ;;  %793 = vmatprep.subr.mxu1 %v6270_v10  ;;  %v6375_v29 = vld [vmem:[%s9035_s2 + $0x120] sm:$0xff]  ;;  %v296_v30 = vld [vmem:[%s6234_s15 + $0x28] sm:$0xff]  ;;  %v6383_v31 = vld [vmem:[%s9035_s2 + $0x110] sm:$0xff] }
  0x26   : > { %527 = vmatprep.mubr.f32.mxu1 %v9040_v5  ;;  %4738 = vmatmul.mubr.msk.f32.vlgmr.msra.gmra.mxu0 %vm330_vm0, %v291_v11  ;;  %v6389_v32 = vld [vmem:[%s9035_s2 + $0x108] sm:$0xff]  ;;  %v6392_v33 = vld [vmem:[%s6234_s15 + $0x30] sm:$0xff]  ;;  %v6399_v34 = vld [vmem:[%s9035_s2 + $0xf8] sm:$0xff] }
  0x27   : > { %5192 = vmatprep.subr.mxu0 %v9040_v5  ;;  %449 = vmatprep.mubr.f32.mxu0 %v9040_v5  ;;  %v6407_v35 = vld [vmem:[%s9035_s2 + $0xf0] sm:$0xff]  ;;  %v6413_v36 = vld [vmem:[%s6234_s15 + $0x38] sm:$0xff]  ;;  %v6418_v37 = vld [vmem:[%s9035_s2 + $0xe0] sm:$0xff] }
  0x28   : > { %5193 = vmatpush3.msra.mxu0 %v6287_v13  ;;  %v6424_v38 = vld [vmem:[%s9035_s2 + $0xd8] sm:$0xff]  ;;  %v6427_v39 = vld [vmem:[%s6234_s15 + $0x40] sm:$0xff]  ;;  %v6434_v40 = vld [vmem:[%s9035_s2 + $0xc8] sm:$0xff] }
  0x29   : > { %4752 = vmatmul.mubr.msk.f32.gmra.mxu1 %vm330_vm0, %v6279_v12  ;;  %5194 = vmatprep.subr.mxu0 %v9040_v5  ;;  %v6440_v41 = vld [vmem:[%s9035_s2 + $0x100] sm:$0xff]  ;;  %v6454_v43 = vld [vmem:[%s6234_s15 + $0x48] sm:$0xff]  ;;  %v6459_v44 = vld [vmem:[%s9035_s2 + $0xb0] sm:$0xff] }
  0x2a   : > { %533 = vmatprep.mubr.f32.mxu1 %v9040_v5  ;;  %4739 = vmatmul.mubr.msk.f32.gmra.mxu0 %vm330_vm0, %v292_v14  ;;  %v6448_v42 = vld [vmem:[%s9035_s2 + $0xc0] sm:$0xff]  ;;  %v6465_v45 = vld [vmem:[%s9035_s2 + $0xa8] sm:$0xff]  ;;  %v6468_v46 = vld [vmem:[%s6234_s15 + $0x50] sm:$0xff] }
  0x2b   : > { %455 = vmatprep.mubr.f32.mxu0 %v9040_v5  ;;  %5195 = vmatpush3.msra.mxu0 %v6301_v16  ;;  %v6475_v47 = vld [vmem:[%s9035_s2 + $0x98] sm:$0xff]  ;;  %v6484_v48 = vld [vmem:[%s9035_s2 + $0x90] sm:$0xff]  ;;  %v6495_v50 = vld [vmem:[%s9035_s2 + $0x80] sm:$0xff] }
  0x2c   : > { %5196 = vmatprep.subr.mxu0 %v9040_v5  ;;  %v6490_v49 = vld [vmem:[%s6234_s15 + $0x58] sm:$0xff]  ;;  %v6508_v52 = vld [vmem:[%s9035_s2 + $0x68] sm:$0xff]  ;;  %v6522_v54 = vld [vmem:[%s9035_s2 + $0x60] sm:$0xff] }
  0x2d   : > { %4753 = vmatmul.mubr.msk.f32.gmra.mxu1 %vm330_vm0, %v6295_v15  ;;  %5197 = vmatpush3.msra.mxu0 %v6309_v17  ;;  %v6501_v51 = vld [vmem:[%s9035_s2 + $0x78] sm:$0xff]  ;;  %v6514_v53 = vld [vmem:[%s9035_s2 + $0xe8] sm:$0xff]  ;;  %v6530_v55 = vld [vmem:[%s9035_s2 + $0x50] sm:$0xff] }
  0x2e   : > { %5168 = vmatprep.mubr.msk.f32.mxu1 %vm330_vm0, %v291_v11  ;;  %4740 = vmatmul.mubr.msk.f32.gmra.mxu0 %vm330_vm0, %v293_v18  ;;  %v6536_v56 = vld [vmem:[%s9035_s2 + $0x48] sm:$0xff]  ;;  %v6543_v57 = vld [vmem:[%s9035_s2 + $0x38] sm:$0xff]  ;;  %v6552_v58 = vld [vmem:[%s9035_s2 + $0x30] sm:$0xff] }
  0x2f   : > { %461 = vmatprep.mubr.f32.mxu0 %v9040_v5  ;;  %5198 = vmatprep.subr.mxu0 %v9040_v5  ;;  %v6557_v59 = vld [vmem:[%s9035_s2 + $0xd0] sm:$0xff]  ;;  %v6565_v60 = vld [vmem:[%s9035_s2 + $0x20] sm:$0xff]  ;;  %v6571_v61 = vld [vmem:[%s9035_s2 + $0x18] sm:$0xff] }
  0x30   : > { %5199 = vmatpush3.msra.mxu0 %v6320_v19  ;;  %9101 = vst [vmem:[#allocation6_spill] sm:$0xff] %v6565_v60  ;;  %9102 = vst [vmem:[#allocation7_spill] sm:$0xff] %v6571_v61  ;;  %v6578_v62 = vld [vmem:[%s9035_s2 + $0x8] sm:$0xff]  ;;  %v6587_v63 = vld [vmem:[%s9035_s2] sm:$0xff] }
  0x31   : > { %5169 = vmatmul.mubr.msk.f32.vlgmr.msra.gmra.mxu1 %vm330_vm0, %v292_v14  ;;  %5200 = vmatprep.subr.mxu0 %v9040_v5  ;;  %9103 = vst [vmem:[#allocation8_spill] sm:$0xff] %v6578_v62  ;;  %9104 = vst [vmem:[#allocation9_spill] sm:$0xff] %v6587_v63  ;;  %v6591_v0 = vld [vmem:[#allocation2] sm:$0xff]  ;;  %v6596_v1 = vld [vmem:[%s9035_s2 + $0xb8] sm:$0xff]  ;;  %v315_v14 = vlaneseq }
  0x32   : > { %794 = vmatpush1.msra.mxu1 %v6325_v20  ;;  %5171 = vmatprep.mubr.msk.f32.mxu1 %vm330_vm0, %v293_v18  ;;  %v6608_v2 = vld [vmem:[%s9035_s2 + $0xa0] sm:$0xff]  ;;  %v6617_v3 = vld [vmem:[%s9035_s2 + $0x88] sm:$0xff]  ;;  %v6626_v4 = vld [vmem:[%s9035_s2 + $0x70] sm:$0xff] }
  0x33   : > { %795 = vmatprep.subr.mxu1 %v6332_v21  ;;  %4741 = vmatmul.mubr.msk.f32.gmra.mxu0 %vm330_vm0, %v294_v23  ;;  %v6645_v7 = vld [vmem:[%s9035_s2 + $0x40] sm:$0xff]  ;;  %v6656_v8 = vld [vmem:[%s9035_s2 + $0x28] sm:$0xff] }
  0x34   : > { %796 = vmatpush1.msra.mxu1 %v6339_v22  ;;  %5201 = vmatpush3.msra.mxu0 %v6368_v28  ;;  %9105 = vst [vmem:[#allocation10_spill] sm:$0xff] %v6656_v8 }
  0x35   : > { %5172 = vmatmul.mubr.msk.f32.gmra.mxu1 %vm330_vm0, %v294_v23  ;;  %797 = vmatprep.subr.mxu1 %v6348_v24 }
  0x36   : > { %798 = vmatpush1.msra.mxu1 %v6354_v25  ;;  %5174 = vmatprep.mubr.msk.f32.mxu1 %vm330_vm0, %v295_v26 }
  0x37   : > { %799 = vmatprep.subr.mxu1 %v6362_v27  ;;  %467 = vmatprep.mubr.f32.mxu0 %v9040_v5 }
  0x38   : > { %800 = vmatpush1.msra.mxu1 %v6375_v29  ;;  %4742 = vmatmul.mubr.msk.f32.gmra.mxu0 %vm330_vm0, %v295_v26  ;;  %v6749_v26 = vshrl.u32 %v315_v14, 7 }
  0x39   : > { %5175 = vmatmul.mubr.msk.f32.gmra.mxu1 %vm330_vm0, %v296_v30  ;;  %801 = vmatprep.subr.mxu1 %v6383_v31 }
  0x3a   : > { %802 = vmatpush1.msra.mxu1 %v6389_v32  ;;  %5177 = vmatprep.mubr.msk.f32.mxu1 %vm330_vm0, %v6392_v33 }
  0x3b   : > { %803 = vmatprep.subr.mxu1 %v6399_v34  ;;  %5202 = vmatprep.subr.mxu0 %v9040_v5 }
  0x3c   : > { %804 = vmatpush1.msra.mxu1 %v6407_v35  ;;  %5203 = vmatpush3.msra.mxu0 %v6440_v41 }
  0x3d   : > { %5178 = vmatmul.mubr.msk.f32.gmra.mxu1 %vm330_vm0, %v6413_v36  ;;  %805 = vmatprep.subr.mxu1 %v6418_v37 }
  0x3e   : > { %806 = vmatpush1.msra.mxu1 %v6424_v38  ;;  %5180 = vmatprep.mubr.msk.f32.mxu1 %vm330_vm0, %v6427_v39 }
  0x3f   : > { %807 = vmatprep.subr.mxu1 %v6434_v40  ;;  %473 = vmatprep.mubr.f32.mxu0 %v9040_v5 }
  0x40   : > { %808 = vmatpush1.msra.mxu1 %v6448_v42  ;;  %5204 = vmatprep.subr.mxu0 %v9040_v5 }
  0x41   : > { %5181 = vmatmul.mubr.msk.f32.gmra.mxu1 %vm330_vm0, %v6454_v43  ;;  %809 = vmatprep.subr.mxu1 %v6459_v44 }
  0x42   : > { %810 = vmatpush1.msra.mxu1 %v6465_v45  ;;  %5183 = vmatprep.mubr.msk.f32.mxu1 %vm330_vm0, %v6468_v46 }
  0x43   : > { %811 = vmatprep.subr.mxu1 %v6475_v47  ;;  %4743 = vmatmul.mubr.msk.f32.gmra.mxu0 %vm330_vm0, %v296_v30 }
  0x44   : > { %812 = vmatpush1.msra.mxu1 %v6484_v48  ;;  %5205 = vmatpush3.msra.mxu0 %v6514_v53 }
  0x45   : > { %5184 = vmatmul.mubr.msk.f32.gmra.mxu1 %vm330_vm0, %v6490_v49  ;;  %813 = vmatprep.subr.mxu1 %v6495_v50 }
  0x46   : > { %814 = vmatpush1.msra.mxu1 %v6501_v51  ;;  %5186 = vmatprep.mubr.msk.f32.mxu1 %vm330_vm0, %v6253_v6  ;;  %v6637_v6 = vld [vmem:[%s9035_s2 + $0x58] sm:$0xff] }
  0x47   : > { %815 = vmatprep.subr.mxu1 %v6508_v52  ;;  %5206 = vmatprep.subr.mxu0 %v9040_v5 }
  0x48   : > { %816 = vmatpush1.msra.mxu1 %v6522_v54  ;;  %479 = vmatprep.mubr.f32.mxu0 %v9040_v5 }
  0x49   : > { %5187 = vmatmul.mubr.msk.f32.gmra.mxu1 %vm330_vm0, %v6265_v9  ;;  %817 = vmatprep.subr.mxu1 %v6530_v55  ;;  %v6664_v9 = vld [vmem:[%s9035_s2 + $0x10] sm:$0xff] }
  0x4a   : > { %818 = vmatpush1.msra.mxu1 %v6536_v56  ;;  %5189 = vmatprep.mubr.msk.f32.mxu1 %vm330_vm0, %v6279_v12  ;;  %9106 = vst [vmem:[#allocation11_spill] sm:$0xff] %v6664_v9 }
  0x4b   : > { %819 = vmatprep.subr.mxu1 %v6543_v57  ;;  %5207 = vmatpush3.msra.mxu0 %v6557_v59 }
  0x4c   : > { %820 = vmatpush1.msra.mxu1 %v6552_v58  ;;  %4744 = vmatmul.mubr.msk.f32.gmra.mxu0 %vm330_vm0, %v6392_v33 }
  0x4d   : > { %5190 = vmatmul.mubr.msk.f32.gmra.mxu1 %vm330_vm0, %v6295_v15  ;;  %821 = vmatprep.subr.mxu1 %v6565_v60 }
  0x4e   : > { %822 = vmatpush1.msra.mxu1 %v6571_v61  ;;  %857 = vmatprep.mubr.f32.mxu1 %v9040_v5 }
  0x4f   : > { %823 = vmatprep.subr.mxu1 %v6578_v62  ;;  %5208 = vmatprep.subr.mxu0 %v9040_v5 }
  0x50   : > { %824 = vmatpush1.msra.mxu1 %v6587_v63  ;;  %5209 = vmatpush3.msra.mxu0 %v6596_v1 }
  0x51   : > { %858 = vmatmul.mubr.f32.vlgmr.msra.gmra.mxu1 %v6591_v0  ;;  %485 = vmatprep.mubr.f32.mxu0 %v9040_v5 }
  0x52   : > { %5210 = vmatprep.subr.mxu0 %v9040_v5  ;;  %4745 = vmatmul.mubr.msk.f32.gmra.mxu0 %vm330_vm0, %v6413_v36  ;;  %v325_v36 = vsub.s32 2, %v6749_v26 }
  0x53   : > { %1026 = vmatprep.subr.mxu1 %v6270_v10  ;;  %5211 = vmatpush3.msra.mxu0 %v6608_v2 }
  0x54   : > { %491 = vmatprep.mubr.f32.mxu0 %v9040_v5  ;;  %5212 = vmatprep.subr.mxu0 %v9040_v5 }
  0x55   : > { %1027 = vmatpush1.msra.mxu1 %v6325_v20  ;;  %5213 = vmatpush3.msra.mxu0 %v6617_v3 }
  0x56   : > { %1028 = vmatprep.subr.mxu1 %v6332_v21  ;;  %4746 = vmatmul.mubr.msk.f32.gmra.mxu0 %vm330_vm0, %v6427_v39 }
  0x57   : > { %5214 = vmatprep.subr.mxu0 %v9040_v5  ;;  %497 = vmatprep.mubr.f32.mxu0 %v9040_v5 }
  0x58   : > { %5215 = vmatpush3.msra.mxu0 %v6626_v4  ;;  %1029 = vmatpush1.msra.mxu1 %v6339_v22 }
  0x59   : > { %5216 = vmatprep.subr.mxu0 %v9040_v5  ;;  %1030 = vmatprep.subr.mxu1 %v6348_v24 }
  0x5a   : > { %5217 = vmatpush3.msra.mxu0 %v6637_v6  ;;  %1031 = vmatpush1.msra.mxu1 %v6354_v25 }
  0x5b   : > { %4747 = vmatmul.mubr.msk.f32.gmra.mxu0 %vm330_vm0, %v6454_v43  ;;  %5218 = vmatprep.subr.mxu0 %v9040_v5 }
  0x5c   : > { %503 = vmatprep.mubr.f32.mxu0 %v9040_v5  ;;  %5219 = vmatpush3.msra.mxu0 %v6645_v7 }
  0x5d   : > { %5220 = vmatprep.subr.mxu0 %v9040_v5  ;;  %1032 = vmatprep.subr.mxu1 %v6362_v27 }
  0x5e   : > { %5221 = vmatpush3.msra.mxu0 %v6656_v8  ;;  %1033 = vmatpush1.msra.mxu1 %v6375_v29 }
  0x5f   : > { %4748 = vmatmul.mubr.msk.f32.gmra.mxu0 %vm330_vm0, %v6468_v46  ;;  %5222 = vmatprep.subr.mxu0 %v9040_v5 }
  0x60   : > { %509 = vmatprep.mubr.f32.mxu0 %v9040_v5  ;;  %5223 = vmatpush3.msra.mxu0 %v6664_v9 }
  0x61   : > { %5227 = vmatprep.subr.mxu0 %v9040_v5  ;;  %1034 = vmatprep.subr.mxu1 %v6383_v31 }
  0x62   : > { %1090 = vmatprep.mubr.f32.mxu1 %v9040_v5  ;;  %1035 = vmatpush1.msra.mxu1 %v6389_v32 }
  0x63   : > { %4749 = vmatmul.mubr.msk.f32.gmra.mxu0 %vm330_vm0, %v6490_v49  ;;  %1036 = vmatprep.subr.mxu1 %v6399_v34  ;;  %v313_v49 = vld [vmem:[%s9036_s3] sm:$0x7] }
  0x64   : > { %5224 = vmatprep.mubr.msk.f32.mxu0 %vm6149_vm1, %v9040_v5  ;;  %1037 = vmatpush1.msra.mxu1 %v6407_v35 }
  0x65   : > { %1038 = vmatprep.subr.mxu1 %v6418_v37 }
  0x66   : > { %1039 = vmatpush1.msra.mxu1 %v6424_v38 }
  0x67   : > { %5225 = vmatmul.mubr.f32.vlgmr.msra.gmra.mxu0 %v6591_v0  ;;  %1040 = vmatprep.subr.mxu1 %v6434_v40 }
  0x68   : > { %5228 = vmatpush3.msra.mxu0 %v6287_v13  ;;  %1041 = vmatpush1.msra.mxu1 %v6448_v42 }
  0x69   : > { %5229 = vmatprep.subr.mxu0 %v9040_v5  ;;  %1042 = vmatprep.subr.mxu1 %v6459_v44 }
  0x6a   : > { %5230 = vmatpush3.msra.mxu0 %v6301_v16  ;;  %1043 = vmatpush1.msra.mxu1 %v6465_v45 }
  0x6b   : > { %5231 = vmatprep.subr.mxu0 %v9040_v5  ;;  %1044 = vmatprep.subr.mxu1 %v6475_v47 }
  0x6c   : > { %5232 = vmatpush3.msra.mxu0 %v6309_v17  ;;  %1045 = vmatpush1.msra.mxu1 %v6484_v48 }
  0x6d   : > { %5233 = vmatprep.subr.mxu0 %v9040_v5  ;;  %1046 = vmatprep.subr.mxu1 %v6495_v50 }
  0x6e   : > { %5234 = vmatpush3.msra.mxu0 %v6320_v19  ;;  %1047 = vmatpush1.msra.mxu1 %v6501_v51 }
  0x6f   : > { %5235 = vmatprep.subr.mxu0 %v9040_v5  ;;  %1048 = vmatprep.subr.mxu1 %v6508_v52 }
  0x70   : > { %5236 = vmatpush3.msra.mxu0 %v6368_v28  ;;  %1049 = vmatpush1.msra.mxu1 %v6522_v54 }
  0x71   : > { %5237 = vmatprep.subr.mxu0 %v9040_v5  ;;  %1050 = vmatprep.subr.mxu1 %v6530_v55 }
  0x72   : > { %5238 = vmatpush3.msra.mxu0 %v6440_v41  ;;  %1051 = vmatpush1.msra.mxu1 %v6536_v56 }
  0x73   : > { %5239 = vmatprep.subr.mxu0 %v9040_v5  ;;  %1052 = vmatprep.subr.mxu1 %v6543_v57 }
  0x74   : > { %5240 = vmatpush3.msra.mxu0 %v6514_v53  ;;  %1053 = vmatpush1.msra.mxu1 %v6552_v58 }
  0x75   : > { %5241 = vmatprep.subr.mxu0 %v9040_v5  ;;  %1054 = vmatprep.subr.mxu1 %v6565_v60 }
  0x76   : > { %5242 = vmatpush3.msra.mxu0 %v6557_v59  ;;  %1055 = vmatpush1.msra.mxu1 %v6571_v61 }
  0x77   : > { %5243 = vmatprep.subr.mxu0 %v9040_v5  ;;  %1056 = vmatprep.subr.mxu1 %v6578_v62 }
  0x78   : > { %5244 = vmatpush3.msra.mxu0 %v6596_v1  ;;  %1057 = vmatpush1.msra.mxu1 %v6587_v63 }
  0x79   : > { %5245 = vmatprep.subr.mxu0 %v9040_v5  ;;  %5259 = vmatprep.mubr.msk.f32.mxu0 %vm6149_vm1, %v9040_v5 }
  0x7a   : > { %5246 = vmatpush3.msra.mxu0 %v6608_v2  ;;  %1259 = vmatprep.subr.mxu1 %v6270_v10 }
  0x7b   : > { %5247 = vmatprep.subr.mxu0 %v9040_v5 }
  0x7c   : > { %5248 = vmatpush3.msra.mxu0 %v6617_v3 }
  0x7d   : > { %5249 = vmatprep.subr.mxu0 %v9040_v5 }
  0x7e   : > { %5250 = vmatpush3.msra.mxu0 %v6626_v4 }
  0x7f   : > { %5251 = vmatprep.subr.mxu0 %v9040_v5 }
  0x80   : > { %5252 = vmatpush3.msra.mxu0 %v6637_v6 }
  0x81   : > { %5253 = vmatprep.subr.mxu0 %v9040_v5 }
  0x82   : > { %5254 = vmatpush3.msra.mxu0 %v6645_v7 }
  0x83   : > { %5255 = vmatprep.subr.mxu0 %v9040_v5 }
  0x84   : > { %5256 = vmatpush3.msra.mxu0 %v6656_v8 }
  0x85   : > { %5257 = vmatprep.subr.mxu0 %v9040_v5 }
  0x86   : > { %5258 = vmatpush3.msra.mxu0 %v6664_v9 }
  0x87   : > { %5262 = vmatprep.subr.mxu0 %v9040_v5 }
  0xe1   : > { %v6741_v11 = vpop.f32.mrf.mxu1 }
  0xe2   : > { %9107 = vst [vmem:[#allocation12_spill] sm:$0xff] %v6741_v11 }
  0xe3   : > { %v6743_v12 = vpop.f32.mrf.mxu1 }
  0xe4   : > { %9108 = vst [vmem:[#allocation13_spill] sm:$0xff] %v6743_v12 }
  0xe5   : > { %v6745_v15 = vpop.f32.mrf.mxu1 }
  0xe6   : > { %9109 = vst [vmem:[#allocation14_spill] sm:$0xff] %v6745_v15  ;;  %v445_v18 = vpop.f32.mrf.mxu0 }
  0xe7   : > { %v6747_v23 = vpop.f32.mrf.mxu1 }
  0xe8   : > { %9110 = vst [vmem:[#allocation15_spill] sm:$0xff] %v6747_v23  ;;  %v447_v30 = vpop.f32.mrf.mxu0  ;;  %v6765_v23 = vrot.slane %v313_v49, %v325_v36 }
  0xe9   : > { %v6751_v33 = vpop.f32.mrf.mxu1 }
  0xea   : > { %9111 = vst [vmem:[#allocation16_spill] sm:$0xff] %v6751_v33  ;;  %v6754_v39 = vpop.f32.mrf.mxu0 }
  0xeb   : > { %9112 = vst [vmem:[#allocation17_spill] sm:$0xff] %v6754_v39  ;;  %v6756_v43 = vpop.f32.mrf.mxu1 }
  0xec   : > { %9113 = vst [vmem:[#allocation18_spill] sm:$0xff] %v6756_v43  ;;  %v6758_v46 = vpop.f32.mrf.mxu0 }
  0xed   : > { %9114 = vst [vmem:[#allocation19_spill] sm:$0xff] %v6758_v46  ;;  %v6763_v5 = vpop.f32.mrf.mxu1 }
  0xee   : > { %9115 = vst [vmem:[#allocation20_spill] sm:$0xff] %v6763_v5  ;;  %v6769_v15 = vpop.f32.mrf.mxu0 }
  0xef   : > { %v6767_v14 = vpop.f32.mrf.mxu1  ;;  %9117 = vst [vmem:[#allocation22_spill] sm:$0xff] %v6769_v15 }
  0xf0   : > { %9116 = vst [vmem:[#allocation21_spill] sm:$0xff] %v6767_v14  ;;  %v6776_v43 = vpop.f32.mrf.mxu0 }
  0xf1   : > { %v5170_v33 = vpop.f32.mrf.mxu1  ;;  %9119 = vst [vmem:[#allocation24_spill] sm:$0xff] %v6776_v43 }
  0xf2   : > { %v6772_v12 = vadd.f32 %v5170_v33, %v6765_v23 }
  0xf3   : > { %v6774_v11 = vpop.f32.mrf.mxu1  ;;  %v6781_v5 = vpop.f32.mrf.mxu0 }
  0xf4   : > { %9118 = vst [vmem:[#allocation23_spill] sm:$0xff] %v6772_v12  ;;  %9121 = vst [vmem:[#allocation26_spill] sm:$0xff] %v6781_v5 }
  0xf5   : > { %v5173_v46 = vpop.f32.mrf.mxu1  ;;  %v6789_v12 = vpop.f32.mrf.mxu0 }
  0xf6   : > { %v6779_v39 = vadd.f32 %v5173_v46, %v6765_v23  ;;  %9124 = vst [vmem:[#allocation29_spill] sm:$0xff] %v6789_v12 }
  0xf7   : > { %v616_v10 = vpop.f32.mrf.mxu1 }
  0xf8   : > { %9120 = vst [vmem:[#allocation25_spill] sm:$0xff] %v6779_v39  ;;  %v6784_v36 = vadd.f32 %v616_v10, %v6765_v23  ;;  %v6797_v63 = vpop.f32.mrf.mxu0 }
  0xf9   : > { %v5176_v14 = vpop.f32.mrf.mxu1  ;;  %9127 = vst [vmem:[#allocation32_spill] sm:$0xff] %v6797_v63 }
  0xfa   : > { %9122 = vst [vmem:[#allocation27_spill] sm:$0xff] %v6784_v36  ;;  %v6787_v15 = vadd.f32 %v5176_v14, %v6765_v23  ;;  %v6805_v36 = vpop.f32.mrf.mxu0 }
  0xfb   : > { %v626_v33 = vpop.f32.mrf.mxu1  ;;  %9130 = vst [vmem:[#allocation35_spill] sm:$0xff] %v6805_v36 }
  0xfc   : > { %9123 = vst [vmem:[#allocation28_spill] sm:$0xff] %v6787_v15  ;;  %v6792_v9 = vadd.f32 %v626_v33, %v6765_v23 }
  0xfd   : > { %v5179_v43 = vpop.f32.mrf.mxu1 }
  0xfe   : > { %9125 = vst [vmem:[#allocation30_spill] sm:$0xff] %v6792_v9  ;;  %v6795_v46 = vadd.f32 %v5179_v43, %v6765_v23 }
  0xff   : > { %v636_v39 = vpop.f32.mrf.mxu1 }
 0x100   : > { %9126 = vst [vmem:[#allocation31_spill] sm:$0xff] %v6795_v46  ;;  %v6800_v10 = vadd.f32 %v636_v39, %v6765_v23 }
 0x101   : > { %v5182_v5 = vpop.f32.mrf.mxu1 }
 0x102   : > { %9128 = vst [vmem:[#allocation33_spill] sm:$0xff] %v6800_v10  ;;  %v6803_v14 = vadd.f32 %v5182_v5, %v6765_v23  ;;  %v317_v5 = vsub.s32 0, %v6749_v26 }
 0x103   : > { %v646_v15 = vpop.f32.mrf.mxu1  ;;  %v6813_v12 = vpop.f32.mrf.mxu0 }
 0x104   : > { %9129 = vst [vmem:[#allocation34_spill] sm:$0xff] %v6803_v14  ;;  %v6808_v33 = vadd.f32 %v646_v15, %v6765_v23  ;;  %9133 = vst [vmem:[#allocation38_spill] sm:$0xff] %v6813_v12  ;;  %v321_v12 = vsub.s32 1, %v6749_v26 }
 0x105   : > { %v5185_v9 = vpop.f32.mrf.mxu1  ;;  %v6822_v63 = vpop.f32.mrf.mxu0 }
 0x106   : > { %9131 = vst [vmem:[#allocation36_spill] sm:$0xff] %v6808_v33  ;;  %v6811_v43 = vadd.f32 %v5185_v9, %v6765_v23  ;;  %9136 = vst [vmem:[#allocation41_spill] sm:$0xff] %v6822_v63 }
 0x107   : > { %v656_v46 = vpop.f32.mrf.mxu1 }
 0x108   : > { %9132 = vst [vmem:[#allocation37_spill] sm:$0xff] %v6811_v43  ;;  %v6816_v39 = vadd.f32 %v656_v46, %v6765_v23  ;;  %v6827_v43 = vrot.slane %v313_v49, %v317_v5  ;;  %v6843_v5 = vrot.slane %v313_v49, %v321_v12 }
 0x109   : > { %v5188_v10 = vpop.f32.mrf.mxu1 }
 0x10a   : > { %9134 = vst [vmem:[#allocation39_spill] sm:$0xff] %v6816_v39  ;;  %v6820_v14 = vadd.f32 %v5188_v10, %v6765_v23  ;;  %9138 = vst [vmem:[#allocation43_spill] sm:$0xff] %v6827_v43  ;;  %v446_v10 = vadd.f32 %v445_v18, %v6827_v43 }
 0x10b   : > { %v666_v36 = vpop.f32.mrf.mxu1 }
 0x10c   : > { %9135 = vst [vmem:[#allocation40_spill] sm:$0xff] %v6820_v14  ;;  %v6825_v15 = vadd.f32 %v666_v36, %v6765_v23  ;;  %v6832_v39 = vpop.f32.mrf.mxu0 }
 0x10d   : > { %v5191_v9 = vpop.f32.mrf.mxu1  ;;  %9140 = vst [vmem:[#allocation45_spill] sm:$0xff] %v6832_v39  ;;  %v448_v39 = vadd.f32 %v447_v30, %v6843_v5 }
 0x10e   : > { %9137 = vst [vmem:[#allocation42_spill] sm:$0xff] %v6825_v15  ;;  %v6830_v33 = vadd.f32 %v5191_v9, %v6765_v23  ;;  %v6839_v62 = vpop.f32.mrf.mxu0 }
 0x10f   : > { %v676_v46 = vpop.f32.mrf.mxu1  ;;  %9142 = vst [vmem:[#allocation47_spill] sm:$0xff] %v6839_v62 }
 0x110   : > { %9139 = vst [vmem:[#allocation44_spill] sm:$0xff] %v6830_v33  ;;  %v6837_v14 = vadd.f32 %v676_v46, %v6765_v23 }
 0x111   : > { %v859_v63 = vpop.f32.mrf.mxu1 }
 0x112   : > { %9141 = vst [vmem:[#allocation46_spill] sm:$0xff] %v6837_v14  ;;  %v934_v36 = vadd.f32 %v859_v63, %v446_v10  ;;  %v6841_v15 = vpop.f32.mrf.mxu0 }
 0x113   : > { %9143 = vst [vmem:[#allocation48_spill] sm:$0xff] %v6841_v15  ;;  %v861_v33 = vpop.f32.mrf.mxu1 }
 0x114   : > { %v4771_v9 = vmul.f32 -1.442695, %v934_v36  ;;  %v6845_v8 = vpop.f32.mrf.mxu0  ;;  %v941_v18 = vadd.f32 %v861_v33, %v448_v39 }
 0x115   : > { %9144 = vst [vmem:[#allocation49_spill] sm:$0xff] %v6845_v8 }
 0x116   : > { %5800 = vpow2.f32 %v4771_v9  ;;  %v6848_v61 = vpop.f32.mrf.mxu0  ;;  %v4772_v62 = vmul.f32 -1.442695, %v941_v18  ;;  %v6867_v18 = vld [vmem:[%s9037_s4] ss:$0 sm:$0xff] }
 0x117   : > { %9145 = vst [vmem:[#allocation50_spill] sm:$0xff] %v6848_v61  ;;  %9153 = vst [vmem:[#allocation58_spill] sm:$0xff] %v6867_v18 }
 0x118   : > { %v6850_v46 = vpop.f32.mrf.mxu0  ;;  %5802 = vpow2.f32 %v4772_v62 }
 0x119   : > { %9146 = vst [vmem:[#allocation51_spill] sm:$0xff] %v6850_v46 }
 0x11b   : > { %v6852_v14 = vpop.f32.mrf.mxu0 }
 0x11c   : > { %9147 = vst [vmem:[#allocation52_spill] sm:$0xff] %v6852_v14 }
 0x11d   : > { %v6854_v63 = vpop.f32.mrf.mxu0 }
 0x11e   : > { %9148 = vst [vmem:[#allocation53_spill] sm:$0xff] %v6854_v63 }
 0x11f   : > { %v6856_v10 = vpop.f32.mrf.mxu0 }
 0x120   : > { %9149 = vst [vmem:[#allocation54_spill] sm:$0xff] %v6856_v10 }
 0x121   : > { %v6858_v12 = vpop.f32.mrf.mxu0 }
 0x122   : > { %9150 = vst [vmem:[#allocation55_spill] sm:$0xff] %v6858_v12  ;;  %v607_v12 = vadd.f32 %v6774_v11, %v6765_v23 }
 0x123   : > { %v5801_v49 = vpop.eup %5800  ;;  %v6860_v36 = vpop.f32.mrf.mxu0 }
 0x124   : > { %9151 = vst [vmem:[#allocation56_spill] sm:$0xff] %v6860_v36  ;;  %v938_v30 = vadd.f32 1.0, %v5801_v49 }
 0x125   : > { %v6862_v9 = vpop.f32.mrf.mxu0  ;;  %v5803_v46 = vpop.eup %5802 }
 0x126   : > { %9152 = vst [vmem:[#allocation57_spill] sm:$0xff] %v6862_v9  ;;  %5804 = vrcp.f32 %v938_v30  ;;  %v945_v63 = vadd.f32 1.0, %v5803_v46  ;;  %v6150_v30 = vmov 1966171168  }
 0x127   : > { %v930_v33 = vpop.f32.mrf.mxu0  ;;  %v959_v9 = vunpack.c.l.s4 %v6150_v30  ;;  %v9155_v30 = vld [vmem:[#allocation7_spill] sm:$0xff] }
 0x128   : > { %v948_v62 = vadd.f32 %v6867_v18, %v930_v33  ;;  %5806 = vrcp.f32 %v945_v63 }
 0x129   : > { %v5226_v39 = vpop.f32.mrf.mxu0  ;;  %v960_v14 = vunpack.c.0.s8 %v959_v9 }
 0x12b   : > { %v6873_v15 = vsub.s32 %v960_v14, %v6749_v26  ;;  %v9154_v26 = vmov 0.0  }
 0x133   : > { %v5805_v10 = vpop.eup %5804 }
 0x134   : > { %v949_v49 = vmul.f32 %v5805_v10, %v948_v62 }
 0x135   : > { %v5807_v39 = vpop.eup %5806 }
 0x136   : > { %v950_v36 = vadd.f32 %v949_v49, %v607_v12  ;;  %v952_v61 = vsub.f32 1.0, %v5807_v39  ;;  %v954_v33 = vmul.f32 %v5807_v39, %v6591_v0  ;;  %v9156_v39 = vld [vmem:[#allocation10_spill] sm:$0xff] }
 0x138   : > { %5808 = vtanh.f32 %v950_v36 }
 0x145   : > { %v5809_v8 = vpop.eup %5808 }
 0x146   : > { %v953_v46 = vmul.f32 %v5809_v8, %v952_v61 }
 0x148   : > { %v6876_v18 = vadd.f32 %v954_v33, %v953_v46  ;;  %v9157_v46 = vld [vmem:[#allocation8_spill] sm:$0xff]  ;;  %v9158_v33 = vld [vmem:[#allocation9_spill] sm:$0xff] }
 0x14a   : > { %v957_v11 = vcombine.high %v6876_v18, %v6876_v18  ;;  %v964_v23 = vrot.slane %v6876_v18, %v6873_v15  ;;  %1091 = vmatmul.mubr.f32.vlgmr.msra.gmra.mxu1 %v6876_v18  ;;  %5260 = vmatmul.mubr.f32.vlgmr.msra.gmra.mxu0 %v6876_v18 }
 0x14b   : > { %1260 = vmatpush1.msra.mxu1 %v6325_v20  ;;  %5263 = vmatpush3.msra.mxu0 %v6287_v13 }
 0x14c   : > { %v971_v61 = vrot.slane %v957_v11, %v6873_v15  ;;  %v972_v0 = vcombine.high %v964_v23, %v964_v23  ;;  %v980_v8 = vrot.slane %v964_v23, %v6873_v15  ;;  %4773 = vst.sshfl [vmem:[%s6236_s16] sm:$0x1 pattern:$0x73625140] %v964_v23  ;;  %1261 = vmatprep.subr.mxu1 %v6332_v21  ;;  %v9159_v11 = vld [vmem:[#allocation11_spill] sm:$0xff]  ;;  %v9160_v23 = vld [vmem:[#allocation5_spill] sm:$0xff] }
 0x14d   : > { %5264 = vmatprep.subr.mxu0 %v9154_v26  ;;  %1262 = vmatpush1.msra.mxu1 %v6339_v22 }
 0x14e   : > { %5265 = vmatpush3.msra.mxu0 %v6301_v16  ;;  %v973_v14 = vcombine.high %v971_v61, %v971_v61  ;;  %v987_v63 = vrot.slane %v971_v61, %v6873_v15  ;;  %v994_v10 = vrot.slane %v972_v0, %v6873_v15  ;;  %v1002_v12 = vcombine.high %v980_v8, %v980_v8 }
 0x14f   : > { %4774 = vst.sshfl [vmem:[%s6236_s16 + $0x10] sm:$0x1 pattern:$0x73625140] %v972_v0  ;;  %1263 = vmatprep.subr.mxu1 %v6348_v24  ;;  %5266 = vmatprep.subr.mxu0 %v9154_v26 }
 0x150   : > { %4775 = vst.sshfl [vmem:[%s6236_s16 + $0x40] sm:$0x1 pattern:$0x73625140] %v971_v61  ;;  %1264 = vmatpush1.msra.mxu1 %v6354_v25  ;;  %v1001_v36 = vrot.slane %v973_v14, %v6873_v15  ;;  %v1003_v9 = vcombine.high %v987_v63, %v987_v63  ;;  %v1004_v62 = vcombine.high %v994_v10, %v994_v10  ;;  %1016 = vst [vmem:[%s6236_s16 + $0x20] sm:$0x1] %v1002_v12 }
 0x151   : > { %4776 = vst.sshfl [vmem:[%s6236_s16 + $0x50] sm:$0x1 pattern:$0x73625140] %v973_v14  ;;  %5267 = vmatpush3.msra.mxu0 %v6309_v17  ;;  %1265 = vmatprep.subr.mxu1 %v6362_v27  ;;  %v9161_v61 = vld [vmem:[#allocation17_spill] sm:$0xff] }
 0x152   : > { %5268 = vmatprep.subr.mxu0 %v9154_v26  ;;  %1266 = vmatpush1.msra.mxu1 %v6375_v29  ;;  %v1005_v49 = vcombine.high %v1001_v36, %v1001_v36  ;;  %1017 = vst [vmem:[%s6236_s16 + $0x30] sm:$0x1] %v1004_v62  ;;  %1020 = vst [vmem:[%s6236_s16 + $0x60] sm:$0x1] %v1003_v9  ;;  %v452_v0 = vadd.f32 %v9161_v61, %v6827_v43  ;;  %v9162_v9 = vld [vmem:[#allocation19_spill] sm:$0xff] }
 0x153   : > { %5269 = vmatpush3.msra.mxu0 %v6320_v19  ;;  %1267 = vmatprep.subr.mxu1 %v6383_v31  ;;  %v454_v62 = vadd.f32 %v9162_v9, %v6843_v5 }
 0x154   : > { %5270 = vmatprep.subr.mxu0 %v9154_v26  ;;  %1268 = vmatpush1.msra.mxu1 %v6389_v32  ;;  %1021 = vst [vmem:[%s6236_s16 + $0x70] sm:$0x1] %v1005_v49 }
 0x155   : > { %5271 = vmatpush3.msra.mxu0 %v6368_v28  ;;  %1269 = vmatprep.subr.mxu1 %v6399_v34 }
 0x156   : > { %5272 = vmatprep.subr.mxu0 %v9154_v26  ;;  %1270 = vmatpush1.msra.mxu1 %v6407_v35 }
 0x157   : > { %5273 = vmatpush3.msra.mxu0 %v6440_v41  ;;  %1271 = vmatprep.subr.mxu1 %v6418_v37 }
 0x158   : > { %5274 = vmatprep.subr.mxu0 %v9154_v26  ;;  %1272 = vmatpush1.msra.mxu1 %v6424_v38 }
 0x159   : > { %5275 = vmatpush3.msra.mxu0 %v6514_v53  ;;  %1273 = vmatprep.subr.mxu1 %v6434_v40 }
 0x15a   : > { %5276 = vmatprep.subr.mxu0 %v9154_v26  ;;  %1274 = vmatpush1.msra.mxu1 %v6448_v42 }
 0x15b   : > { %5277 = vmatpush3.msra.mxu0 %v6557_v59  ;;  %1275 = vmatprep.subr.mxu1 %v6459_v44 }
 0x15c   : > { %5278 = vmatprep.subr.mxu0 %v9154_v26  ;;  %1276 = vmatpush1.msra.mxu1 %v6465_v45 }
 0x15d   : > { %5279 = vmatpush3.msra.mxu0 %v6596_v1  ;;  %1277 = vmatprep.subr.mxu1 %v6475_v47 }
 0x15e   : > { %5280 = vmatprep.subr.mxu0 %v9154_v26  ;;  %1278 = vmatpush1.msra.mxu1 %v6484_v48 }
 0x15f   : > { %5281 = vmatpush3.msra.mxu0 %v6608_v2  ;;  %1279 = vmatprep.subr.mxu1 %v6495_v50 }
 0x160   : > { %5282 = vmatprep.subr.mxu0 %v9154_v26  ;;  %1280 = vmatpush1.msra.mxu1 %v6501_v51 }
 0x161   : > { %5283 = vmatpush3.msra.mxu0 %v6617_v3  ;;  %1281 = vmatprep.subr.mxu1 %v6508_v52 }
 0x162   : > { %5284 = vmatprep.subr.mxu0 %v9154_v26  ;;  %1282 = vmatpush1.msra.mxu1 %v6522_v54 }
 0x163   : > { %5285 = vmatpush3.msra.mxu0 %v6626_v4  ;;  %1283 = vmatprep.subr.mxu1 %v6530_v55 }
 0x164   : > { %5286 = vmatprep.subr.mxu0 %v9154_v26  ;;  %1284 = vmatpush1.msra.mxu1 %v6536_v56 }
 0x165   : > { %5287 = vmatpush3.msra.mxu0 %v6637_v6  ;;  %1285 = vmatprep.subr.mxu1 %v6543_v57 }
 0x166   : > { %5288 = vmatprep.subr.mxu0 %v9154_v26  ;;  %1286 = vmatpush1.msra.mxu1 %v6552_v58 }
 0x167   : > { %5289 = vmatpush3.msra.mxu0 %v6645_v7  ;;  %1287 = vmatprep.subr.mxu1 %v6565_v60 }
 0x168   : > { %5290 = vmatprep.subr.mxu0 %v9154_v26  ;;  %1288 = vmatpush1.msra.mxu1 %v9155_v30  ;;  %v9163_v30 = vld [vmem:[#allocation58_spill] sm:$0xff] }
 0x169   : > { %5291 = vmatpush3.msra.mxu0 %v9156_v39  ;;  %1289 = vmatprep.subr.mxu1 %v9157_v46 }
 0x16a   : > { %5292 = vmatprep.subr.mxu0 %v9154_v26  ;;  %1290 = vmatpush1.msra.mxu1 %v9158_v33 }
 0x16b   : > { %1323 = vmatprep.mubr.f32.mxu1 %v9154_v26  ;;  %5293 = vmatpush3.msra.mxu0 %v9159_v11 }
 0x16c   : > { %5294 = vmatprep.mubr.msk.f32.mxu0 %vm6149_vm1, %v9154_v26  ;;  %1492 = vmatprep.subr.mxu1 %v9160_v23 }
 0x16d   : > { %5297 = vmatprep.subr.mxu0 %v9154_v26 }
 0x20a   : > { %v1092_v8 = vpop.f32.mrf.mxu1  ;;  %v1163_v14 = vpop.f32.mrf.mxu0 }
 0x20b   : > { %v1167_v63 = vadd.f32 %v1092_v8, %v452_v0  ;;  %v1181_v61 = vadd.f32 %v9163_v30, %v1163_v14  ;;  %v9164_v0 = vld [vmem:[#allocation23_spill] sm:$0xff] }
 0x20c   : > { %v5261_v10 = vpop.f32.mrf.mxu0  ;;  %v1094_v36 = vpop.f32.mrf.mxu1 }
 0x20d   : > { %v4777_v12 = vmul.f32 -1.442695, %v1167_v63  ;;  %v1174_v49 = vadd.f32 %v1094_v36, %v454_v62 }
 0x20f   : > { %5810 = vpow2.f32 %v4777_v12  ;;  %v4778_v11 = vmul.f32 -1.442695, %v1174_v49 }
 0x211   : > { %5812 = vpow2.f32 %v4778_v11 }
 0x21c   : > { %v5811_v33 = vpop.eup %5810 }
 0x21d   : > { %v1171_v23 = vadd.f32 1.0, %v5811_v33 }
 0x21e   : > { %v5813_v46 = vpop.eup %5812 }
 0x21f   : > { %5814 = vrcp.f32 %v1171_v23  ;;  %v1178_v39 = vadd.f32 1.0, %v5813_v46 }
 0x221   : > { %5816 = vrcp.f32 %v1178_v39 }
 0x22c   : > { %v5815_v43 = vpop.eup %5814 }
 0x22d   : > { %v1182_v60 = vmul.f32 %v5815_v43, %v1181_v61 }
 0x22e   : > { %v5817_v63 = vpop.eup %5816 }
 0x22f   : > { %v1183_v8 = vadd.f32 %v1182_v60, %v9164_v0  ;;  %v1185_v10 = vsub.f32 1.0, %v5817_v63  ;;  %v1187_v11 = vmul.f32 %v5817_v63, %v6876_v18 }
 0x231   : > { %5818 = vtanh.f32 %v1183_v8 }
 0x23e   : > { %v5819_v12 = vpop.eup %5818 }
 0x23f   : > { %v1186_v36 = vmul.f32 %v5819_v12, %v1185_v10  ;;  %v7082_v12 = vld [vmem:[%s9035_s2 + $0x168] sm:$0xff] }
 0x241   : > { %v6971_v9 = vadd.f32 %v1187_v11, %v1186_v36  ;;  %v7088_v36 = vld [vmem:[%s9035_s2 + $0x178] sm:$0xff] }
 0x243   : > { %v1190_v46 = vcombine.high %v6971_v9, %v6971_v9  ;;  %v1197_v33 = vrot.slane %v6971_v9, %v6873_v15  ;;  %1324 = vmatmul.mubr.f32.vlgmr.msra.gmra.mxu1 %v6971_v9  ;;  %5295 = vmatmul.mubr.f32.vlgmr.msra.gmra.mxu0 %v6971_v9 }
 0x244   : > { %1493 = vmatpush1.msra.mxu1 %v6325_v20  ;;  %5298 = vmatpush3.msra.mxu0 %v6287_v13 }
 0x245   : > { %v1204_v60 = vrot.slane %v1190_v46, %v6873_v15  ;;  %v1205_v43 = vcombine.high %v1197_v33, %v1197_v33  ;;  %v1213_v18 = vrot.slane %v1197_v33, %v6873_v15  ;;  %4779 = vst.sshfl [vmem:[%s6236_s16 + $0x1] sm:$0x1 pattern:$0x73625140] %v1197_v33  ;;  %1494 = vmatprep.subr.mxu1 %v6332_v21  ;;  %v7097_v33 = vld [vmem:[%s9035_s2 + $0x158] sm:$0xff] }
 0x246   : > { %5299 = vmatprep.subr.mxu0 %v9154_v26  ;;  %1495 = vmatpush1.msra.mxu1 %v6339_v22 }
 0x247   : > { %5300 = vmatpush3.msra.mxu0 %v6301_v16  ;;  %v1206_v39 = vcombine.high %v1204_v60, %v1204_v60  ;;  %v1220_v20 = vrot.slane %v1204_v60, %v6873_v15  ;;  %v1227_v13 = vrot.slane %v1205_v43, %v6873_v15  ;;  %v1235_v14 = vcombine.high %v1213_v18, %v1213_v18 }
 0x248   : > { %4780 = vst.sshfl [vmem:[%s6236_s16 + $0x11] sm:$0x1 pattern:$0x73625140] %v1205_v43  ;;  %1496 = vmatprep.subr.mxu1 %v6348_v24  ;;  %5301 = vmatprep.subr.mxu0 %v9154_v26  ;;  %v7110_v43 = vld [vmem:[%s9035_s2 + $0x160] sm:$0xff] }
 0x249   : > { %4781 = vst.sshfl [vmem:[%s6236_s16 + $0x41] sm:$0x1 pattern:$0x73625140] %v1204_v60  ;;  %1497 = vmatpush1.msra.mxu1 %v6354_v25  ;;  %v1234_v21 = vrot.slane %v1206_v39, %v6873_v15  ;;  %v1236_v16 = vcombine.high %v1220_v20, %v1220_v20  ;;  %v1237_v22 = vcombine.high %v1227_v13, %v1227_v13  ;;  %1249 = vst [vmem:[%s6236_s16 + $0x21] sm:$0x1] %v1235_v14 }
 0x24a   : > { %4782 = vst.sshfl [vmem:[%s6236_s16 + $0x51] sm:$0x1 pattern:$0x73625140] %v1206_v39  ;;  %5302 = vmatpush3.msra.mxu0 %v6309_v17  ;;  %1498 = vmatprep.subr.mxu1 %v6362_v27  ;;  %v9165_v17 = vld [vmem:[#allocation6_spill] sm:$0xff]  ;;  %v9168_v27 = vld [vmem:[#allocation8_spill] sm:$0xff] }
 0x24b   : > { %5303 = vmatprep.subr.mxu0 %v9154_v26  ;;  %1499 = vmatpush1.msra.mxu1 %v6375_v29  ;;  %v1238_v24 = vcombine.high %v1234_v21, %v1234_v21  ;;  %1250 = vst [vmem:[%s6236_s16 + $0x31] sm:$0x1] %v1237_v22  ;;  %1253 = vst [vmem:[%s6236_s16 + $0x61] sm:$0x1] %v1236_v16  ;;  %v9167_v25 = vld [vmem:[#allocation10_spill] sm:$0xff]  ;;  %v9170_v29 = vld [vmem:[#allocation11_spill] sm:$0xff] }
 0x24c   : > { %5304 = vmatpush3.msra.mxu0 %v6320_v19  ;;  %1500 = vmatprep.subr.mxu1 %v6383_v31  ;;  %v9166_v19 = vld [vmem:[#allocation7_spill] sm:$0xff]  ;;  %v7060_v31 = vld [vmem:[%s9035_s2 + $0x170] sm:$0xff]  ;;  %v7120_v14 = vld [vmem:[%s9035_s2 + $0x140] sm:$0xff] }
 0x24d   : > { %5305 = vmatprep.subr.mxu0 %v9154_v26  ;;  %1501 = vmatpush1.msra.mxu1 %v6389_v32  ;;  %1254 = vst [vmem:[%s6236_s16 + $0x71] sm:$0x1] %v1238_v24  ;;  %9171 = vst [vmem:[#allocation5_spill] sm:$0xff] %v7060_v31  ;;  %v9172_v32 = vld [vmem:[#allocation43_spill] sm:$0xff]  ;;  %v7104_v60 = vld [vmem:[%s9035_s2 + $0x150] sm:$0xff] }
 0x24e   : > { %5306 = vmatpush3.msra.mxu0 %v6368_v28  ;;  %1502 = vmatprep.subr.mxu1 %v6399_v34  ;;  %v9169_v28 = vld [vmem:[#allocation9_spill] sm:$0xff]  ;;  %v9173_v34 = vld [vmem:[#allocation22_spill] sm:$0xff]  ;;  %v7127_v21 = vld [vmem:[%s9035_s2 + $0x138] sm:$0xff] }
 0x24f   : > { %5307 = vmatprep.subr.mxu0 %v9154_v26  ;;  %1503 = vmatpush1.msra.mxu1 %v6407_v35  ;;  %v458_v35 = vadd.f32 %v9173_v34, %v9172_v32  ;;  %v7157_v34 = vld [vmem:[%s9035_s2 + $0x130] sm:$0xff] }
 0x250   : > { %5308 = vmatpush3.msra.mxu0 %v6440_v41  ;;  %1504 = vmatprep.subr.mxu1 %v6418_v37 }
 0x251   : > { %5309 = vmatprep.subr.mxu0 %v9154_v26  ;;  %1505 = vmatpush1.msra.mxu1 %v6424_v38 }
 0x252   : > { %5310 = vmatpush3.msra.mxu0 %v6514_v53  ;;  %1506 = vmatprep.subr.mxu1 %v6434_v40 }
 0x253   : > { %5311 = vmatprep.subr.mxu0 %v9154_v26  ;;  %1507 = vmatpush1.msra.mxu1 %v6448_v42 }
 0x254   : > { %5312 = vmatpush3.msra.mxu0 %v6557_v59  ;;  %1508 = vmatprep.subr.mxu1 %v6459_v44 }
 0x255   : > { %5313 = vmatprep.subr.mxu0 %v9154_v26  ;;  %1509 = vmatpush1.msra.mxu1 %v6465_v45  ;;  %v9174_v45 = vld [vmem:[#allocation24_spill] sm:$0xff] }
 0x256   : > { %5314 = vmatpush3.msra.mxu0 %v6596_v1  ;;  %1510 = vmatprep.subr.mxu1 %v6475_v47  ;;  %v460_v47 = vadd.f32 %v9174_v45, %v6843_v5  ;;  %v7209_v45 = vld [vmem:[%s9035_s2 + $0xd8] sm:$0xff] }
 0x257   : > { %5315 = vmatprep.subr.mxu0 %v9154_v26  ;;  %1511 = vmatpush1.msra.mxu1 %v6484_v48 }
 0x258   : > { %5316 = vmatpush3.msra.mxu0 %v6608_v2  ;;  %1512 = vmatprep.subr.mxu1 %v6495_v50 }
 0x259   : > { %5317 = vmatprep.subr.mxu0 %v9154_v26  ;;  %1513 = vmatpush1.msra.mxu1 %v6501_v51 }
 0x25a   : > { %5318 = vmatpush3.msra.mxu0 %v6617_v3  ;;  %1514 = vmatprep.subr.mxu1 %v6508_v52 }
 0x25b   : > { %5319 = vmatprep.subr.mxu0 %v9154_v26  ;;  %1515 = vmatpush1.msra.mxu1 %v6522_v54 }
 0x25c   : > { %5320 = vmatpush3.msra.mxu0 %v6626_v4  ;;  %1516 = vmatprep.subr.mxu1 %v6530_v55 }
 0x25d   : > { %5321 = vmatprep.subr.mxu0 %v9154_v26  ;;  %1517 = vmatpush1.msra.mxu1 %v6536_v56 }
 0x25e   : > { %5322 = vmatpush3.msra.mxu0 %v6637_v6  ;;  %1518 = vmatprep.subr.mxu1 %v6543_v57 }
 0x25f   : > { %5323 = vmatprep.subr.mxu0 %v9154_v26  ;;  %1519 = vmatpush1.msra.mxu1 %v6552_v58  ;;  %v9175_v58 = vld [vmem:[#allocation27_spill] sm:$0xff] }
 0x260   : > { %5324 = vmatpush3.msra.mxu0 %v6645_v7  ;;  %1520 = vmatprep.subr.mxu1 %v9165_v17  ;;  %v7136_v17 = vld [vmem:[%s9035_s2 + $0x148] sm:$0xff] }
 0x261   : > { %5325 = vmatprep.subr.mxu0 %v9154_v26  ;;  %1521 = vmatpush1.msra.mxu1 %v9166_v19  ;;  %v7142_v19 = vld [vmem:[%s9035_s2 + $0x128] sm:$0xff] }
 0x262   : > { %5326 = vmatpush3.msra.mxu0 %v9167_v25  ;;  %1522 = vmatprep.subr.mxu1 %v9168_v27  ;;  %v7149_v27 = vld [vmem:[%s9035_s2 + $0x120] sm:$0xff] }
 0x263   : > { %5327 = vmatprep.subr.mxu0 %v9154_v26  ;;  %1523 = vmatpush1.msra.mxu1 %v9169_v28 }
 0x264   : > { %1556 = vmatprep.mubr.f32.mxu1 %v9154_v26  ;;  %5328 = vmatpush3.msra.mxu0 %v9170_v29 }
 0x265   : > { %5329 = vmatprep.mubr.msk.f32.mxu0 %vm6149_vm1, %v9154_v26  ;;  %1725 = vmatprep.subr.mxu1 %v7060_v31 }
 0x266   : > { %5332 = vmatprep.subr.mxu0 %v9154_v26 }
 0x303   : > { %v1325_v37 = vpop.f32.mrf.mxu1  ;;  %v1396_v38 = vpop.f32.mrf.mxu0 }
 0x304   : > { %v1400_v40 = vadd.f32 %v1325_v37, %v458_v35  ;;  %v1414_v55 = vadd.f32 %v9163_v30, %v1396_v38  ;;  %v7163_v35 = vld [vmem:[%s9035_s2 + $0x110] sm:$0xff]  ;;  %v7170_v37 = vld [vmem:[%s9035_s2 + $0x108] sm:$0xff]  ;;  %v7177_v38 = vld [vmem:[%s9035_s2 + $0x118] sm:$0xff] }
 0x305   : > { %v5296_v41 = vpop.f32.mrf.mxu0  ;;  %v1327_v44 = vpop.f32.mrf.mxu1 }
 0x306   : > { %v4783_v42 = vmul.f32 -1.442695, %v1400_v40  ;;  %v1407_v48 = vadd.f32 %v1327_v44, %v460_v47  ;;  %v7183_v40 = vld [vmem:[%s9035_s2 + $0xf8] sm:$0xff]  ;;  %v7190_v41 = vld [vmem:[%s9035_s2 + $0xf0] sm:$0xff]  ;;  %v7202_v44 = vld [vmem:[%s9035_s2 + $0xe0] sm:$0xff] }
 0x307   : > { %v7215_v47 = vld [vmem:[%s9035_s2 + $0xe8] sm:$0xff] }
 0x308   : > { %5820 = vpow2.f32 %v4783_v42  ;;  %v4784_v50 = vmul.f32 -1.442695, %v1407_v48  ;;  %v7196_v42 = vld [vmem:[%s9035_s2 + $0x100] sm:$0xff]  ;;  %v7221_v48 = vld [vmem:[%s9035_s2 + $0xc8] sm:$0xff] }
 0x30a   : > { %5822 = vpow2.f32 %v4784_v50  ;;  %v7228_v50 = vld [vmem:[%s9035_s2 + $0xc0] sm:$0xff] }
 0x315   : > { %v5821_v51 = vpop.eup %5820 }
 0x316   : > { %v1404_v52 = vadd.f32 1.0, %v5821_v51  ;;  %v7234_v51 = vld [vmem:[%s9035_s2 + $0xd0] sm:$0xff] }
 0x317   : > { %v5823_v53 = vpop.eup %5822 }
 0x318   : > { %5824 = vrcp.f32 %v1404_v52  ;;  %v1411_v54 = vadd.f32 1.0, %v5823_v53  ;;  %v7240_v52 = vld [vmem:[%s9035_s2 + $0xb0] sm:$0xff]  ;;  %v7247_v53 = vld [vmem:[%s9035_s2 + $0xa8] sm:$0xff] }
 0x31a   : > { %5826 = vrcp.f32 %v1411_v54  ;;  %v7254_v54 = vld [vmem:[%s9035_s2 + $0x98] sm:$0xff] }
 0x325   : > { %v5825_v56 = vpop.eup %5824 }
 0x326   : > { %v1415_v57 = vmul.f32 %v5825_v56, %v1414_v55  ;;  %v7261_v55 = vld [vmem:[%s9035_s2 + $0x90] sm:$0xff]  ;;  %v7275_v56 = vld [vmem:[%s9035_s2 + $0x78] sm:$0xff] }
 0x327   : > { %v5827_v62 = vpop.eup %5826 }
 0x328   : > { %v1416_v59 = vadd.f32 %v1415_v57, %v9175_v58  ;;  %v1418_v49 = vsub.f32 1.0, %v5827_v62  ;;  %v1420_v0 = vmul.f32 %v5827_v62, %v6971_v9  ;;  %v7289_v57 = vld [vmem:[%s9035_s2 + $0x60] sm:$0xff]  ;;  %v7303_v58 = vld [vmem:[%s9035_s2 + $0x48] sm:$0xff]  ;;  %v7331_v62 = vld [vmem:[%s9035_s2 + $0x18] sm:$0xff] }
 0x329   : > { %9177 = vst [vmem:[#allocation19_spill] sm:$0xff] %v7331_v62 }
 0x32a   : > { %5828 = vtanh.f32 %v1416_v59  ;;  %v7317_v59 = vld [vmem:[%s9035_s2 + $0x30] sm:$0xff] }
 0x337   : > { %v5829_v23 = vpop.eup %5828 }
 0x338   : > { %v1419_v61 = vmul.f32 %v5829_v23, %v1418_v49  ;;  %v7345_v49 = vld [vmem:[%s9035_s2] sm:$0xff] }
 0x339   : > { %9179 = vst [vmem:[#allocation23_spill] sm:$0xff] %v7345_v49 }
 0x33a   : > { %v7071_v8 = vadd.f32 %v1420_v0, %v1419_v61 }
 0x33c   : > { %v1423_v63 = vcombine.high %v7071_v8, %v7071_v8  ;;  %v1430_v10 = vrot.slane %v7071_v8, %v6873_v15  ;;  %1557 = vmatmul.mubr.f32.vlgmr.msra.gmra.mxu1 %v7071_v8  ;;  %5330 = vmatmul.mubr.f32.vlgmr.msra.gmra.mxu0 %v7071_v8 }
 0x33d   : > { %1726 = vmatpush1.msra.mxu1 %v7082_v12  ;;  %5333 = vmatpush3.msra.mxu0 %v7088_v36 }
 0x33e   : > { %v1437_v11 = vrot.slane %v1423_v63, %v6873_v15  ;;  %v1438_v9 = vcombine.high %v1430_v10, %v1430_v10  ;;  %v1446_v46 = vrot.slane %v1430_v10, %v6873_v15  ;;  %4785 = vst.sshfl [vmem:[%s6236_s16 + $0x2] sm:$0x1 pattern:$0x73625140] %v1430_v10  ;;  %1727 = vmatprep.subr.mxu1 %v7097_v33 }
 0x33f   : > { %5334 = vmatprep.subr.mxu0 %v9154_v26  ;;  %1728 = vmatpush1.msra.mxu1 %v7104_v60 }
 0x340   : > { %5335 = vmatpush3.msra.mxu0 %v7110_v43  ;;  %v1439_v18 = vcombine.high %v1437_v11, %v1437_v11  ;;  %v1453_v39 = vrot.slane %v1437_v11, %v6873_v15  ;;  %v1460_v20 = vrot.slane %v1438_v9, %v6873_v15  ;;  %v1468_v13 = vcombine.high %v1446_v46, %v1446_v46  ;;  %v9181_v46 = vld [vmem:[#allocation29_spill] sm:$0xff] }
 0x341   : > { %4786 = vst.sshfl [vmem:[%s6236_s16 + $0x12] sm:$0x1 pattern:$0x73625140] %v1438_v9  ;;  %1729 = vmatprep.subr.mxu1 %v7120_v14  ;;  %5336 = vmatprep.subr.mxu0 %v9154_v26 }
 0x342   : > { %4787 = vst.sshfl [vmem:[%s6236_s16 + $0x42] sm:$0x1 pattern:$0x73625140] %v1437_v11  ;;  %1730 = vmatpush1.msra.mxu1 %v7127_v21  ;;  %v1467_v16 = vrot.slane %v1439_v18, %v6873_v15  ;;  %v1469_v22 = vcombine.high %v1453_v39, %v1453_v39  ;;  %v1470_v24 = vcombine.high %v1460_v20, %v1460_v20  ;;  %1482 = vst [vmem:[%s6236_s16 + $0x22] sm:$0x1] %v1468_v13 }
 0x343   : > { %4788 = vst.sshfl [vmem:[%s6236_s16 + $0x52] sm:$0x1 pattern:$0x73625140] %v1439_v18  ;;  %5337 = vmatpush3.msra.mxu0 %v7136_v17  ;;  %1731 = vmatprep.subr.mxu1 %v7142_v19  ;;  %v466_v18 = vadd.f32 %v9181_v46, %v6843_v5 }
 0x344   : > { %5338 = vmatprep.subr.mxu0 %v9154_v26  ;;  %1732 = vmatpush1.msra.mxu1 %v7149_v27  ;;  %v1471_v28 = vcombine.high %v1467_v16, %v1467_v16  ;;  %1483 = vst [vmem:[%s6236_s16 + $0x32] sm:$0x1] %v1470_v24  ;;  %1486 = vst [vmem:[%s6236_s16 + $0x62] sm:$0x1] %v1469_v22 }
 0x345   : > { %5339 = vmatpush3.msra.mxu0 %v7157_v34  ;;  %1733 = vmatprep.subr.mxu1 %v7163_v35 }
 0x346   : > { %5340 = vmatprep.subr.mxu0 %v9154_v26  ;;  %1734 = vmatpush1.msra.mxu1 %v7170_v37  ;;  %1487 = vst [vmem:[%s6236_s16 + $0x72] sm:$0x1] %v1471_v28 }
 0x347   : > { %5341 = vmatpush3.msra.mxu0 %v7177_v38  ;;  %1735 = vmatprep.subr.mxu1 %v7183_v40 }
 0x348   : > { %5342 = vmatprep.subr.mxu0 %v9154_v26  ;;  %1736 = vmatpush1.msra.mxu1 %v7190_v41 }
 0x349   : > { %5343 = vmatpush3.msra.mxu0 %v7196_v42  ;;  %1737 = vmatprep.subr.mxu1 %v7202_v44 }
 0x34a   : > { %5344 = vmatprep.subr.mxu0 %v9154_v26  ;;  %1738 = vmatpush1.msra.mxu1 %v7209_v45 }
 0x34b   : > { %5345 = vmatpush3.msra.mxu0 %v7215_v47  ;;  %1739 = vmatprep.subr.mxu1 %v7221_v48 }
 0x34c   : > { %5346 = vmatprep.subr.mxu0 %v9154_v26  ;;  %1740 = vmatpush1.msra.mxu1 %v7228_v50 }
 0x34d   : > { %5347 = vmatpush3.msra.mxu0 %v7234_v51  ;;  %1741 = vmatprep.subr.mxu1 %v7240_v52 }
 0x34e   : > { %5348 = vmatprep.subr.mxu0 %v9154_v26  ;;  %1742 = vmatpush1.msra.mxu1 %v7247_v53 }
 0x34f   : > { %5349 = vmatpush3.msra.mxu0 %v6596_v1  ;;  %1743 = vmatprep.subr.mxu1 %v7254_v54  ;;  %v7268_v1 = vld [vmem:[%s9035_s2 + $0x80] sm:$0xff] }
 0x350   : > { %5350 = vmatprep.subr.mxu0 %v9154_v26  ;;  %1744 = vmatpush1.msra.mxu1 %v7261_v55 }
 0x351   : > { %5351 = vmatpush3.msra.mxu0 %v6608_v2  ;;  %1745 = vmatprep.subr.mxu1 %v7268_v1  ;;  %v7282_v2 = vld [vmem:[%s9035_s2 + $0x68] sm:$0xff] }
 0x352   : > { %5352 = vmatprep.subr.mxu0 %v9154_v26  ;;  %1746 = vmatpush1.msra.mxu1 %v7275_v56 }
 0x353   : > { %5353 = vmatpush3.msra.mxu0 %v6617_v3  ;;  %1747 = vmatprep.subr.mxu1 %v7282_v2  ;;  %v7296_v3 = vld [vmem:[%s9035_s2 + $0x50] sm:$0xff] }
 0x354   : > { %5354 = vmatprep.subr.mxu0 %v9154_v26  ;;  %1748 = vmatpush1.msra.mxu1 %v7289_v57 }
 0x355   : > { %5355 = vmatpush3.msra.mxu0 %v6626_v4  ;;  %1749 = vmatprep.subr.mxu1 %v7296_v3  ;;  %v7310_v4 = vld [vmem:[%s9035_s2 + $0x38] sm:$0xff] }
 0x356   : > { %5356 = vmatprep.subr.mxu0 %v9154_v26  ;;  %1750 = vmatpush1.msra.mxu1 %v7303_v58 }
 0x357   : > { %5357 = vmatpush3.msra.mxu0 %v6637_v6  ;;  %1751 = vmatprep.subr.mxu1 %v7310_v4  ;;  %v7324_v6 = vld [vmem:[%s9035_s2 + $0x20] sm:$0xff] }
 0x358   : > { %5358 = vmatprep.subr.mxu0 %v9154_v26  ;;  %1752 = vmatpush1.msra.mxu1 %v7317_v59  ;;  %9176 = vst [vmem:[#allocation17_spill] sm:$0xff] %v7324_v6 }
 0x359   : > { %5359 = vmatpush3.msra.mxu0 %v6645_v7  ;;  %1753 = vmatprep.subr.mxu1 %v7324_v6  ;;  %v7338_v7 = vld [vmem:[%s9035_s2 + $0x8] sm:$0xff] }
 0x35a   : > { %5360 = vmatprep.subr.mxu0 %v9154_v26  ;;  %1754 = vmatpush1.msra.mxu1 %v7331_v62  ;;  %9178 = vst [vmem:[#allocation58_spill] sm:$0xff] %v7338_v7 }
 0x35b   : > { %5361 = vmatpush3.msra.mxu0 %v9167_v25  ;;  %1755 = vmatprep.subr.mxu1 %v7338_v7  ;;  %v9180_v25 = vld [vmem:[#allocation26_spill] sm:$0xff] }
 0x35c   : > { %5362 = vmatprep.subr.mxu0 %v9154_v26  ;;  %1756 = vmatpush1.msra.mxu1 %v7345_v49  ;;  %v464_v23 = vadd.f32 %v9180_v25, %v9172_v32 }
 0x35d   : > { %1789 = vmatprep.mubr.f32.mxu1 %v9154_v26  ;;  %5363 = vmatpush3.msra.mxu0 %v9170_v29 }
 0x35e   : > { %5364 = vmatprep.mubr.msk.f32.mxu0 %vm6149_vm1, %v9154_v26  ;;  %1958 = vmatprep.subr.mxu1 %v7060_v31 }
 0x35f   : > { %5367 = vmatprep.subr.mxu0 %v9154_v26 }
 0x3fc   : > { %v1558_v61 = vpop.f32.mrf.mxu1  ;;  %v1629_v0 = vpop.f32.mrf.mxu0 }
 0x3fd   : > { %v1633_v63 = vadd.f32 %v1558_v61, %v464_v23  ;;  %v1647_v24 = vadd.f32 %v9163_v30, %v1629_v0  ;;  %v9182_v23 = vld [vmem:[#allocation25_spill] sm:$0xff] }
 0x3fe   : > { %v5331_v10 = vpop.f32.mrf.mxu0  ;;  %v1560_v9 = vpop.f32.mrf.mxu1 }
 0x3ff   : > { %v4789_v11 = vmul.f32 -1.442695, %v1633_v63  ;;  %v1640_v29 = vadd.f32 %v1560_v9, %v466_v18 }
 0x401   : > { %5830 = vpow2.f32 %v4789_v11  ;;  %v4790_v39 = vmul.f32 -1.442695, %v1640_v29 }
 0x403   : > { %5832 = vpow2.f32 %v4790_v39 }
 0x40e   : > { %v5831_v20 = vpop.eup %5830 }
 0x40f   : > { %v1637_v13 = vadd.f32 1.0, %v5831_v20 }
 0x410   : > { %v5833_v16 = vpop.eup %5832 }
 0x411   : > { %5834 = vrcp.f32 %v1637_v13  ;;  %v1644_v22 = vadd.f32 1.0, %v5833_v16 }
 0x413   : > { %5836 = vrcp.f32 %v1644_v22 }
 0x41e   : > { %v5835_v28 = vpop.eup %5834 }
 0x41f   : > { %v1648_v25 = vmul.f32 %v5835_v28, %v1647_v24 }
 0x420   : > { %v5837_v63 = vpop.eup %5836 }
 0x421   : > { %v1649_v61 = vadd.f32 %v1648_v25, %v9182_v23  ;;  %v1651_v10 = vsub.f32 1.0, %v5837_v63  ;;  %v1653_v46 = vmul.f32 %v5837_v63, %v7071_v8  ;;  %v7418_v63 = vld [vmem:[%s9035_s2 + $0xb8] sm:$0xff] }
 0x423   : > { %5838 = vtanh.f32 %v1649_v61 }
 0x430   : > { %v5839_v11 = vpop.eup %5838 }
 0x431   : > { %v1652_v9 = vmul.f32 %v5839_v11, %v1651_v10  ;;  %v7427_v10 = vld [vmem:[%s9035_s2 + $0xa0] sm:$0xff]  ;;  %v7436_v11 = vld [vmem:[%s9035_s2 + $0x88] sm:$0xff] }
 0x433   : > { %v7361_v18 = vadd.f32 %v1653_v46, %v1652_v9  ;;  %v7445_v9 = vld [vmem:[%s9035_s2 + $0x70] sm:$0xff]  ;;  %v7454_v46 = vld [vmem:[%s9035_s2 + $0x58] sm:$0xff] }
 0x435   : > { %v1656_v29 = vcombine.high %v7361_v18, %v7361_v18  ;;  %v1663_v0 = vrot.slane %v7361_v18, %v6873_v15  ;;  %1790 = vmatmul.mubr.f32.vlgmr.msra.gmra.mxu1 %v7361_v18  ;;  %5365 = vmatmul.mubr.f32.vlgmr.msra.gmra.mxu0 %v7361_v18 }
 0x436   : > { %1959 = vmatpush1.msra.mxu1 %v7082_v12  ;;  %5368 = vmatpush3.msra.mxu0 %v7088_v36 }
 0x437   : > { %v1670_v8 = vrot.slane %v1656_v29, %v6873_v15  ;;  %v1671_v39 = vcombine.high %v1663_v0, %v1663_v0  ;;  %v1679_v20 = vrot.slane %v1663_v0, %v6873_v15  ;;  %4791 = vst.sshfl [vmem:[%s6236_s16 + $0x3] sm:$0x1 pattern:$0x73625140] %v1663_v0  ;;  %1960 = vmatprep.subr.mxu1 %v7097_v33  ;;  %v7463_v29 = vld [vmem:[%s9035_s2 + $0x40] sm:$0xff]  ;;  %v7472_v0 = vld [vmem:[%s9035_s2 + $0x28] sm:$0xff] }
 0x438   : > { %5369 = vmatprep.subr.mxu0 %v9154_v26  ;;  %1961 = vmatpush1.msra.mxu1 %v7104_v60  ;;  %9183 = vst [vmem:[#allocation6_spill] sm:$0xff] %v7472_v0 }
 0x439   : > { %5370 = vmatpush3.msra.mxu0 %v7110_v43  ;;  %v1672_v13 = vcombine.high %v1670_v8, %v1670_v8  ;;  %v1686_v16 = vrot.slane %v1670_v8, %v6873_v15  ;;  %v1693_v22 = vrot.slane %v1671_v39, %v6873_v15  ;;  %v1701_v24 = vcombine.high %v1679_v20, %v1679_v20 }
 0x43a   : > { %4792 = vst.sshfl [vmem:[%s6236_s16 + $0x13] sm:$0x1 pattern:$0x73625140] %v1671_v39  ;;  %1962 = vmatprep.subr.mxu1 %v7120_v14  ;;  %5371 = vmatprep.subr.mxu0 %v9154_v26  ;;  %v9185_v39 = vld [vmem:[#allocation32_spill] sm:$0xff] }
 0x43b   : > { %4793 = vst.sshfl [vmem:[%s6236_s16 + $0x43] sm:$0x1 pattern:$0x73625140] %v1670_v8  ;;  %1963 = vmatpush1.msra.mxu1 %v7127_v21  ;;  %v1700_v28 = vrot.slane %v1672_v13, %v6873_v15  ;;  %v1702_v25 = vcombine.high %v1686_v16, %v1686_v16  ;;  %v1703_v23 = vcombine.high %v1693_v22, %v1693_v22  ;;  %1715 = vst [vmem:[%s6236_s16 + $0x23] sm:$0x1] %v1701_v24 }
 0x43c   : > { %4794 = vst.sshfl [vmem:[%s6236_s16 + $0x53] sm:$0x1 pattern:$0x73625140] %v1672_v13  ;;  %5372 = vmatpush3.msra.mxu0 %v7136_v17  ;;  %1964 = vmatprep.subr.mxu1 %v7142_v19  ;;  %v7482_v8 = vld [vmem:[%s9035_s2 + $0x10] sm:$0xff]  ;;  %v470_v20 = vadd.f32 %v9185_v39, %v9172_v32 }
 0x43d   : > { %5373 = vmatprep.subr.mxu0 %v9154_v26  ;;  %1965 = vmatpush1.msra.mxu1 %v7149_v27  ;;  %v1704_v61 = vcombine.high %v1700_v28, %v1700_v28  ;;  %1716 = vst [vmem:[%s6236_s16 + $0x33] sm:$0x1] %v1703_v23  ;;  %1719 = vst [vmem:[%s6236_s16 + $0x63] sm:$0x1] %v1702_v25  ;;  %v9186_v23 = vld [vmem:[#allocation35_spill] sm:$0xff] }
 0x43e   : > { %5374 = vmatpush3.msra.mxu0 %v7157_v34  ;;  %1966 = vmatprep.subr.mxu1 %v7163_v35  ;;  %9184 = vst [vmem:[#allocation7_spill] sm:$0xff] %v7482_v8 }
 0x43f   : > { %5375 = vmatprep.subr.mxu0 %v9154_v26  ;;  %1967 = vmatpush1.msra.mxu1 %v7170_v37  ;;  %1720 = vst [vmem:[%s6236_s16 + $0x73] sm:$0x1] %v1704_v61  ;;  %v472_v61 = vadd.f32 %v9186_v23, %v6843_v5 }
 0x440   : > { %5376 = vmatpush3.msra.mxu0 %v7177_v38  ;;  %1968 = vmatprep.subr.mxu1 %v7183_v40 }
 0x441   : > { %5377 = vmatprep.subr.mxu0 %v9154_v26  ;;  %1969 = vmatpush1.msra.mxu1 %v7190_v41 }
 0x442   : > { %5378 = vmatpush3.msra.mxu0 %v7196_v42  ;;  %1970 = vmatprep.subr.mxu1 %v7202_v44 }
 0x443   : > { %5379 = vmatprep.subr.mxu0 %v9154_v26  ;;  %1971 = vmatpush1.msra.mxu1 %v7209_v45 }
 0x444   : > { %5380 = vmatpush3.msra.mxu0 %v7215_v47  ;;  %1972 = vmatprep.subr.mxu1 %v7221_v48 }
 0x445   : > { %5381 = vmatprep.subr.mxu0 %v9154_v26  ;;  %1973 = vmatpush1.msra.mxu1 %v7228_v50 }
 0x446   : > { %5382 = vmatpush3.msra.mxu0 %v7234_v51  ;;  %1974 = vmatprep.subr.mxu1 %v7240_v52 }
 0x447   : > { %5383 = vmatprep.subr.mxu0 %v9154_v26  ;;  %1975 = vmatpush1.msra.mxu1 %v7247_v53 }
 0x448   : > { %5384 = vmatpush3.msra.mxu0 %v7418_v63  ;;  %1976 = vmatprep.subr.mxu1 %v7254_v54 }
 0x449   : > { %5385 = vmatprep.subr.mxu0 %v9154_v26  ;;  %1977 = vmatpush1.msra.mxu1 %v7261_v55 }
 0x44a   : > { %5386 = vmatpush3.msra.mxu0 %v7427_v10  ;;  %1978 = vmatprep.subr.mxu1 %v7268_v1 }
 0x44b   : > { %5387 = vmatprep.subr.mxu0 %v9154_v26  ;;  %1979 = vmatpush1.msra.mxu1 %v7275_v56 }
 0x44c   : > { %5388 = vmatpush3.msra.mxu0 %v7436_v11  ;;  %1980 = vmatprep.subr.mxu1 %v7282_v2 }
 0x44d   : > { %5389 = vmatprep.subr.mxu0 %v9154_v26  ;;  %1981 = vmatpush1.msra.mxu1 %v7289_v57 }
 0x44e   : > { %5390 = vmatpush3.msra.mxu0 %v7445_v9  ;;  %1982 = vmatprep.subr.mxu1 %v7296_v3 }
 0x44f   : > { %5391 = vmatprep.subr.mxu0 %v9154_v26  ;;  %1983 = vmatpush1.msra.mxu1 %v7303_v58 }
 0x450   : > { %5392 = vmatpush3.msra.mxu0 %v7454_v46  ;;  %1984 = vmatprep.subr.mxu1 %v7310_v4 }
 0x451   : > { %5393 = vmatprep.subr.mxu0 %v9154_v26  ;;  %1985 = vmatpush1.msra.mxu1 %v7317_v59 }
 0x452   : > { %5394 = vmatpush3.msra.mxu0 %v7463_v29  ;;  %1986 = vmatprep.subr.mxu1 %v7324_v6 }
 0x453   : > { %5395 = vmatprep.subr.mxu0 %v9154_v26  ;;  %1987 = vmatpush1.msra.mxu1 %v7331_v62 }
 0x454   : > { %5396 = vmatpush3.msra.mxu0 %v7472_v0  ;;  %1988 = vmatprep.subr.mxu1 %v7338_v7 }
 0x455   : > { %5397 = vmatprep.subr.mxu0 %v9154_v26  ;;  %1989 = vmatpush1.msra.mxu1 %v7345_v49 }
 0x456   : > { %2022 = vmatprep.mubr.f32.mxu1 %v9154_v26  ;;  %5398 = vmatpush3.msra.mxu0 %v7482_v8 }
 0x457   : > { %5399 = vmatprep.mubr.msk.f32.mxu0 %vm6149_vm1, %v9154_v26  ;;  %2191 = vmatprep.subr.mxu1 %v7060_v31 }
 0x458   : > { %5402 = vmatprep.subr.mxu0 %v9154_v26 }
 0x4f5   : > { %v1791_v13 = vpop.f32.mrf.mxu1  ;;  %v1862_v16 = vpop.f32.mrf.mxu0 }
 0x4f6   : > { %v1866_v22 = vadd.f32 %v1791_v13, %v470_v20  ;;  %v1880_v39 = vadd.f32 %v9163_v30, %v1862_v16  ;;  %v9187_v20 = vld [vmem:[#allocation30_spill] sm:$0xff] }
 0x4f7   : > { %v5366_v24 = vpop.f32.mrf.mxu0  ;;  %v1793_v25 = vpop.f32.mrf.mxu1 }
 0x4f8   : > { %v4795_v28 = vmul.f32 -1.442695, %v1866_v22  ;;  %v1873_v8 = vadd.f32 %v1793_v25, %v472_v61 }
 0x4fa   : > { %5840 = vpow2.f32 %v4795_v28  ;;  %v4796_v49 = vmul.f32 -1.442695, %v1873_v8 }
 0x4fc   : > { %5842 = vpow2.f32 %v4796_v49 }
 0x507   : > { %v5841_v7 = vpop.eup %5840 }
 0x508   : > { %v1870_v31 = vadd.f32 1.0, %v5841_v7 }
 0x509   : > { %v5843_v0 = vpop.eup %5842 }
 0x50a   : > { %5844 = vrcp.f32 %v1870_v31  ;;  %v1877_v62 = vadd.f32 1.0, %v5843_v0 }
 0x50c   : > { %5846 = vrcp.f32 %v1877_v62 }
 0x517   : > { %v5845_v32 = vpop.eup %5844 }
 0x518   : > { %v1881_v6 = vmul.f32 %v5845_v32, %v1880_v39 }
 0x519   : > { %v5847_v22 = vpop.eup %5846 }
 0x51a   : > { %v1882_v13 = vadd.f32 %v1881_v6, %v9187_v20  ;;  %v1884_v24 = vsub.f32 1.0, %v5847_v22  ;;  %v1886_v49 = vmul.f32 %v5847_v22, %v7361_v18  ;;  %v9189_v22 = vld [vmem:[#allocation19_spill] sm:$0xff] }
 0x51c   : > { %5848 = vtanh.f32 %v1882_v13  ;;  %v9188_v13 = vld [vmem:[#allocation17_spill] sm:$0xff] }
 0x529   : > { %v5849_v28 = vpop.eup %5848 }
 0x52a   : > { %v1885_v25 = vmul.f32 %v5849_v28, %v1884_v24  ;;  %v9190_v24 = vld [vmem:[#allocation6_spill] sm:$0xff] }
 0x52b   : > { %v9191_v28 = vld [vmem:[#allocation58_spill] sm:$0xff] }
 0x52c   : > { %v7496_v8 = vadd.f32 %v1886_v49, %v1885_v25  ;;  %v9192_v25 = vld [vmem:[#allocation23_spill] sm:$0xff] }
 0x52d   : > { %v9193_v49 = vld [vmem:[#allocation7_spill] sm:$0xff] }
 0x52e   : > { %v1889_v31 = vcombine.high %v7496_v8, %v7496_v8  ;;  %v1896_v30 = vrot.slane %v7496_v8, %v6873_v15  ;;  %2023 = vmatmul.mubr.f32.vlgmr.msra.gmra.mxu1 %v7496_v8  ;;  %5400 = vmatmul.mubr.f32.vlgmr.msra.gmra.mxu0 %v7496_v8 }
 0x52f   : > { %2192 = vmatpush1.msra.mxu1 %v7082_v12  ;;  %5403 = vmatpush3.msra.mxu0 %v7088_v36 }
 0x530   : > { %v1903_v32 = vrot.slane %v1889_v31, %v6873_v15  ;;  %v1904_v6 = vcombine.high %v1896_v30, %v1896_v30  ;;  %v1912_v62 = vrot.slane %v1896_v30, %v6873_v15  ;;  %4797 = vst.sshfl [vmem:[%s6236_s16 + $0x4] sm:$0x1 pattern:$0x73625140] %v1896_v30  ;;  %2193 = vmatprep.subr.mxu1 %v7097_v33  ;;  %v9194_v31 = vld [vmem:[#allocation5_spill] sm:$0xff]  ;;  %v9195_v30 = vld [vmem:[#allocation43_spill] sm:$0xff] }
 0x531   : > { %5404 = vmatprep.subr.mxu0 %v9154_v26  ;;  %2194 = vmatpush1.msra.mxu1 %v7104_v60 }
 0x532   : > { %5405 = vmatpush3.msra.mxu0 %v7110_v43  ;;  %v1905_v7 = vcombine.high %v1903_v32, %v1903_v32  ;;  %v1919_v18 = vrot.slane %v1903_v32, %v6873_v15  ;;  %v1926_v0 = vrot.slane %v1904_v6, %v6873_v15  ;;  %v1934_v16 = vcombine.high %v1912_v62, %v1912_v62 }
 0x533   : > { %4798 = vst.sshfl [vmem:[%s6236_s16 + $0x14] sm:$0x1 pattern:$0x73625140] %v1904_v6  ;;  %2195 = vmatprep.subr.mxu1 %v7120_v14  ;;  %5406 = vmatprep.subr.mxu0 %v9154_v26 }
 0x534   : > { %4799 = vst.sshfl [vmem:[%s6236_s16 + $0x44] sm:$0x1 pattern:$0x73625140] %v1903_v32  ;;  %2196 = vmatpush1.msra.mxu1 %v7127_v21  ;;  %v1933_v23 = vrot.slane %v1905_v7, %v6873_v15  ;;  %v1935_v61 = vcombine.high %v1919_v18, %v1919_v18  ;;  %v1936_v39 = vcombine.high %v1926_v0, %v1926_v0  ;;  %1948 = vst [vmem:[%s6236_s16 + $0x24] sm:$0x1] %v1934_v16 }
 0x535   : > { %4800 = vst.sshfl [vmem:[%s6236_s16 + $0x54] sm:$0x1 pattern:$0x73625140] %v1905_v7  ;;  %5407 = vmatpush3.msra.mxu0 %v7136_v17  ;;  %2197 = vmatprep.subr.mxu1 %v7142_v19  ;;  %v9196_v32 = vld [vmem:[#allocation38_spill] sm:$0xff] }
 0x536   : > { %5408 = vmatprep.subr.mxu0 %v9154_v26  ;;  %2198 = vmatpush1.msra.mxu1 %v7149_v27  ;;  %v1937_v20 = vcombine.high %v1933_v23, %v1933_v23  ;;  %1949 = vst [vmem:[%s6236_s16 + $0x34] sm:$0x1] %v1936_v39  ;;  %1952 = vst [vmem:[%s6236_s16 + $0x64] sm:$0x1] %v1935_v61  ;;  %v476_v6 = vadd.f32 %v9196_v32, %v9195_v30  ;;  %v9197_v61 = vld [vmem:[#allocation41_spill] sm:$0xff] }
 0x537   : > { %5409 = vmatpush3.msra.mxu0 %v7157_v34  ;;  %2199 = vmatprep.subr.mxu1 %v7163_v35  ;;  %v478_v39 = vadd.f32 %v9197_v61, %v6843_v5  ;;  %v7591_v32 = vld [vmem:[%s9037_s4] ss:$0 sm:$0xff] }
 0x538   : > { %5410 = vmatprep.subr.mxu0 %v9154_v26  ;;  %2200 = vmatpush1.msra.mxu1 %v7170_v37  ;;  %1953 = vst [vmem:[%s6236_s16 + $0x74] sm:$0x1] %v1937_v20 }
 0x539   : > { %5411 = vmatpush3.msra.mxu0 %v7177_v38  ;;  %2201 = vmatprep.subr.mxu1 %v7183_v40 }
 0x53a   : > { %5412 = vmatprep.subr.mxu0 %v9154_v26  ;;  %2202 = vmatpush1.msra.mxu1 %v7190_v41 }
 0x53b   : > { %5413 = vmatpush3.msra.mxu0 %v7196_v42  ;;  %2203 = vmatprep.subr.mxu1 %v7202_v44 }
 0x53c   : > { %5414 = vmatprep.subr.mxu0 %v9154_v26  ;;  %2204 = vmatpush1.msra.mxu1 %v7209_v45 }
 0x53d   : > { %5415 = vmatpush3.msra.mxu0 %v7215_v47  ;;  %2205 = vmatprep.subr.mxu1 %v7221_v48 }
 0x53e   : > { %5416 = vmatprep.subr.mxu0 %v9154_v26  ;;  %2206 = vmatpush1.msra.mxu1 %v7228_v50 }
 0x53f   : > { %5417 = vmatpush3.msra.mxu0 %v7234_v51  ;;  %2207 = vmatprep.subr.mxu1 %v7240_v52 }
 0x540   : > { %5418 = vmatprep.subr.mxu0 %v9154_v26  ;;  %2208 = vmatpush1.msra.mxu1 %v7247_v53 }
 0x541   : > { %5419 = vmatpush3.msra.mxu0 %v7418_v63  ;;  %2209 = vmatprep.subr.mxu1 %v7254_v54 }
 0x542   : > { %5420 = vmatprep.subr.mxu0 %v9154_v26  ;;  %2210 = vmatpush1.msra.mxu1 %v7261_v55 }
 0x543   : > { %5421 = vmatpush3.msra.mxu0 %v7427_v10  ;;  %2211 = vmatprep.subr.mxu1 %v7268_v1 }
 0x544   : > { %5422 = vmatprep.subr.mxu0 %v9154_v26  ;;  %2212 = vmatpush1.msra.mxu1 %v7275_v56 }
 0x545   : > { %5423 = vmatpush3.msra.mxu0 %v7436_v11  ;;  %2213 = vmatprep.subr.mxu1 %v7282_v2 }
 0x546   : > { %5424 = vmatprep.subr.mxu0 %v9154_v26  ;;  %2214 = vmatpush1.msra.mxu1 %v7289_v57 }
 0x547   : > { %5425 = vmatpush3.msra.mxu0 %v7445_v9  ;;  %2215 = vmatprep.subr.mxu1 %v7296_v3 }
 0x548   : > { %5426 = vmatprep.subr.mxu0 %v9154_v26  ;;  %2216 = vmatpush1.msra.mxu1 %v7303_v58 }
 0x549   : > { %5427 = vmatpush3.msra.mxu0 %v7454_v46  ;;  %2217 = vmatprep.subr.mxu1 %v7310_v4 }
 0x54a   : > { %5428 = vmatprep.subr.mxu0 %v9154_v26  ;;  %2218 = vmatpush1.msra.mxu1 %v7317_v59 }
 0x54b   : > { %5429 = vmatpush3.msra.mxu0 %v7463_v29  ;;  %2219 = vmatprep.subr.mxu1 %v9188_v13 }
 0x54c   : > { %5430 = vmatprep.subr.mxu0 %v9154_v26  ;;  %2220 = vmatpush1.msra.mxu1 %v9189_v22 }
 0x54d   : > { %5431 = vmatpush3.msra.mxu0 %v9190_v24  ;;  %2221 = vmatprep.subr.mxu1 %v9191_v28 }
 0x54e   : > { %5432 = vmatprep.subr.mxu0 %v9154_v26  ;;  %2222 = vmatpush1.msra.mxu1 %v9192_v25 }
 0x54f   : > { %2255 = vmatprep.mubr.f32.mxu1 %v9154_v26  ;;  %5433 = vmatpush3.msra.mxu0 %v9193_v49 }
 0x550   : > { %5434 = vmatprep.mubr.msk.f32.mxu0 %vm6149_vm1, %v9154_v26  ;;  %2424 = vmatprep.subr.mxu1 %v9194_v31 }
 0x551   : > { %5437 = vmatprep.subr.mxu0 %v9154_v26 }
 0x5ee   : > { %v2024_v62 = vpop.f32.mrf.mxu1  ;;  %v2095_v7 = vpop.f32.mrf.mxu0 }
 0x5ef   : > { %v2099_v18 = vadd.f32 %v2024_v62, %v476_v6  ;;  %v2113_v6 = vadd.f32 %v7591_v32, %v2095_v7 }
 0x5f0   : > { %v5401_v0 = vpop.f32.mrf.mxu0  ;;  %v2026_v23 = vpop.f32.mrf.mxu1 }
 0x5f1   : > { %v4801_v16 = vmul.f32 -1.442695, %v2099_v18  ;;  %v2106_v20 = vadd.f32 %v2026_v23, %v478_v39  ;;  %v9198_v0 = vld [vmem:[#allocation28_spill] sm:$0xff] }
 0x5f3   : > { %5850 = vpow2.f32 %v4801_v16  ;;  %v4802_v49 = vmul.f32 -1.442695, %v2106_v20 }
 0x5f5   : > { %5852 = vpow2.f32 %v4802_v49 }
 0x600   : > { %v5851_v25 = vpop.eup %5850 }
 0x601   : > { %v2103_v31 = vadd.f32 1.0, %v5851_v25 }
 0x602   : > { %v5853_v28 = vpop.eup %5852 }
 0x603   : > { %5854 = vrcp.f32 %v2103_v31  ;;  %v2110_v24 = vadd.f32 1.0, %v5853_v28 }
 0x605   : > { %5856 = vrcp.f32 %v2110_v24 }
 0x610   : > { %v5855_v62 = vpop.eup %5854 }
 0x611   : > { %v2114_v18 = vmul.f32 %v5855_v62, %v2113_v6 }
 0x612   : > { %v5857_v49 = vpop.eup %5856 }
 0x613   : > { %v2115_v16 = vadd.f32 %v2114_v18, %v9198_v0  ;;  %v2117_v23 = vsub.f32 1.0, %v5857_v49  ;;  %v2119_v28 = vmul.f32 %v5857_v49, %v7496_v8 }
 0x615   : > { %5858 = vtanh.f32 %v2115_v16 }
 0x622   : > { %v5859_v25 = vpop.eup %5858 }
 0x623   : > { %v2118_v31 = vmul.f32 %v5859_v25, %v2117_v23 }
 0x625   : > { %v7596_v61 = vadd.f32 %v2119_v28, %v2118_v31  ;;  %v9199_v31 = vld [vmem:[#allocation6_spill] sm:$0xff] }
 0x626   : > { %v9200_v28 = vld [vmem:[#allocation58_spill] sm:$0xff] }
 0x627   : > { %v2122_v39 = vcombine.high %v7596_v61, %v7596_v61  ;;  %v2129_v7 = vrot.slane %v7596_v61, %v6873_v15  ;;  %2256 = vmatmul.mubr.f32.vlgmr.msra.gmra.mxu1 %v7596_v61  ;;  %5435 = vmatmul.mubr.f32.vlgmr.msra.gmra.mxu0 %v7596_v61 }
 0x628   : > { %2425 = vmatpush1.msra.mxu1 %v7082_v12  ;;  %5438 = vmatpush3.msra.mxu0 %v7088_v36 }
 0x629   : > { %v2136_v8 = vrot.slane %v2122_v39, %v6873_v15  ;;  %v2137_v24 = vcombine.high %v2129_v7, %v2129_v7  ;;  %v2145_v20 = vrot.slane %v2129_v7, %v6873_v15  ;;  %4803 = vst.sshfl [vmem:[%s6236_s16 + $0x5] sm:$0x1 pattern:$0x73625140] %v2129_v7  ;;  %2426 = vmatprep.subr.mxu1 %v7097_v33  ;;  %v9201_v39 = vld [vmem:[#allocation23_spill] sm:$0xff] }
 0x62a   : > { %5439 = vmatprep.subr.mxu0 %v9154_v26  ;;  %2427 = vmatpush1.msra.mxu1 %v7104_v60  ;;  %v9202_v7 = vld [vmem:[#allocation7_spill] sm:$0xff] }
 0x62b   : > { %5440 = vmatpush3.msra.mxu0 %v7110_v43  ;;  %v2138_v6 = vcombine.high %v2136_v8, %v2136_v8  ;;  %v2152_v62 = vrot.slane %v2136_v8, %v6873_v15  ;;  %v2159_v18 = vrot.slane %v2137_v24, %v6873_v15  ;;  %v2167_v0 = vcombine.high %v2145_v20, %v2145_v20 }
 0x62c   : > { %4804 = vst.sshfl [vmem:[%s6236_s16 + $0x15] sm:$0x1 pattern:$0x73625140] %v2137_v24  ;;  %2428 = vmatprep.subr.mxu1 %v7120_v14  ;;  %5441 = vmatprep.subr.mxu0 %v9154_v26  ;;  %v9204_v24 = vld [vmem:[#allocation45_spill] sm:$0xff] }
 0x62d   : > { %4805 = vst.sshfl [vmem:[%s6236_s16 + $0x45] sm:$0x1 pattern:$0x73625140] %v2136_v8  ;;  %2429 = vmatpush1.msra.mxu1 %v7127_v21  ;;  %v2166_v16 = vrot.slane %v2138_v6, %v6873_v15  ;;  %v2168_v49 = vcombine.high %v2152_v62, %v2152_v62  ;;  %v2169_v23 = vcombine.high %v2159_v18, %v2159_v18  ;;  %2181 = vst [vmem:[%s6236_s16 + $0x25] sm:$0x1] %v2167_v0 }
 0x62e   : > { %4806 = vst.sshfl [vmem:[%s6236_s16 + $0x55] sm:$0x1 pattern:$0x73625140] %v2138_v6  ;;  %5442 = vmatpush3.msra.mxu0 %v7136_v17  ;;  %2430 = vmatprep.subr.mxu1 %v7142_v19  ;;  %v9203_v8 = vld [vmem:[#allocation5_spill] sm:$0xff]  ;;  %v482_v20 = vadd.f32 %v9204_v24, %v9195_v30 }
 0x62f   : > { %5443 = vmatprep.subr.mxu0 %v9154_v26  ;;  %2431 = vmatpush1.msra.mxu1 %v7149_v27  ;;  %v2170_v25 = vcombine.high %v2166_v16, %v2166_v16  ;;  %2182 = vst [vmem:[%s6236_s16 + $0x35] sm:$0x1] %v2169_v23  ;;  %2185 = vst [vmem:[%s6236_s16 + $0x65] sm:$0x1] %v2168_v49  ;;  %v9205_v23 = vld [vmem:[#allocation47_spill] sm:$0xff] }
 0x630   : > { %5444 = vmatpush3.msra.mxu0 %v7157_v34  ;;  %2432 = vmatprep.subr.mxu1 %v7163_v35 }
 0x631   : > { %5445 = vmatprep.subr.mxu0 %v9154_v26  ;;  %2433 = vmatpush1.msra.mxu1 %v7170_v37  ;;  %2186 = vst [vmem:[%s6236_s16 + $0x75] sm:$0x1] %v2170_v25  ;;  %v484_v25 = vadd.f32 %v9205_v23, %v6843_v5 }
 0x632   : > { %5446 = vmatpush3.msra.mxu0 %v7177_v38  ;;  %2434 = vmatprep.subr.mxu1 %v7183_v40 }
 0x633   : > { %5447 = vmatprep.subr.mxu0 %v9154_v26  ;;  %2435 = vmatpush1.msra.mxu1 %v7190_v41 }
 0x634   : > { %5448 = vmatpush3.msra.mxu0 %v7196_v42  ;;  %2436 = vmatprep.subr.mxu1 %v7202_v44 }
 0x635   : > { %5449 = vmatprep.subr.mxu0 %v9154_v26  ;;  %2437 = vmatpush1.msra.mxu1 %v7209_v45 }
 0x636   : > { %5450 = vmatpush3.msra.mxu0 %v7215_v47  ;;  %2438 = vmatprep.subr.mxu1 %v7221_v48 }
 0x637   : > { %5451 = vmatprep.subr.mxu0 %v9154_v26  ;;  %2439 = vmatpush1.msra.mxu1 %v7228_v50 }
 0x638   : > { %5452 = vmatpush3.msra.mxu0 %v7234_v51  ;;  %2440 = vmatprep.subr.mxu1 %v7240_v52 }
 0x639   : > { %5453 = vmatprep.subr.mxu0 %v9154_v26  ;;  %2441 = vmatpush1.msra.mxu1 %v7247_v53 }
 0x63a   : > { %5454 = vmatpush3.msra.mxu0 %v7418_v63  ;;  %2442 = vmatprep.subr.mxu1 %v7254_v54 }
 0x63b   : > { %5455 = vmatprep.subr.mxu0 %v9154_v26  ;;  %2443 = vmatpush1.msra.mxu1 %v7261_v55 }
 0x63c   : > { %5456 = vmatpush3.msra.mxu0 %v7427_v10  ;;  %2444 = vmatprep.subr.mxu1 %v7268_v1 }
 0x63d   : > { %5457 = vmatprep.subr.mxu0 %v9154_v26  ;;  %2445 = vmatpush1.msra.mxu1 %v7275_v56 }
 0x63e   : > { %5458 = vmatpush3.msra.mxu0 %v7436_v11  ;;  %2446 = vmatprep.subr.mxu1 %v7282_v2 }
 0x63f   : > { %5459 = vmatprep.subr.mxu0 %v9154_v26  ;;  %2447 = vmatpush1.msra.mxu1 %v7289_v57 }
 0x640   : > { %5460 = vmatpush3.msra.mxu0 %v7445_v9  ;;  %2448 = vmatprep.subr.mxu1 %v7296_v3 }
 0x641   : > { %5461 = vmatprep.subr.mxu0 %v9154_v26  ;;  %2449 = vmatpush1.msra.mxu1 %v7303_v58 }
 0x642   : > { %5462 = vmatpush3.msra.mxu0 %v7454_v46  ;;  %2450 = vmatprep.subr.mxu1 %v7310_v4 }
 0x643   : > { %5463 = vmatprep.subr.mxu0 %v9154_v26  ;;  %2451 = vmatpush1.msra.mxu1 %v7317_v59 }
 0x644   : > { %5464 = vmatpush3.msra.mxu0 %v7463_v29  ;;  %2452 = vmatprep.subr.mxu1 %v9188_v13 }
 0x645   : > { %5465 = vmatprep.subr.mxu0 %v9154_v26  ;;  %2453 = vmatpush1.msra.mxu1 %v9189_v22 }
 0x646   : > { %5466 = vmatpush3.msra.mxu0 %v9199_v31  ;;  %2454 = vmatprep.subr.mxu1 %v9200_v28 }
 0x647   : > { %5467 = vmatprep.subr.mxu0 %v9154_v26  ;;  %2455 = vmatpush1.msra.mxu1 %v9201_v39 }
 0x648   : > { %2488 = vmatprep.mubr.f32.mxu1 %v9154_v26  ;;  %5468 = vmatpush3.msra.mxu0 %v9202_v7 }
 0x649   : > { %5469 = vmatprep.mubr.msk.f32.mxu0 %vm6149_vm1, %v9154_v26  ;;  %2657 = vmatprep.subr.mxu1 %v9203_v8 }
 0x64a   : > { %5472 = vmatprep.subr.mxu0 %v9154_v26 }
 0x6e7   : > { %v2257_v6 = vpop.f32.mrf.mxu1  ;;  %v2328_v62 = vpop.f32.mrf.mxu0 }
 0x6e8   : > { %v2332_v18 = vadd.f32 %v2257_v6, %v482_v20  ;;  %v2346_v24 = vadd.f32 %v7591_v32, %v2328_v62  ;;  %v9206_v20 = vld [vmem:[#allocation33_spill] sm:$0xff] }
 0x6e9   : > { %v5436_v0 = vpop.f32.mrf.mxu0  ;;  %v2259_v49 = vpop.f32.mrf.mxu1 }
 0x6ea   : > { %v4807_v16 = vmul.f32 -1.442695, %v2332_v18  ;;  %v2339_v7 = vadd.f32 %v2259_v49, %v484_v25 }
 0x6ec   : > { %5860 = vpow2.f32 %v4807_v16  ;;  %v4808_v39 = vmul.f32 -1.442695, %v2339_v7 }
 0x6ee   : > { %5862 = vpow2.f32 %v4808_v39 }
 0x6f9   : > { %v5861_v28 = vpop.eup %5860 }
 0x6fa   : > { %v2336_v8 = vadd.f32 1.0, %v5861_v28 }
 0x6fb   : > { %v5863_v31 = vpop.eup %5862 }
 0x6fc   : > { %5864 = vrcp.f32 %v2336_v8  ;;  %v2343_v22 = vadd.f32 1.0, %v5863_v31 }
 0x6fe   : > { %5866 = vrcp.f32 %v2343_v22 }
 0x709   : > { %v5865_v30 = vpop.eup %5864 }
 0x70a   : > { %v2347_v13 = vmul.f32 %v5865_v30, %v2346_v24 }
 0x70b   : > { %v5867_v18 = vpop.eup %5866 }
 0x70c   : > { %v2348_v6 = vadd.f32 %v2347_v13, %v9206_v20  ;;  %v2350_v0 = vsub.f32 1.0, %v5867_v18  ;;  %v2352_v39 = vmul.f32 %v5867_v18, %v7596_v61 }
 0x70e   : > { %5868 = vtanh.f32 %v2348_v6 }
 0x71b   : > { %v5869_v16 = vpop.eup %5868 }
 0x71c   : > { %v2351_v49 = vmul.f32 %v5869_v16, %v2350_v0  ;;  %v7802_v16 = vld [vmem:[%s9035_s2 + $0x168] sm:$0xff] }
 0x71e   : > { %v7691_v7 = vadd.f32 %v2352_v39, %v2351_v49  ;;  %v7808_v49 = vld [vmem:[%s9035_s2 + $0x178] sm:$0xff] }
 0x720   : > { %v2355_v31 = vcombine.high %v7691_v7, %v7691_v7  ;;  %v2362_v28 = vrot.slane %v7691_v7, %v6873_v15  ;;  %2489 = vmatmul.mubr.f32.vlgmr.msra.gmra.mxu1 %v7691_v7  ;;  %5470 = vmatmul.mubr.f32.vlgmr.msra.gmra.mxu0 %v7691_v7 }
 0x721   : > { %2658 = vmatpush1.msra.mxu1 %v7082_v12  ;;  %5473 = vmatpush3.msra.mxu0 %v7088_v36 }
 0x722   : > { %v2369_v13 = vrot.slane %v2355_v31, %v6873_v15  ;;  %v2370_v22 = vcombine.high %v2362_v28, %v2362_v28  ;;  %v2378_v30 = vrot.slane %v2362_v28, %v6873_v15  ;;  %4809 = vst.sshfl [vmem:[%s6236_s16 + $0x6] sm:$0x1 pattern:$0x73625140] %v2362_v28  ;;  %2659 = vmatprep.subr.mxu1 %v7097_v33  ;;  %v7817_v28 = vld [vmem:[%s9035_s2 + $0x158] sm:$0xff] }
 0x723   : > { %5474 = vmatprep.subr.mxu0 %v9154_v26  ;;  %2660 = vmatpush1.msra.mxu1 %v7104_v60 }
 0x724   : > { %5475 = vmatpush3.msra.mxu0 %v7110_v43  ;;  %v2371_v61 = vcombine.high %v2369_v13, %v2369_v13  ;;  %v2385_v12 = vrot.slane %v2369_v13, %v6873_v15  ;;  %v2392_v36 = vrot.slane %v2370_v22, %v6873_v15  ;;  %v2400_v62 = vcombine.high %v2378_v30, %v2378_v30 }
 0x725   : > { %4810 = vst.sshfl [vmem:[%s6236_s16 + $0x16] sm:$0x1 pattern:$0x73625140] %v2370_v22  ;;  %2661 = vmatprep.subr.mxu1 %v7120_v14  ;;  %5476 = vmatprep.subr.mxu0 %v9154_v26  ;;  %v7830_v22 = vld [vmem:[%s9035_s2 + $0x160] sm:$0xff] }
 0x726   : > { %4811 = vst.sshfl [vmem:[%s6236_s16 + $0x46] sm:$0x1 pattern:$0x73625140] %v2369_v13  ;;  %2662 = vmatpush1.msra.mxu1 %v7127_v21  ;;  %v2399_v33 = vrot.slane %v2371_v61, %v6873_v15  ;;  %v2401_v60 = vcombine.high %v2385_v12, %v2385_v12  ;;  %v2402_v43 = vcombine.high %v2392_v36, %v2392_v36  ;;  %2414 = vst [vmem:[%s6236_s16 + $0x26] sm:$0x1] %v2400_v62 }
 0x727   : > { %4812 = vst.sshfl [vmem:[%s6236_s16 + $0x56] sm:$0x1 pattern:$0x73625140] %v2371_v61  ;;  %5477 = vmatpush3.msra.mxu0 %v7136_v17  ;;  %2663 = vmatprep.subr.mxu1 %v7142_v19  ;;  %v9207_v21 = vld [vmem:[#allocation17_spill] sm:$0xff]  ;;  %v9208_v17 = vld [vmem:[#allocation19_spill] sm:$0xff] }
 0x728   : > { %5478 = vmatprep.subr.mxu0 %v9154_v26  ;;  %2664 = vmatpush1.msra.mxu1 %v7149_v27  ;;  %v2403_v14 = vcombine.high %v2399_v33, %v2399_v33  ;;  %2415 = vst [vmem:[%s6236_s16 + $0x36] sm:$0x1] %v2402_v43  ;;  %2418 = vst [vmem:[%s6236_s16 + $0x66] sm:$0x1] %v2401_v60  ;;  %v9209_v19 = vld [vmem:[#allocation6_spill] sm:$0xff]  ;;  %v7840_v62 = vld [vmem:[%s9035_s2 + $0x140] sm:$0xff] }
 0x729   : > { %5479 = vmatpush3.msra.mxu0 %v7157_v34  ;;  %2665 = vmatprep.subr.mxu1 %v7163_v35  ;;  %v9210_v27 = vld [vmem:[#allocation58_spill] sm:$0xff]  ;;  %v9211_v34 = vld [vmem:[#allocation23_spill] sm:$0xff] }
 0x72a   : > { %5480 = vmatprep.subr.mxu0 %v9154_v26  ;;  %2666 = vmatpush1.msra.mxu1 %v7170_v37  ;;  %2419 = vst [vmem:[%s6236_s16 + $0x76] sm:$0x1] %v2403_v14  ;;  %v9212_v35 = vld [vmem:[#allocation7_spill] sm:$0xff]  ;;  %v7780_v37 = vld [vmem:[%s9035_s2 + $0x170] sm:$0xff] }
 0x72b   : > { %5481 = vmatpush3.msra.mxu0 %v7177_v38  ;;  %2667 = vmatprep.subr.mxu1 %v7183_v40  ;;  %9213 = vst [vmem:[#allocation10_spill] sm:$0xff] %v7780_v37  ;;  %v9214_v38 = vld [vmem:[#allocation43_spill] sm:$0xff]  ;;  %v9215_v40 = vld [vmem:[#allocation48_spill] sm:$0xff]  ;;  %v7824_v13 = vld [vmem:[%s9035_s2 + $0x150] sm:$0xff] }
 0x72c   : > { %5482 = vmatprep.subr.mxu0 %v9154_v26  ;;  %2668 = vmatpush1.msra.mxu1 %v7190_v41  ;;  %v488_v41 = vadd.f32 %v9215_v40, %v9214_v38  ;;  %v7847_v33 = vld [vmem:[%s9035_s2 + $0x138] sm:$0xff]  ;;  %v7877_v40 = vld [vmem:[%s9035_s2 + $0x130] sm:$0xff] }
 0x72d   : > { %5483 = vmatpush3.msra.mxu0 %v7196_v42  ;;  %2669 = vmatprep.subr.mxu1 %v7202_v44 }
 0x72e   : > { %5484 = vmatprep.subr.mxu0 %v9154_v26  ;;  %2670 = vmatpush1.msra.mxu1 %v7209_v45 }
 0x72f   : > { %5485 = vmatpush3.msra.mxu0 %v7215_v47  ;;  %2671 = vmatprep.subr.mxu1 %v7221_v48 }
 0x730   : > { %5486 = vmatprep.subr.mxu0 %v9154_v26  ;;  %2672 = vmatpush1.msra.mxu1 %v7228_v50 }
 0x731   : > { %5487 = vmatpush3.msra.mxu0 %v7234_v51  ;;  %2673 = vmatprep.subr.mxu1 %v7240_v52  ;;  %v9216_v51 = vld [vmem:[#allocation49_spill] sm:$0xff] }
 0x732   : > { %5488 = vmatprep.subr.mxu0 %v9154_v26  ;;  %2674 = vmatpush1.msra.mxu1 %v7247_v53  ;;  %v490_v52 = vadd.f32 %v9216_v51, %v6843_v5  ;;  %v7929_v51 = vld [vmem:[%s9035_s2 + $0xd8] sm:$0xff] }
 0x733   : > { %5489 = vmatpush3.msra.mxu0 %v7418_v63  ;;  %2675 = vmatprep.subr.mxu1 %v7254_v54 }
 0x734   : > { %5490 = vmatprep.subr.mxu0 %v9154_v26  ;;  %2676 = vmatpush1.msra.mxu1 %v7261_v55 }
 0x735   : > { %5491 = vmatpush3.msra.mxu0 %v7427_v10  ;;  %2677 = vmatprep.subr.mxu1 %v7268_v1 }
 0x736   : > { %5492 = vmatprep.subr.mxu0 %v9154_v26  ;;  %2678 = vmatpush1.msra.mxu1 %v7275_v56 }
 0x737   : > { %5493 = vmatpush3.msra.mxu0 %v7436_v11  ;;  %2679 = vmatprep.subr.mxu1 %v7282_v2 }
 0x738   : > { %5494 = vmatprep.subr.mxu0 %v9154_v26  ;;  %2680 = vmatpush1.msra.mxu1 %v7289_v57 }
 0x739   : > { %5495 = vmatpush3.msra.mxu0 %v7445_v9  ;;  %2681 = vmatprep.subr.mxu1 %v7296_v3 }
 0x73a   : > { %5496 = vmatprep.subr.mxu0 %v9154_v26  ;;  %2682 = vmatpush1.msra.mxu1 %v7303_v58 }
 0x73b   : > { %5497 = vmatpush3.msra.mxu0 %v7454_v46  ;;  %2683 = vmatprep.subr.mxu1 %v7310_v4  ;;  %v9217_v4 = vld [vmem:[#allocation31_spill] sm:$0xff] }
 0x73c   : > { %5498 = vmatprep.subr.mxu0 %v9154_v26  ;;  %2684 = vmatpush1.msra.mxu1 %v7317_v59 }
 0x73d   : > { %5499 = vmatpush3.msra.mxu0 %v7463_v29  ;;  %2685 = vmatprep.subr.mxu1 %v9207_v21  ;;  %v7856_v21 = vld [vmem:[%s9035_s2 + $0x148] sm:$0xff] }
 0x73e   : > { %5500 = vmatprep.subr.mxu0 %v9154_v26  ;;  %2686 = vmatpush1.msra.mxu1 %v9208_v17  ;;  %v7862_v17 = vld [vmem:[%s9035_s2 + $0x128] sm:$0xff] }
 0x73f   : > { %5501 = vmatpush3.msra.mxu0 %v9209_v19  ;;  %2687 = vmatprep.subr.mxu1 %v9210_v27  ;;  %v7869_v27 = vld [vmem:[%s9035_s2 + $0x120] sm:$0xff] }
 0x740   : > { %5502 = vmatprep.subr.mxu0 %v9154_v26  ;;  %2688 = vmatpush1.msra.mxu1 %v9211_v34 }
 0x741   : > { %2721 = vmatprep.mubr.f32.mxu1 %v9154_v26  ;;  %5503 = vmatpush3.msra.mxu0 %v9212_v35 }
 0x742   : > { %5504 = vmatprep.mubr.msk.f32.mxu0 %vm6149_vm1, %v9154_v26  ;;  %2894 = vmatprep.subr.mxu1 %v7780_v37 }
 0x743   : > { %5507 = vmatprep.subr.mxu0 %v9154_v26 }
 0x7e0   : > { %v2490_v42 = vpop.f32.mrf.mxu1  ;;  %v2561_v44 = vpop.f32.mrf.mxu0 }
 0x7e1   : > { %v2565_v45 = vadd.f32 %v2490_v42, %v488_v41  ;;  %v2579_v57 = vadd.f32 %v7591_v32, %v2561_v44  ;;  %v7883_v41 = vld [vmem:[%s9035_s2 + $0x110] sm:$0xff]  ;;  %v7890_v42 = vld [vmem:[%s9035_s2 + $0x108] sm:$0xff]  ;;  %v7897_v44 = vld [vmem:[%s9035_s2 + $0x118] sm:$0xff] }
 0x7e2   : > { %v5471_v47 = vpop.f32.mrf.mxu0  ;;  %v2492_v50 = vpop.f32.mrf.mxu1 }
 0x7e3   : > { %v4813_v48 = vmul.f32 -1.442695, %v2565_v45  ;;  %v2572_v53 = vadd.f32 %v2492_v50, %v490_v52  ;;  %v7903_v45 = vld [vmem:[%s9035_s2 + $0xf8] sm:$0xff]  ;;  %v7910_v47 = vld [vmem:[%s9035_s2 + $0xf0] sm:$0xff]  ;;  %v7922_v50 = vld [vmem:[%s9035_s2 + $0xe0] sm:$0xff] }
 0x7e4   : > { %v7935_v52 = vld [vmem:[%s9035_s2 + $0xe8] sm:$0xff] }
 0x7e5   : > { %5870 = vpow2.f32 %v4813_v48  ;;  %v4814_v54 = vmul.f32 -1.442695, %v2572_v53  ;;  %v7916_v48 = vld [vmem:[%s9035_s2 + $0x100] sm:$0xff]  ;;  %v7941_v53 = vld [vmem:[%s9035_s2 + $0xc8] sm:$0xff] }
 0x7e7   : > { %5872 = vpow2.f32 %v4814_v54  ;;  %v7948_v54 = vld [vmem:[%s9035_s2 + $0xc0] sm:$0xff] }
 0x7f2   : > { %v5871_v55 = vpop.eup %5870 }
 0x7f3   : > { %v2569_v1 = vadd.f32 1.0, %v5871_v55  ;;  %v7954_v55 = vld [vmem:[%s9035_s2 + $0xd0] sm:$0xff] }
 0x7f4   : > { %v5873_v56 = vpop.eup %5872 }
 0x7f5   : > { %5874 = vrcp.f32 %v2569_v1  ;;  %v2576_v2 = vadd.f32 1.0, %v5873_v56  ;;  %v7960_v1 = vld [vmem:[%s9035_s2 + $0xb0] sm:$0xff]  ;;  %v7967_v56 = vld [vmem:[%s9035_s2 + $0xa8] sm:$0xff] }
 0x7f7   : > { %5876 = vrcp.f32 %v2576_v2  ;;  %v7974_v2 = vld [vmem:[%s9035_s2 + $0x98] sm:$0xff] }
 0x802   : > { %v5875_v3 = vpop.eup %5874 }
 0x803   : > { %v2580_v58 = vmul.f32 %v5875_v3, %v2579_v57  ;;  %v7981_v57 = vld [vmem:[%s9035_s2 + $0x90] sm:$0xff]  ;;  %v7995_v3 = vld [vmem:[%s9035_s2 + $0x78] sm:$0xff] }
 0x804   : > { %v5877_v23 = vpop.eup %5876 }
 0x805   : > { %v2581_v59 = vadd.f32 %v2580_v58, %v9217_v4  ;;  %v2583_v25 = vsub.f32 1.0, %v5877_v23  ;;  %v2585_v20 = vmul.f32 %v5877_v23, %v7691_v7  ;;  %v8009_v58 = vld [vmem:[%s9035_s2 + $0x60] sm:$0xff]  ;;  %v8023_v4 = vld [vmem:[%s9035_s2 + $0x48] sm:$0xff]  ;;  %v8051_v23 = vld [vmem:[%s9035_s2 + $0x18] sm:$0xff] }
 0x806   : > { %9220 = vst [vmem:[#allocation11_spill] sm:$0xff] %v8051_v23 }
 0x807   : > { %5878 = vtanh.f32 %v2581_v59  ;;  %v8037_v59 = vld [vmem:[%s9035_s2 + $0x30] sm:$0xff] }
 0x808   : > { %9218 = vst [vmem:[#allocation8_spill] sm:$0xff] %v8037_v59 }
 0x814   : > { %v5879_v8 = vpop.eup %5878 }
 0x815   : > { %v2584_v24 = vmul.f32 %v5879_v8, %v2583_v25  ;;  %v8065_v25 = vld [vmem:[%s9035_s2] sm:$0xff] }
 0x816   : > { %9222 = vst [vmem:[#allocation24_spill] sm:$0xff] %v8065_v25 }
 0x817   : > { %v7791_v6 = vadd.f32 %v2585_v20, %v2584_v24 }
 0x819   : > { %v2588_v18 = vcombine.high %v7791_v6, %v7791_v6  ;;  %v2595_v0 = vrot.slane %v7791_v6, %v6873_v15  ;;  %2722 = vmatmul.mubr.f32.vlgmr.msra.gmra.mxu1 %v7791_v6  ;;  %5505 = vmatmul.mubr.f32.vlgmr.msra.gmra.mxu0 %v7791_v6 }
 0x81a   : > { %2895 = vmatpush1.msra.mxu1 %v7802_v16  ;;  %5508 = vmatpush3.msra.mxu0 %v7808_v49 }
 0x81b   : > { %v2602_v39 = vrot.slane %v2588_v18, %v6873_v15  ;;  %v2603_v7 = vcombine.high %v2595_v0, %v2595_v0  ;;  %v2611_v31 = vrot.slane %v2595_v0, %v6873_v15  ;;  %4815 = vst.sshfl [vmem:[%s6236_s16 + $0x7] sm:$0x1 pattern:$0x73625140] %v2595_v0  ;;  %2896 = vmatprep.subr.mxu1 %v7817_v28 }
 0x81c   : > { %5509 = vmatprep.subr.mxu0 %v9154_v26  ;;  %2897 = vmatpush1.msra.mxu1 %v7824_v13 }
 0x81d   : > { %5510 = vmatpush3.msra.mxu0 %v7830_v22  ;;  %v2604_v30 = vcombine.high %v2602_v39, %v2602_v39  ;;  %v2618_v61 = vrot.slane %v2602_v39, %v6873_v15  ;;  %v2625_v12 = vrot.slane %v2603_v7, %v6873_v15  ;;  %v2633_v36 = vcombine.high %v2611_v31, %v2611_v31  ;;  %v9224_v31 = vld [vmem:[#allocation51_spill] sm:$0xff] }
 0x81e   : > { %4816 = vst.sshfl [vmem:[%s6236_s16 + $0x17] sm:$0x1 pattern:$0x73625140] %v2603_v7  ;;  %2898 = vmatprep.subr.mxu1 %v7840_v62  ;;  %5511 = vmatprep.subr.mxu0 %v9154_v26 }
 0x81f   : > { %4817 = vst.sshfl [vmem:[%s6236_s16 + $0x47] sm:$0x1 pattern:$0x73625140] %v2602_v39  ;;  %2899 = vmatpush1.msra.mxu1 %v7847_v33  ;;  %v2632_v60 = vrot.slane %v2604_v30, %v6873_v15  ;;  %v2634_v43 = vcombine.high %v2618_v61, %v2618_v61  ;;  %v2635_v14 = vcombine.high %v2625_v12, %v2625_v12  ;;  %2647 = vst [vmem:[%s6236_s16 + $0x27] sm:$0x1] %v2633_v36 }
 0x820   : > { %4818 = vst.sshfl [vmem:[%s6236_s16 + $0x57] sm:$0x1 pattern:$0x73625140] %v2604_v30  ;;  %5512 = vmatpush3.msra.mxu0 %v7856_v21  ;;  %2900 = vmatprep.subr.mxu1 %v7862_v17  ;;  %v496_v30 = vadd.f32 %v9224_v31, %v6843_v5 }
 0x821   : > { %5513 = vmatprep.subr.mxu0 %v9154_v26  ;;  %2901 = vmatpush1.msra.mxu1 %v7869_v27  ;;  %v2636_v34 = vcombine.high %v2632_v60, %v2632_v60  ;;  %2648 = vst [vmem:[%s6236_s16 + $0x37] sm:$0x1] %v2635_v14  ;;  %2651 = vst [vmem:[%s6236_s16 + $0x67] sm:$0x1] %v2634_v43 }
 0x822   : > { %5514 = vmatpush3.msra.mxu0 %v7877_v40  ;;  %2902 = vmatprep.subr.mxu1 %v7883_v41 }
 0x823   : > { %5515 = vmatprep.subr.mxu0 %v9154_v26  ;;  %2903 = vmatpush1.msra.mxu1 %v7890_v42  ;;  %2652 = vst [vmem:[%s6236_s16 + $0x77] sm:$0x1] %v2636_v34 }
 0x824   : > { %5516 = vmatpush3.msra.mxu0 %v7897_v44  ;;  %2904 = vmatprep.subr.mxu1 %v7903_v45 }
 0x825   : > { %5517 = vmatprep.subr.mxu0 %v9154_v26  ;;  %2905 = vmatpush1.msra.mxu1 %v7910_v47 }
 0x826   : > { %5518 = vmatpush3.msra.mxu0 %v7916_v48  ;;  %2906 = vmatprep.subr.mxu1 %v7922_v50 }
 0x827   : > { %5519 = vmatprep.subr.mxu0 %v9154_v26  ;;  %2907 = vmatpush1.msra.mxu1 %v7929_v51 }
 0x828   : > { %5520 = vmatpush3.msra.mxu0 %v7935_v52  ;;  %2908 = vmatprep.subr.mxu1 %v7941_v53 }
 0x829   : > { %5521 = vmatprep.subr.mxu0 %v9154_v26  ;;  %2909 = vmatpush1.msra.mxu1 %v7948_v54 }
 0x82a   : > { %5522 = vmatpush3.msra.mxu0 %v7954_v55  ;;  %2910 = vmatprep.subr.mxu1 %v7960_v1 }
 0x82b   : > { %5523 = vmatprep.subr.mxu0 %v9154_v26  ;;  %2911 = vmatpush1.msra.mxu1 %v7967_v56 }
 0x82c   : > { %5524 = vmatpush3.msra.mxu0 %v7418_v63  ;;  %2912 = vmatprep.subr.mxu1 %v7974_v2  ;;  %v7988_v63 = vld [vmem:[%s9035_s2 + $0x80] sm:$0xff] }
 0x82d   : > { %5525 = vmatprep.subr.mxu0 %v9154_v26  ;;  %2913 = vmatpush1.msra.mxu1 %v7981_v57 }
 0x82e   : > { %5526 = vmatpush3.msra.mxu0 %v7427_v10  ;;  %2914 = vmatprep.subr.mxu1 %v7988_v63  ;;  %v8002_v10 = vld [vmem:[%s9035_s2 + $0x68] sm:$0xff] }
 0x82f   : > { %5527 = vmatprep.subr.mxu0 %v9154_v26  ;;  %2915 = vmatpush1.msra.mxu1 %v7995_v3 }
 0x830   : > { %5528 = vmatpush3.msra.mxu0 %v7436_v11  ;;  %2916 = vmatprep.subr.mxu1 %v8002_v10  ;;  %v8016_v11 = vld [vmem:[%s9035_s2 + $0x50] sm:$0xff] }
 0x831   : > { %5529 = vmatprep.subr.mxu0 %v9154_v26  ;;  %2917 = vmatpush1.msra.mxu1 %v8009_v58 }
 0x832   : > { %5530 = vmatpush3.msra.mxu0 %v7445_v9  ;;  %2918 = vmatprep.subr.mxu1 %v8016_v11  ;;  %v8030_v9 = vld [vmem:[%s9035_s2 + $0x38] sm:$0xff] }
 0x833   : > { %5531 = vmatprep.subr.mxu0 %v9154_v26  ;;  %2919 = vmatpush1.msra.mxu1 %v8023_v4 }
 0x834   : > { %5532 = vmatpush3.msra.mxu0 %v7454_v46  ;;  %2920 = vmatprep.subr.mxu1 %v8030_v9  ;;  %v8044_v46 = vld [vmem:[%s9035_s2 + $0x20] sm:$0xff] }
 0x835   : > { %5533 = vmatprep.subr.mxu0 %v9154_v26  ;;  %2921 = vmatpush1.msra.mxu1 %v8037_v59  ;;  %9219 = vst [vmem:[#allocation9_spill] sm:$0xff] %v8044_v46 }
 0x836   : > { %5534 = vmatpush3.msra.mxu0 %v7463_v29  ;;  %2922 = vmatprep.subr.mxu1 %v8044_v46  ;;  %v8058_v29 = vld [vmem:[%s9035_s2 + $0x8] sm:$0xff] }
 0x837   : > { %5535 = vmatprep.subr.mxu0 %v9154_v26  ;;  %2923 = vmatpush1.msra.mxu1 %v8051_v23  ;;  %9221 = vst [vmem:[#allocation22_spill] sm:$0xff] %v8058_v29 }
 0x838   : > { %5536 = vmatpush3.msra.mxu0 %v9209_v19  ;;  %2924 = vmatprep.subr.mxu1 %v8058_v29  ;;  %v9223_v19 = vld [vmem:[#allocation50_spill] sm:$0xff] }
 0x839   : > { %5537 = vmatprep.subr.mxu0 %v9154_v26  ;;  %2925 = vmatpush1.msra.mxu1 %v8065_v25  ;;  %v494_v8 = vadd.f32 %v9223_v19, %v9214_v38 }
 0x83a   : > { %2958 = vmatprep.mubr.f32.mxu1 %v9154_v26  ;;  %5538 = vmatpush3.msra.mxu0 %v9212_v35 }
 0x83b   : > { %5539 = vmatprep.mubr.msk.f32.mxu0 %vm6149_vm1, %v9154_v26  ;;  %3128 = vmatprep.subr.mxu1 %v7780_v37 }
 0x83c   : > { %5542 = vmatprep.subr.mxu0 %v9154_v26 }
 0x8d9   : > { %v2723_v24 = vpop.f32.mrf.mxu1  ;;  %v2794_v20 = vpop.f32.mrf.mxu0 }
 0x8da   : > { %v2798_v18 = vadd.f32 %v2723_v24, %v494_v8  ;;  %v2812_v14 = vadd.f32 %v7591_v32, %v2794_v20  ;;  %v9225_v8 = vld [vmem:[#allocation36_spill] sm:$0xff] }
 0x8db   : > { %v5506_v0 = vpop.f32.mrf.mxu0  ;;  %v2725_v7 = vpop.f32.mrf.mxu1 }
 0x8dc   : > { %v4819_v39 = vmul.f32 -1.442695, %v2798_v18  ;;  %v2805_v35 = vadd.f32 %v2725_v7, %v496_v30 }
 0x8de   : > { %5880 = vpow2.f32 %v4819_v39  ;;  %v4820_v61 = vmul.f32 -1.442695, %v2805_v35  ;;  %v2821_v39 = vstv %s2820_s10 }
 0x8df   : > { %vm8082_vm2 = vcmp.eq.s32.totalorder %v2821_v39, 1 }
 0x8e0   : > { %5882 = vpow2.f32 %v4820_v61 }
 0x8eb   : > { %v5881_v12 = vpop.eup %5880 }
 0x8ec   : > { %v2802_v36 = vadd.f32 1.0, %v5881_v12 }
 0x8ed   : > { %v5883_v60 = vpop.eup %5882 }
 0x8ee   : > { %5884 = vrcp.f32 %v2802_v36  ;;  %v2809_v43 = vadd.f32 1.0, %v5883_v60 }
 0x8f0   : > { %5886 = vrcp.f32 %v2809_v43 }
 0x8fb   : > { %v5885_v34 = vpop.eup %5884 }
 0x8fc   : > { %v2813_v19 = vmul.f32 %v5885_v34, %v2812_v14 }
 0x8fd   : > { %v5887_v18 = vpop.eup %5886 }
 0x8fe   : > { %v2814_v24 = vadd.f32 %v2813_v19, %v9225_v8  ;;  %v2816_v0 = vsub.f32 1.0, %v5887_v18  ;;  %v2818_v30 = vmul.f32 %v5887_v18, %v7791_v6 }
 0x900   : > { %5888 = vtanh.f32 %v2814_v24 }
 0x90d   : > { %v5889_v7 = vpop.eup %5888 }
 0x90e   : > { %v2817_v31 = vmul.f32 %v5889_v7, %v2816_v0 }
 0x910   : > { %v2819_v20 = vadd.f32 %v2818_v30, %v2817_v31  ;;  %v8146_v31 = vld [vmem:[%s9035_s2 + $0xb8] sm:$0xff]  ;;  %v8155_v30 = vld [vmem:[%s9035_s2 + $0xa0] sm:$0xff] }
 0x912   : > { %v8089_v61 = vsel %vm8082_vm2, %v2819_v20, %v7791_v6  ;;  %v8164_v20 = vld [vmem:[%s9035_s2 + $0x88] sm:$0xff] }
 0x913   : > { %v2825_v12 = vcombine.high %v8089_v61, %v8089_v61  ;;  %v2832_v36 = vrot.slane %v8089_v61, %v6873_v15  ;;  %2959 = vmatmul.mubr.f32.vlgmr.msra.gmra.mxu1 %v8089_v61  ;;  %5540 = vmatmul.mubr.f32.vlgmr.msra.gmra.mxu0 %v8089_v61 }
 0x914   : > { %3129 = vmatpush1.msra.mxu1 %v7802_v16  ;;  %5543 = vmatpush3.msra.mxu0 %v7808_v49 }
 0x915   : > { %v2839_v60 = vrot.slane %v2825_v12, %v6873_v15  ;;  %v2840_v43 = vcombine.high %v2832_v36, %v2832_v36  ;;  %v2848_v14 = vrot.slane %v2832_v36, %v6873_v15  ;;  %4821 = vst.sshfl [vmem:[%s6236_s16 + $0x8] sm:$0x1 pattern:$0x73625140] %v2832_v36  ;;  %3130 = vmatprep.subr.mxu1 %v7817_v28  ;;  %v8173_v12 = vld [vmem:[%s9035_s2 + $0x70] sm:$0xff]  ;;  %v8182_v36 = vld [vmem:[%s9035_s2 + $0x58] sm:$0xff] }
 0x916   : > { %5544 = vmatprep.subr.mxu0 %v9154_v26  ;;  %3131 = vmatpush1.msra.mxu1 %v7824_v13 }
 0x917   : > { %5545 = vmatpush3.msra.mxu0 %v7830_v22  ;;  %v2841_v34 = vcombine.high %v2839_v60, %v2839_v60  ;;  %v2855_v19 = vrot.slane %v2839_v60, %v6873_v15  ;;  %v2862_v8 = vrot.slane %v2840_v43, %v6873_v15  ;;  %v2870_v24 = vcombine.high %v2848_v14, %v2848_v14  ;;  %v8210_v14 = vld [vmem:[%s9035_s2 + $0x10] sm:$0xff] }
 0x918   : > { %4822 = vst.sshfl [vmem:[%s6236_s16 + $0x18] sm:$0x1 pattern:$0x73625140] %v2840_v43  ;;  %3132 = vmatprep.subr.mxu1 %v7840_v62  ;;  %5546 = vmatprep.subr.mxu0 %v9154_v26  ;;  %v8200_v43 = vld [vmem:[%s9035_s2 + $0x28] sm:$0xff]  ;;  %9230 = vst [vmem:[#allocation29_spill] sm:$0xff] %v8210_v14 }
 0x919   : > { %4823 = vst.sshfl [vmem:[%s6236_s16 + $0x48] sm:$0x1 pattern:$0x73625140] %v2839_v60  ;;  %3133 = vmatpush1.msra.mxu1 %v7847_v33  ;;  %v2869_v18 = vrot.slane %v2841_v34, %v6873_v15  ;;  %v2871_v0 = vcombine.high %v2855_v19, %v2855_v19  ;;  %v2872_v39 = vcombine.high %v2862_v8, %v2862_v8  ;;  %2884 = vst [vmem:[%s6236_s16 + $0x28] sm:$0x1] %v2870_v24 }
 0x91a   : > { %4824 = vst.sshfl [vmem:[%s6236_s16 + $0x58] sm:$0x1 pattern:$0x73625140] %v2841_v34  ;;  %5547 = vmatpush3.msra.mxu0 %v7856_v21  ;;  %3134 = vmatprep.subr.mxu1 %v7862_v17  ;;  %v8191_v60 = vld [vmem:[%s9035_s2 + $0x40] sm:$0xff]  ;;  %9229 = vst [vmem:[#allocation26_spill] sm:$0xff] %v8200_v43 }
 0x91b   : > { %5548 = vmatprep.subr.mxu0 %v9154_v26  ;;  %3135 = vmatpush1.msra.mxu1 %v7869_v27  ;;  %v2873_v7 = vcombine.high %v2869_v18, %v2869_v18  ;;  %2885 = vst [vmem:[%s6236_s16 + $0x38] sm:$0x1] %v2872_v39  ;;  %2888 = vst [vmem:[%s6236_s16 + $0x68] sm:$0x1] %v2871_v0  ;;  %v9231_v34 = vld [vmem:[#allocation52_spill] sm:$0xff] }
 0x91c   : > { %5549 = vmatpush3.msra.mxu0 %v7877_v40  ;;  %3136 = vmatprep.subr.mxu1 %v7883_v41  ;;  %9228 = vst [vmem:[#allocation27_spill] sm:$0xff] %v8191_v60  ;;  %v500_v19 = vadd.f32 %v9231_v34, %v9214_v38 }
 0x91d   : > { %5550 = vmatprep.subr.mxu0 %v9154_v26  ;;  %3137 = vmatpush1.msra.mxu1 %v7890_v42  ;;  %2889 = vst [vmem:[%s6236_s16 + $0x78] sm:$0x1] %v2873_v7 }
 0x91e   : > { %5551 = vmatpush3.msra.mxu0 %v7897_v44  ;;  %3138 = vmatprep.subr.mxu1 %v7903_v45 }
 0x91f   : > { %5552 = vmatprep.subr.mxu0 %v9154_v26  ;;  %3139 = vmatpush1.msra.mxu1 %v7910_v47 }
 0x920   : > { %5553 = vmatpush3.msra.mxu0 %v7916_v48  ;;  %3140 = vmatprep.subr.mxu1 %v7922_v50 }
 0x921   : > { %5554 = vmatprep.subr.mxu0 %v9154_v26  ;;  %3141 = vmatpush1.msra.mxu1 %v7929_v51 }
 0x922   : > { %5555 = vmatpush3.msra.mxu0 %v7935_v52  ;;  %3142 = vmatprep.subr.mxu1 %v7941_v53 }
 0x923   : > { %5556 = vmatprep.subr.mxu0 %v9154_v26  ;;  %3143 = vmatpush1.msra.mxu1 %v7948_v54 }
 0x924   : > { %5557 = vmatpush3.msra.mxu0 %v7954_v55  ;;  %3144 = vmatprep.subr.mxu1 %v7960_v1 }
 0x925   : > { %5558 = vmatprep.subr.mxu0 %v9154_v26  ;;  %3145 = vmatpush1.msra.mxu1 %v7967_v56 }
 0x926   : > { %5559 = vmatpush3.msra.mxu0 %v8146_v31  ;;  %3146 = vmatprep.subr.mxu1 %v7974_v2 }
 0x927   : > { %5560 = vmatprep.subr.mxu0 %v9154_v26  ;;  %3147 = vmatpush1.msra.mxu1 %v7981_v57 }
 0x928   : > { %5561 = vmatpush3.msra.mxu0 %v8155_v30  ;;  %3148 = vmatprep.subr.mxu1 %v7988_v63 }
 0x929   : > { %5562 = vmatprep.subr.mxu0 %v9154_v26  ;;  %3149 = vmatpush1.msra.mxu1 %v7995_v3 }
 0x92a   : > { %5563 = vmatpush3.msra.mxu0 %v8164_v20  ;;  %3150 = vmatprep.subr.mxu1 %v8002_v10 }
 0x92b   : > { %5564 = vmatprep.subr.mxu0 %v9154_v26  ;;  %3151 = vmatpush1.msra.mxu1 %v8009_v58 }
 0x92c   : > { %5565 = vmatpush3.msra.mxu0 %v8173_v12  ;;  %3152 = vmatprep.subr.mxu1 %v8016_v11 }
 0x92d   : > { %5566 = vmatprep.subr.mxu0 %v9154_v26  ;;  %3153 = vmatpush1.msra.mxu1 %v8023_v4 }
 0x92e   : > { %5567 = vmatpush3.msra.mxu0 %v8182_v36  ;;  %3154 = vmatprep.subr.mxu1 %v8030_v9 }
 0x92f   : > { %5568 = vmatprep.subr.mxu0 %v9154_v26  ;;  %3155 = vmatpush1.msra.mxu1 %v8037_v59 }
 0x930   : > { %5569 = vmatpush3.msra.mxu0 %v8191_v60  ;;  %3156 = vmatprep.subr.mxu1 %v8044_v46 }
 0x931   : > { %5570 = vmatprep.subr.mxu0 %v9154_v26  ;;  %3157 = vmatpush1.msra.mxu1 %v8051_v23 }
 0x932   : > { %5571 = vmatpush3.msra.mxu0 %v8200_v43  ;;  %3158 = vmatprep.subr.mxu1 %v8058_v29 }
 0x933   : > { %5572 = vmatprep.subr.mxu0 %v9154_v26  ;;  %3159 = vmatpush1.msra.mxu1 %v8065_v25  ;;  %v9232_v25 = vld [vmem:[#allocation53_spill] sm:$0xff] }
 0x934   : > { %3192 = vmatprep.mubr.f32.mxu1 %v9154_v26  ;;  %5573 = vmatpush3.msra.mxu0 %v8210_v14  ;;  %v502_v29 = vadd.f32 %v9232_v25, %v6843_v5 }
 0x935   : > { %5574 = vmatprep.mubr.msk.f32.mxu0 %vm6149_vm1, %v9154_v26  ;;  %3362 = vmatprep.subr.mxu1 %v7780_v37 }
 0x936   : > { %5577 = vmatprep.subr.mxu0 %v9154_v26 }
 0x9d3   : > { %v2960_v8 = vpop.f32.mrf.mxu1  ;;  %v3031_v24 = vpop.f32.mrf.mxu0 }
 0x9d4   : > { %v3035_v18 = vadd.f32 %v2960_v8, %v500_v19  ;;  %v3049_v34 = vadd.f32 %v7591_v32, %v3031_v24  ;;  %v9233_v19 = vld [vmem:[#allocation34_spill] sm:$0xff] }
 0x9d5   : > { %v5541_v0 = vpop.f32.mrf.mxu0  ;;  %v2962_v7 = vpop.f32.mrf.mxu1 }
 0x9d6   : > { %v4825_v39 = vmul.f32 -1.442695, %v3035_v18  ;;  %v3042_v14 = vadd.f32 %v2962_v7, %v502_v29 }
 0x9d8   : > { %5890 = vpow2.f32 %v4825_v39  ;;  %v4826_v43 = vmul.f32 -1.442695, %v3042_v14 }
 0x9da   : > { %5892 = vpow2.f32 %v4826_v43 }
 0x9e5   : > { %v5891_v23 = vpop.eup %5890 }
 0x9e6   : > { %v3039_v37 = vadd.f32 1.0, %v5891_v23 }
 0x9e7   : > { %v5893_v46 = vpop.eup %5892 }
 0x9e8   : > { %5894 = vrcp.f32 %v3039_v37  ;;  %v3046_v60 = vadd.f32 1.0, %v5893_v46 }
 0x9ea   : > { %5896 = vrcp.f32 %v3046_v60 }
 0x9f5   : > { %v5895_v38 = vpop.eup %5894 }
 0x9f6   : > { %v3050_v59 = vmul.f32 %v5895_v38, %v3049_v34 }
 0x9f7   : > { %v5897_v18 = vpop.eup %5896 }
 0x9f8   : > { %v3051_v8 = vadd.f32 %v3050_v59, %v9233_v19  ;;  %v3053_v25 = vsub.f32 1.0, %v5897_v18  ;;  %v3055_v43 = vmul.f32 %v5897_v18, %v8089_v61  ;;  %v9234_v18 = vld [vmem:[#allocation8_spill] sm:$0xff] }
 0x9fa   : > { %5898 = vtanh.f32 %v3051_v8 }
 0xa07   : > { %v5899_v0 = vpop.eup %5898 }
 0xa08   : > { %v3054_v29 = vmul.f32 %v5899_v0, %v3053_v25  ;;  %v9235_v25 = vld [vmem:[#allocation27_spill] sm:$0xff]  ;;  %v9236_v0 = vld [vmem:[#allocation9_spill] sm:$0xff] }
 0xa0a   : > { %v3056_v14 = vadd.f32 %v3055_v43, %v3054_v29  ;;  %v9237_v29 = vld [vmem:[#allocation11_spill] sm:$0xff]  ;;  %v9238_v43 = vld [vmem:[#allocation26_spill] sm:$0xff] }
 0xa0c   : > { %v8227_v37 = vsel %vm8082_vm2, %v3056_v14, %v7791_v6  ;;  %v9239_v14 = vld [vmem:[#allocation22_spill] sm:$0xff] }
 0xa0d   : > { %v3059_v32 = vcombine.high %v8227_v37, %v8227_v37  ;;  %v3066_v38 = vrot.slane %v8227_v37, %v6873_v15  ;;  %3193 = vmatmul.mubr.f32.vlgmr.msra.gmra.mxu1 %v8227_v37  ;;  %5575 = vmatmul.mubr.f32.vlgmr.msra.gmra.mxu0 %v8227_v37 }
 0xa0e   : > { %3363 = vmatpush1.msra.mxu1 %v7802_v16  ;;  %5578 = vmatpush3.msra.mxu0 %v7808_v49 }
 0xa0f   : > { %v3073_v59 = vrot.slane %v3059_v32, %v6873_v15  ;;  %v3074_v46 = vcombine.high %v3066_v38, %v3066_v38  ;;  %v3082_v23 = vrot.slane %v3066_v38, %v6873_v15  ;;  %4827 = vst.sshfl [vmem:[%s6236_s16 + $0x9] sm:$0x1 pattern:$0x73625140] %v3066_v38  ;;  %3364 = vmatprep.subr.mxu1 %v7817_v28  ;;  %v9240_v32 = vld [vmem:[#allocation24_spill] sm:$0xff]  ;;  %v9241_v38 = vld [vmem:[#allocation29_spill] sm:$0xff] }
 0xa10   : > { %5579 = vmatprep.subr.mxu0 %v9154_v26  ;;  %3365 = vmatpush1.msra.mxu1 %v7824_v13 }
 0xa11   : > { %5580 = vmatpush3.msra.mxu0 %v7830_v22  ;;  %v3075_v61 = vcombine.high %v3073_v59, %v3073_v59  ;;  %v3089_v60 = vrot.slane %v3073_v59, %v6873_v15  ;;  %v3096_v24 = vrot.slane %v3074_v46, %v6873_v15  ;;  %v3104_v39 = vcombine.high %v3082_v23, %v3082_v23  ;;  %v9244_v23 = vld [vmem:[#allocation54_spill] sm:$0xff] }
 0xa12   : > { %4828 = vst.sshfl [vmem:[%s6236_s16 + $0x19] sm:$0x1 pattern:$0x73625140] %v3074_v46  ;;  %3366 = vmatprep.subr.mxu1 %v7840_v62  ;;  %5581 = vmatprep.subr.mxu0 %v9154_v26  ;;  %v9243_v46 = vld [vmem:[#allocation43_spill] sm:$0xff] }
 0xa13   : > { %4829 = vst.sshfl [vmem:[%s6236_s16 + $0x49] sm:$0x1 pattern:$0x73625140] %v3073_v59  ;;  %3367 = vmatpush1.msra.mxu1 %v7847_v33  ;;  %v3103_v7 = vrot.slane %v3075_v61, %v6873_v15  ;;  %v3105_v34 = vcombine.high %v3089_v60, %v3089_v60  ;;  %v3106_v19 = vcombine.high %v3096_v24, %v3096_v24  ;;  %3118 = vst [vmem:[%s6236_s16 + $0x29] sm:$0x1] %v3104_v39 }
 0xa14   : > { %4830 = vst.sshfl [vmem:[%s6236_s16 + $0x59] sm:$0x1 pattern:$0x73625140] %v3075_v61  ;;  %5582 = vmatpush3.msra.mxu0 %v7856_v21  ;;  %3368 = vmatprep.subr.mxu1 %v7862_v17  ;;  %v9242_v59 = vld [vmem:[#allocation10_spill] sm:$0xff]  ;;  %v506_v61 = vadd.f32 %v9244_v23, %v9243_v46 }
 0xa15   : > { %5583 = vmatprep.subr.mxu0 %v9154_v26  ;;  %3369 = vmatpush1.msra.mxu1 %v7869_v27  ;;  %v3107_v8 = vcombine.high %v3103_v7, %v3103_v7  ;;  %3119 = vst [vmem:[%s6236_s16 + $0x39] sm:$0x1] %v3106_v19  ;;  %3122 = vst [vmem:[%s6236_s16 + $0x69] sm:$0x1] %v3105_v34  ;;  %v8322_v23 = vld [vmem:[%s9037_s4] ss:$0 sm:$0xff] }
 0xa16   : > { %5584 = vmatpush3.msra.mxu0 %v7877_v40  ;;  %3370 = vmatprep.subr.mxu1 %v7883_v41 }
 0xa17   : > { %5585 = vmatprep.subr.mxu0 %v9154_v26  ;;  %3371 = vmatpush1.msra.mxu1 %v7890_v42  ;;  %3123 = vst [vmem:[%s6236_s16 + $0x79] sm:$0x1] %v3107_v8  ;;  %v9245_v8 = vld [vmem:[#allocation55_spill] sm:$0xff] }
 0xa18   : > { %5586 = vmatpush3.msra.mxu0 %v7897_v44  ;;  %3372 = vmatprep.subr.mxu1 %v7903_v45 }
 0xa19   : > { %5587 = vmatprep.subr.mxu0 %v9154_v26  ;;  %3373 = vmatpush1.msra.mxu1 %v7910_v47 }
 0xa1a   : > { %5588 = vmatpush3.msra.mxu0 %v7916_v48  ;;  %3374 = vmatprep.subr.mxu1 %v7922_v50 }
 0xa1b   : > { %5589 = vmatprep.subr.mxu0 %v9154_v26  ;;  %3375 = vmatpush1.msra.mxu1 %v7929_v51 }
 0xa1c   : > { %5590 = vmatpush3.msra.mxu0 %v7935_v52  ;;  %3376 = vmatprep.subr.mxu1 %v7941_v53 }
 0xa1d   : > { %5591 = vmatprep.subr.mxu0 %v9154_v26  ;;  %3377 = vmatpush1.msra.mxu1 %v7948_v54 }
 0xa1e   : > { %5592 = vmatpush3.msra.mxu0 %v7954_v55  ;;  %3378 = vmatprep.subr.mxu1 %v7960_v1 }
 0xa1f   : > { %5593 = vmatprep.subr.mxu0 %v9154_v26  ;;  %3379 = vmatpush1.msra.mxu1 %v7967_v56 }
 0xa20   : > { %5594 = vmatpush3.msra.mxu0 %v8146_v31  ;;  %3380 = vmatprep.subr.mxu1 %v7974_v2 }
 0xa21   : > { %5595 = vmatprep.subr.mxu0 %v9154_v26  ;;  %3381 = vmatpush1.msra.mxu1 %v7981_v57 }
 0xa22   : > { %5596 = vmatpush3.msra.mxu0 %v8155_v30  ;;  %3382 = vmatprep.subr.mxu1 %v7988_v63 }
 0xa23   : > { %5597 = vmatprep.subr.mxu0 %v9154_v26  ;;  %3383 = vmatpush1.msra.mxu1 %v7995_v3 }
 0xa24   : > { %5598 = vmatpush3.msra.mxu0 %v8164_v20  ;;  %3384 = vmatprep.subr.mxu1 %v8002_v10 }
 0xa25   : > { %5599 = vmatprep.subr.mxu0 %v9154_v26  ;;  %3385 = vmatpush1.msra.mxu1 %v8009_v58 }
 0xa26   : > { %5600 = vmatpush3.msra.mxu0 %v8173_v12  ;;  %3386 = vmatprep.subr.mxu1 %v8016_v11 }
 0xa27   : > { %5601 = vmatprep.subr.mxu0 %v9154_v26  ;;  %3387 = vmatpush1.msra.mxu1 %v8023_v4 }
 0xa28   : > { %5602 = vmatpush3.msra.mxu0 %v8182_v36  ;;  %3388 = vmatprep.subr.mxu1 %v8030_v9 }
 0xa29   : > { %5603 = vmatprep.subr.mxu0 %v9154_v26  ;;  %3389 = vmatpush1.msra.mxu1 %v9234_v18 }
 0xa2a   : > { %5604 = vmatpush3.msra.mxu0 %v9235_v25  ;;  %3390 = vmatprep.subr.mxu1 %v9236_v0 }
 0xa2b   : > { %5605 = vmatprep.subr.mxu0 %v9154_v26  ;;  %3391 = vmatpush1.msra.mxu1 %v9237_v29 }
 0xa2c   : > { %5606 = vmatpush3.msra.mxu0 %v9238_v43  ;;  %3392 = vmatprep.subr.mxu1 %v9239_v14 }
 0xa2d   : > { %5607 = vmatprep.subr.mxu0 %v9154_v26  ;;  %3393 = vmatpush1.msra.mxu1 %v9240_v32  ;;  %v508_v32 = vadd.f32 %v9245_v8, %v6843_v5 }
 0xa2e   : > { %3426 = vmatprep.mubr.f32.mxu1 %v9154_v26  ;;  %5608 = vmatpush3.msra.mxu0 %v9241_v38 }
 0xa2f   : > { %5609 = vmatprep.mubr.msk.f32.mxu0 %vm6149_vm1, %v9154_v26  ;;  %3596 = vmatprep.subr.mxu1 %v9242_v59 }
 0xa30   : > { %5612 = vmatprep.subr.mxu0 %v9154_v26 }
 0xacd   : > { %v3194_v60 = vpop.f32.mrf.mxu1  ;;  %v3265_v24 = vpop.f32.mrf.mxu0 }
 0xace   : > { %v3269_v39 = vadd.f32 %v3194_v60, %v506_v61  ;;  %v3283_v61 = vadd.f32 %v8322_v23, %v3265_v24 }
 0xacf   : > { %v5576_v7 = vpop.f32.mrf.mxu0  ;;  %v3196_v19 = vpop.f32.mrf.mxu1 }
 0xad0   : > { %v4831_v34 = vmul.f32 -1.442695, %v3269_v39  ;;  %v3276_v38 = vadd.f32 %v3196_v19, %v508_v32  ;;  %v9246_v7 = vld [vmem:[#allocation39_spill] sm:$0xff] }
 0xad2   : > { %5900 = vpow2.f32 %v4831_v34  ;;  %v4832_v14 = vmul.f32 -1.442695, %v3276_v38 }
 0xad4   : > { %5902 = vpow2.f32 %v4832_v14 }
 0xadf   : > { %v5901_v43 = vpop.eup %5900 }
 0xae0   : > { %v3273_v59 = vadd.f32 1.0, %v5901_v43 }
 0xae1   : > { %v5903_v29 = vpop.eup %5902 }
 0xae2   : > { %5904 = vrcp.f32 %v3273_v59  ;;  %v3280_v0 = vadd.f32 1.0, %v5903_v29 }
 0xae4   : > { %5906 = vrcp.f32 %v3280_v0 }
 0xaef   : > { %v5905_v60 = vpop.eup %5904 }
 0xaf0   : > { %v3284_v39 = vmul.f32 %v5905_v60, %v3283_v61 }
 0xaf1   : > { %v5907_v32 = vpop.eup %5906 }
 0xaf2   : > { %v3285_v34 = vadd.f32 %v3284_v39, %v9246_v7  ;;  %v3287_v14 = vsub.f32 1.0, %v5907_v32  ;;  %v3289_v29 = vmul.f32 %v5907_v32, %v8227_v37 }
 0xaf4   : > { %5908 = vtanh.f32 %v3285_v34 }
 0xb01   : > { %v5909_v43 = vpop.eup %5908 }
 0xb02   : > { %v3288_v38 = vmul.f32 %v5909_v43, %v3287_v14 }
 0xb04   : > { %v3290_v59 = vadd.f32 %v3289_v29, %v3288_v38  ;;  %v9247_v29 = vld [vmem:[#allocation9_spill] sm:$0xff] }
 0xb06   : > { %v8330_v19 = vsel %vm8082_vm2, %v3290_v59, %v7791_v6  ;;  %v9248_v59 = vld [vmem:[#allocation11_spill] sm:$0xff] }
 0xb07   : > { %v3293_v24 = vcombine.high %v8330_v19, %v8330_v19  ;;  %v3300_v0 = vrot.slane %v8330_v19, %v6873_v15  ;;  %3427 = vmatmul.mubr.f32.vlgmr.msra.gmra.mxu1 %v8330_v19  ;;  %5610 = vmatmul.mubr.f32.vlgmr.msra.gmra.mxu0 %v8330_v19 }
 0xb08   : > { %3597 = vmatpush1.msra.mxu1 %v7802_v16  ;;  %5613 = vmatpush3.msra.mxu0 %v7808_v49 }
 0xb09   : > { %v3307_v37 = vrot.slane %v3293_v24, %v6873_v15  ;;  %v3308_v8 = vcombine.high %v3300_v0, %v3300_v0  ;;  %v3316_v61 = vrot.slane %v3300_v0, %v6873_v15  ;;  %4833 = vst.sshfl [vmem:[%s6236_s16 + $0xa] sm:$0x1 pattern:$0x73625140] %v3300_v0  ;;  %3598 = vmatprep.subr.mxu1 %v7817_v28  ;;  %v9249_v24 = vld [vmem:[#allocation26_spill] sm:$0xff] }
 0xb0a   : > { %5614 = vmatprep.subr.mxu0 %v9154_v26  ;;  %3599 = vmatpush1.msra.mxu1 %v7824_v13  ;;  %v9250_v0 = vld [vmem:[#allocation22_spill] sm:$0xff] }
 0xb0b   : > { %5615 = vmatpush3.msra.mxu0 %v7830_v22  ;;  %v3309_v60 = vcombine.high %v3307_v37, %v3307_v37  ;;  %v3323_v39 = vrot.slane %v3307_v37, %v6873_v15  ;;  %v3330_v7 = vrot.slane %v3308_v8, %v6873_v15  ;;  %v3338_v34 = vcombine.high %v3316_v61, %v3316_v61  ;;  %v9253_v61 = vld [vmem:[#allocation10_spill] sm:$0xff] }
 0xb0c   : > { %4834 = vst.sshfl [vmem:[%s6236_s16 + $0x1a] sm:$0x1 pattern:$0x73625140] %v3308_v8  ;;  %3600 = vmatprep.subr.mxu1 %v7840_v62  ;;  %5616 = vmatprep.subr.mxu0 %v9154_v26  ;;  %v9252_v8 = vld [vmem:[#allocation29_spill] sm:$0xff] }
 0xb0d   : > { %4835 = vst.sshfl [vmem:[%s6236_s16 + $0x4a] sm:$0x1 pattern:$0x73625140] %v3307_v37  ;;  %3601 = vmatpush1.msra.mxu1 %v7847_v33  ;;  %v3337_v32 = vrot.slane %v3309_v60, %v6873_v15  ;;  %v3339_v14 = vcombine.high %v3323_v39, %v3323_v39  ;;  %v3340_v43 = vcombine.high %v3330_v7, %v3330_v7  ;;  %3352 = vst [vmem:[%s6236_s16 + $0x2a] sm:$0x1] %v3338_v34 }
 0xb0e   : > { %4836 = vst.sshfl [vmem:[%s6236_s16 + $0x5a] sm:$0x1 pattern:$0x73625140] %v3309_v60  ;;  %5617 = vmatpush3.msra.mxu0 %v7856_v21  ;;  %3602 = vmatprep.subr.mxu1 %v7862_v17  ;;  %v9251_v37 = vld [vmem:[#allocation24_spill] sm:$0xff] }
 0xb0f   : > { %5618 = vmatprep.subr.mxu0 %v9154_v26  ;;  %3603 = vmatpush1.msra.mxu1 %v7869_v27  ;;  %v3341_v38 = vcombine.high %v3337_v32, %v3337_v32  ;;  %3353 = vst [vmem:[%s6236_s16 + $0x3a] sm:$0x1] %v3340_v43  ;;  %3356 = vst [vmem:[%s6236_s16 + $0x6a] sm:$0x1] %v3339_v14  ;;  %v9254_v60 = vld [vmem:[#allocation56_spill] sm:$0xff] }
 0xb10   : > { %5619 = vmatpush3.msra.mxu0 %v7877_v40  ;;  %3604 = vmatprep.subr.mxu1 %v7883_v41  ;;  %v512_v39 = vadd.f32 %v9254_v60, %v9243_v46 }
 0xb11   : > { %5620 = vmatprep.subr.mxu0 %v9154_v26  ;;  %3605 = vmatpush1.msra.mxu1 %v7890_v42  ;;  %3357 = vst [vmem:[%s6236_s16 + $0x7a] sm:$0x1] %v3341_v38 }
 0xb12   : > { %5621 = vmatpush3.msra.mxu0 %v7897_v44  ;;  %3606 = vmatprep.subr.mxu1 %v7903_v45 }
 0xb13   : > { %5622 = vmatprep.subr.mxu0 %v9154_v26  ;;  %3607 = vmatpush1.msra.mxu1 %v7910_v47 }
 0xb14   : > { %5623 = vmatpush3.msra.mxu0 %v7916_v48  ;;  %3608 = vmatprep.subr.mxu1 %v7922_v50 }
 0xb15   : > { %5624 = vmatprep.subr.mxu0 %v9154_v26  ;;  %3609 = vmatpush1.msra.mxu1 %v7929_v51 }
 0xb16   : > { %5625 = vmatpush3.msra.mxu0 %v7935_v52  ;;  %3610 = vmatprep.subr.mxu1 %v7941_v53 }
 0xb17   : > { %5626 = vmatprep.subr.mxu0 %v9154_v26  ;;  %3611 = vmatpush1.msra.mxu1 %v7948_v54 }
 0xb18   : > { %5627 = vmatpush3.msra.mxu0 %v7954_v55  ;;  %3612 = vmatprep.subr.mxu1 %v7960_v1 }
 0xb19   : > { %5628 = vmatprep.subr.mxu0 %v9154_v26  ;;  %3613 = vmatpush1.msra.mxu1 %v7967_v56 }
 0xb1a   : > { %5629 = vmatpush3.msra.mxu0 %v8146_v31  ;;  %3614 = vmatprep.subr.mxu1 %v7974_v2 }
 0xb1b   : > { %5630 = vmatprep.subr.mxu0 %v9154_v26  ;;  %3615 = vmatpush1.msra.mxu1 %v7981_v57 }
 0xb1c   : > { %5631 = vmatpush3.msra.mxu0 %v8155_v30  ;;  %3616 = vmatprep.subr.mxu1 %v7988_v63 }
 0xb1d   : > { %5632 = vmatprep.subr.mxu0 %v9154_v26  ;;  %3617 = vmatpush1.msra.mxu1 %v7995_v3 }
 0xb1e   : > { %5633 = vmatpush3.msra.mxu0 %v8164_v20  ;;  %3618 = vmatprep.subr.mxu1 %v8002_v10 }
 0xb1f   : > { %5634 = vmatprep.subr.mxu0 %v9154_v26  ;;  %3619 = vmatpush1.msra.mxu1 %v8009_v58 }
 0xb20   : > { %5635 = vmatpush3.msra.mxu0 %v8173_v12  ;;  %3620 = vmatprep.subr.mxu1 %v8016_v11 }
 0xb21   : > { %5636 = vmatprep.subr.mxu0 %v9154_v26  ;;  %3621 = vmatpush1.msra.mxu1 %v8023_v4 }
 0xb22   : > { %5637 = vmatpush3.msra.mxu0 %v8182_v36  ;;  %3622 = vmatprep.subr.mxu1 %v8030_v9 }
 0xb23   : > { %5638 = vmatprep.subr.mxu0 %v9154_v26  ;;  %3623 = vmatpush1.msra.mxu1 %v9234_v18 }
 0xb24   : > { %5639 = vmatpush3.msra.mxu0 %v9235_v25  ;;  %3624 = vmatprep.subr.mxu1 %v9247_v29 }
 0xb25   : > { %5640 = vmatprep.subr.mxu0 %v9154_v26  ;;  %3625 = vmatpush1.msra.mxu1 %v9248_v59 }
 0xb26   : > { %5641 = vmatpush3.msra.mxu0 %v9249_v24  ;;  %3626 = vmatprep.subr.mxu1 %v9250_v0 }
 0xb27   : > { %5642 = vmatprep.subr.mxu0 %v9154_v26  ;;  %3627 = vmatpush1.msra.mxu1 %v9251_v37  ;;  %v9255_v37 = vld [vmem:[#allocation57_spill] sm:$0xff] }
 0xb28   : > { %3660 = vmatprep.mubr.f32.mxu1 %v9154_v26  ;;  %5643 = vmatpush3.msra.mxu0 %v9252_v8  ;;  %v514_v0 = vadd.f32 %v9255_v37, %v6843_v5 }
 0xb29   : > { %5644 = vmatprep.mubr.msk.f32.mxu0 %vm6149_vm1, %v9154_v26  ;;  %3830 = vmatprep.subr.mxu1 %v9253_v61 }
 0xb2a   : > { %5647 = vmatprep.subr.mxu0 %v9154_v26 }
 0xbc7   : > { %v3428_v7 = vpop.f32.mrf.mxu1  ;;  %v3499_v34 = vpop.f32.mrf.mxu0 }
 0xbc8   : > { %v3503_v32 = vadd.f32 %v3428_v7, %v512_v39  ;;  %v3517_v60 = vadd.f32 %v8322_v23, %v3499_v34  ;;  %v9256_v39 = vld [vmem:[#allocation37_spill] sm:$0xff] }
 0xbc9   : > { %v5611_v14 = vpop.f32.mrf.mxu0  ;;  %v3430_v38 = vpop.f32.mrf.mxu1 }
 0xbca   : > { %v4837_v43 = vmul.f32 -1.442695, %v3503_v32  ;;  %v3510_v8 = vadd.f32 %v3430_v38, %v514_v0 }
 0xbcc   : > { %5910 = vpow2.f32 %v4837_v43  ;;  %v4838_v24 = vmul.f32 -1.442695, %v3510_v8 }
 0xbce   : > { %5912 = vpow2.f32 %v4838_v24 }
 0xbd9   : > { %v5911_v59 = vpop.eup %5910 }
 0xbda   : > { %v3507_v61 = vadd.f32 1.0, %v5911_v59 }
 0xbdb   : > { %v5913_v29 = vpop.eup %5912 }
 0xbdc   : > { %5914 = vrcp.f32 %v3507_v61  ;;  %v3514_v25 = vadd.f32 1.0, %v5913_v29  ;;  %v9268_v61 = vld [vmem:[#allocation42_spill] sm:$0xff] }
 0xbde   : > { %5916 = vrcp.f32 %v3514_v25 }
 0xbe9   : > { %v5915_v46 = vpop.eup %5914 }
 0xbea   : > { %v3518_v18 = vmul.f32 %v5915_v46, %v3517_v60 }
 0xbeb   : > { %v5917_v32 = vpop.eup %5916 }
 0xbec   : > { %v3519_v7 = vadd.f32 %v3518_v18, %v9256_v39  ;;  %v3521_v37 = vsub.f32 1.0, %v5917_v32  ;;  %v3523_v24 = vmul.f32 %v5917_v32, %v8330_v19 }
 0xbee   : > { %5918 = vtanh.f32 %v3519_v7 }
 0xbfb   : > { %v5919_v14 = vpop.eup %5918 }
 0xbfc   : > { %v3522_v0 = vmul.f32 %v5919_v14, %v3521_v37 }
 0xbfe   : > { %v3524_v8 = vadd.f32 %v3523_v24, %v3522_v0 }
 0xc00   : > { %v8428_v29 = vsel %vm8082_vm2, %v3524_v8, %v7791_v6 }
 0xc01   : > { %v3527_v46 = vcombine.high %v8428_v29, %v8428_v29  ;;  %v3534_v18 = vrot.slane %v8428_v29, %v6873_v15  ;;  %3661 = vmatmul.mubr.f32.vlgmr.msra.gmra.mxu1 %v8428_v29  ;;  %5645 = vmatmul.mubr.f32.vlgmr.msra.gmra.mxu0 %v8428_v29 }
 0xc02   : > { %3831 = vmatpush1.msra.mxu1 %v7802_v16  ;;  %5648 = vmatpush3.msra.mxu0 %v7808_v49 }
 0xc03   : > { %v3541_v25 = vrot.slane %v3527_v46, %v6873_v15  ;;  %v3542_v19 = vcombine.high %v3534_v18, %v3534_v18  ;;  %v3550_v59 = vrot.slane %v3534_v18, %v6873_v15  ;;  %4839 = vst.sshfl [vmem:[%s6236_s16 + $0xb] sm:$0x1 pattern:$0x73625140] %v3534_v18  ;;  %3832 = vmatprep.subr.mxu1 %v7817_v28  ;;  %v8548_v18 = vld [vmem:[%s9035_s2 + $0x178] sm:$0xff] }
 0xc04   : > { %5649 = vmatprep.subr.mxu0 %v9154_v26  ;;  %3833 = vmatpush1.msra.mxu1 %v7824_v13 }
 0xc05   : > { %5650 = vmatpush3.msra.mxu0 %v7830_v22  ;;  %v3543_v34 = vcombine.high %v3541_v25, %v3541_v25  ;;  %v3557_v16 = vrot.slane %v3541_v25, %v6873_v15  ;;  %v3564_v49 = vrot.slane %v3542_v19, %v6873_v15  ;;  %v3572_v43 = vcombine.high %v3550_v59, %v3550_v59 }
 0xc06   : > { %4840 = vst.sshfl [vmem:[%s6236_s16 + $0x1b] sm:$0x1 pattern:$0x73625140] %v3542_v19  ;;  %3834 = vmatprep.subr.mxu1 %v7840_v62  ;;  %5651 = vmatprep.subr.mxu0 %v9154_v26 }
 0xc07   : > { %4841 = vst.sshfl [vmem:[%s6236_s16 + $0x4b] sm:$0x1 pattern:$0x73625140] %v3541_v25  ;;  %3835 = vmatpush1.msra.mxu1 %v7847_v33  ;;  %v3571_v28 = vrot.slane %v3543_v34, %v6873_v15  ;;  %v3573_v13 = vcombine.high %v3557_v16, %v3557_v16  ;;  %v3574_v22 = vcombine.high %v3564_v49, %v3564_v49  ;;  %3586 = vst [vmem:[%s6236_s16 + $0x2b] sm:$0x1] %v3572_v43 }
 0xc08   : > { %4842 = vst.sshfl [vmem:[%s6236_s16 + $0x5b] sm:$0x1 pattern:$0x73625140] %v3543_v34  ;;  %5652 = vmatpush3.msra.mxu0 %v7856_v21  ;;  %3836 = vmatprep.subr.mxu1 %v7862_v17  ;;  %v9257_v33 = vld [vmem:[#allocation8_spill] sm:$0xff]  ;;  %v9258_v21 = vld [vmem:[#allocation27_spill] sm:$0xff] }
 0xc09   : > { %5653 = vmatprep.subr.mxu0 %v9154_v26  ;;  %3837 = vmatpush1.msra.mxu1 %v7869_v27  ;;  %v3575_v62 = vcombine.high %v3571_v28, %v3571_v28  ;;  %3587 = vst [vmem:[%s6236_s16 + $0x3b] sm:$0x1] %v3574_v22  ;;  %3590 = vst [vmem:[%s6236_s16 + $0x6b] sm:$0x1] %v3573_v13  ;;  %v9259_v17 = vld [vmem:[#allocation9_spill] sm:$0xff]  ;;  %v9260_v27 = vld [vmem:[#allocation11_spill] sm:$0xff] }
 0xc0a   : > { %5654 = vmatpush3.msra.mxu0 %v7877_v40  ;;  %3838 = vmatprep.subr.mxu1 %v7883_v41  ;;  %v9261_v40 = vld [vmem:[#allocation26_spill] sm:$0xff]  ;;  %v8557_v34 = vld [vmem:[%s9035_s2 + $0x158] sm:$0xff]  ;;  %v8570_v49 = vld [vmem:[%s9035_s2 + $0x160] sm:$0xff] }
 0xc0b   : > { %5655 = vmatprep.subr.mxu0 %v9154_v26  ;;  %3839 = vmatpush1.msra.mxu1 %v7890_v42  ;;  %3591 = vst [vmem:[%s6236_s16 + $0x7b] sm:$0x1] %v3575_v62  ;;  %v9262_v41 = vld [vmem:[#allocation22_spill] sm:$0xff]  ;;  %v9263_v42 = vld [vmem:[#allocation24_spill] sm:$0xff] }
 0xc0c   : > { %5656 = vmatpush3.msra.mxu0 %v7897_v44  ;;  %3840 = vmatprep.subr.mxu1 %v7903_v45  ;;  %v9264_v44 = vld [vmem:[#allocation29_spill] sm:$0xff]  ;;  %v8517_v45 = vld [vmem:[%s9035_s2 + $0x170] sm:$0xff]  ;;  %v8580_v62 = vld [vmem:[%s9035_s2 + $0x140] sm:$0xff] }
 0xc0d   : > { %5657 = vmatprep.subr.mxu0 %v9154_v26  ;;  %3841 = vmatpush1.msra.mxu1 %v7910_v47  ;;  %v9265_v47 = vld [vmem:[#allocation43_spill] sm:$0xff]  ;;  %v8564_v16 = vld [vmem:[%s9035_s2 + $0x150] sm:$0xff] }
 0xc0e   : > { %5658 = vmatpush3.msra.mxu0 %v7916_v48  ;;  %3842 = vmatprep.subr.mxu1 %v7922_v50  ;;  %v9266_v48 = vld [vmem:[#allocation12_spill] sm:$0xff] }
 0xc0f   : > { %5659 = vmatprep.subr.mxu0 %v9154_v26  ;;  %3843 = vmatpush1.msra.mxu1 %v7929_v51  ;;  %v518_v50 = vadd.f32 %v9266_v48, %v9265_v47  ;;  %v8602_v48 = vld [vmem:[%s9035_s2 + $0x128] sm:$0xff] }
 0xc10   : > { %5660 = vmatpush3.msra.mxu0 %v7935_v52  ;;  %3844 = vmatprep.subr.mxu1 %v7941_v53 }
 0xc11   : > { %5661 = vmatprep.subr.mxu0 %v9154_v26  ;;  %3845 = vmatpush1.msra.mxu1 %v7948_v54 }
 0xc12   : > { %5662 = vmatpush3.msra.mxu0 %v7954_v55  ;;  %3846 = vmatprep.subr.mxu1 %v7960_v1 }
 0xc13   : > { %5663 = vmatprep.subr.mxu0 %v9154_v26  ;;  %3847 = vmatpush1.msra.mxu1 %v7967_v56  ;;  %v9267_v56 = vld [vmem:[#allocation13_spill] sm:$0xff] }
 0xc14   : > { %5664 = vmatpush3.msra.mxu0 %v8146_v31  ;;  %3848 = vmatprep.subr.mxu1 %v7974_v2  ;;  %v520_v2 = vadd.f32 %v9267_v56, %v6843_v5  ;;  %v8650_v56 = vld [vmem:[%s9035_s2 + $0xf0] sm:$0xff] }
 0xc15   : > { %5665 = vmatprep.subr.mxu0 %v9154_v26  ;;  %3849 = vmatpush1.msra.mxu1 %v7981_v57 }
 0xc16   : > { %5666 = vmatpush3.msra.mxu0 %v8155_v30  ;;  %3850 = vmatprep.subr.mxu1 %v7988_v63 }
 0xc17   : > { %5667 = vmatprep.subr.mxu0 %v9154_v26  ;;  %3851 = vmatpush1.msra.mxu1 %v7995_v3 }
 0xc18   : > { %5668 = vmatpush3.msra.mxu0 %v8164_v20  ;;  %3852 = vmatprep.subr.mxu1 %v8002_v10 }
 0xc19   : > { %5669 = vmatprep.subr.mxu0 %v9154_v26  ;;  %3853 = vmatpush1.msra.mxu1 %v8009_v58 }
 0xc1a   : > { %5670 = vmatpush3.msra.mxu0 %v8173_v12  ;;  %3854 = vmatprep.subr.mxu1 %v8016_v11 }
 0xc1b   : > { %5671 = vmatprep.subr.mxu0 %v9154_v26  ;;  %3855 = vmatpush1.msra.mxu1 %v8023_v4 }
 0xc1c   : > { %5672 = vmatpush3.msra.mxu0 %v8182_v36  ;;  %3856 = vmatprep.subr.mxu1 %v8030_v9 }
 0xc1d   : > { %5673 = vmatprep.subr.mxu0 %v9154_v26  ;;  %3857 = vmatpush1.msra.mxu1 %v9257_v33  ;;  %v8587_v33 = vld [vmem:[%s9035_s2 + $0x138] sm:$0xff] }
 0xc1e   : > { %5674 = vmatpush3.msra.mxu0 %v9258_v21  ;;  %3858 = vmatprep.subr.mxu1 %v9259_v17 }
 0xc1f   : > { %5675 = vmatprep.subr.mxu0 %v9154_v26  ;;  %3859 = vmatpush1.msra.mxu1 %v9260_v27 }
 0xc20   : > { %5676 = vmatpush3.msra.mxu0 %v9261_v40  ;;  %3860 = vmatprep.subr.mxu1 %v9262_v41 }
 0xc21   : > { %5677 = vmatprep.subr.mxu0 %v9154_v26  ;;  %3861 = vmatpush1.msra.mxu1 %v9263_v42  ;;  %v8596_v42 = vld [vmem:[%s9035_s2 + $0x148] sm:$0xff] }
 0xc22   : > { %3894 = vmatprep.mubr.f32.mxu1 %v9154_v26  ;;  %5678 = vmatpush3.msra.mxu0 %v9264_v44 }
 0xc23   : > { %5679 = vmatprep.mubr.msk.f32.mxu0 %vm6149_vm1, %v9154_v26  ;;  %4064 = vmatprep.subr.mxu1 %v8517_v45 }
 0xc24   : > { %5682 = vmatprep.subr.mxu0 %v9154_v26 }
 0xcc1   : > { %v3662_v51 = vpop.f32.mrf.mxu1  ;;  %v3733_v52 = vpop.f32.mrf.mxu0 }
 0xcc2   : > { %v3737_v53 = vadd.f32 %v3662_v51, %v518_v50  ;;  %v3751_v4 = vadd.f32 %v8322_v23, %v3733_v52  ;;  %v8609_v50 = vld [vmem:[%s9035_s2 + $0x120] sm:$0xff]  ;;  %v8617_v52 = vld [vmem:[%s9035_s2 + $0x130] sm:$0xff] }
 0xcc3   : > { %v5646_v54 = vpop.f32.mrf.mxu0  ;;  %v3664_v1 = vpop.f32.mrf.mxu1 }
 0xcc4   : > { %v4843_v55 = vmul.f32 -1.442695, %v3737_v53  ;;  %v3744_v57 = vadd.f32 %v3664_v1, %v520_v2  ;;  %v8623_v53 = vld [vmem:[%s9035_s2 + $0x110] sm:$0xff]  ;;  %v8630_v54 = vld [vmem:[%s9035_s2 + $0x108] sm:$0xff]  ;;  %v8643_v1 = vld [vmem:[%s9035_s2 + $0xf8] sm:$0xff] }
 0xcc5   : > { %v8656_v2 = vld [vmem:[%s9035_s2 + $0x100] sm:$0xff] }
 0xcc6   : > { %5920 = vpow2.f32 %v4843_v55  ;;  %v4844_v63 = vmul.f32 -1.442695, %v3744_v57  ;;  %v8637_v55 = vld [vmem:[%s9035_s2 + $0x118] sm:$0xff]  ;;  %v8662_v57 = vld [vmem:[%s9035_s2 + $0xe0] sm:$0xff] }
 0xcc8   : > { %5922 = vpow2.f32 %v4844_v63  ;;  %v8669_v63 = vld [vmem:[%s9035_s2 + $0xd8] sm:$0xff] }
 0xcd3   : > { %v5921_v3 = vpop.eup %5920 }
 0xcd4   : > { %v3741_v10 = vadd.f32 1.0, %v5921_v3  ;;  %v8675_v3 = vld [vmem:[%s9035_s2 + $0xe8] sm:$0xff] }
 0xcd5   : > { %v5923_v58 = vpop.eup %5922 }
 0xcd6   : > { %5924 = vrcp.f32 %v3741_v10  ;;  %v3748_v11 = vadd.f32 1.0, %v5923_v58  ;;  %v8681_v10 = vld [vmem:[%s9035_s2 + $0xc8] sm:$0xff]  ;;  %v8688_v58 = vld [vmem:[%s9035_s2 + $0xc0] sm:$0xff] }
 0xcd8   : > { %5926 = vrcp.f32 %v3748_v11  ;;  %v8694_v11 = vld [vmem:[%s9035_s2 + $0xd0] sm:$0xff] }
 0xce3   : > { %v5925_v9 = vpop.eup %5924 }
 0xce4   : > { %v3752_v38 = vmul.f32 %v5925_v9, %v3751_v4  ;;  %v8700_v4 = vld [vmem:[%s9035_s2 + $0xb0] sm:$0xff]  ;;  %v8707_v9 = vld [vmem:[%s9035_s2 + $0xa8] sm:$0xff] }
 0xce5   : > { %v5927_v39 = vpop.eup %5926 }
 0xce6   : > { %v3753_v60 = vadd.f32 %v3752_v38, %v9268_v61  ;;  %v3755_v7 = vsub.f32 1.0, %v5927_v39  ;;  %v3757_v14 = vmul.f32 %v5927_v39, %v8428_v29  ;;  %v8542_v29 = vld [vmem:[%s9035_s2 + $0x168] sm:$0xff]  ;;  %v8714_v38 = vld [vmem:[%s9035_s2 + $0x98] sm:$0xff]  ;;  %v8721_v61 = vld [vmem:[%s9035_s2 + $0x90] sm:$0xff] }
 0xce7   : > { %v8749_v39 = vld [vmem:[%s9035_s2 + $0x60] sm:$0xff] }
 0xce8   : > { %5928 = vtanh.f32 %v3753_v60  ;;  %v8735_v60 = vld [vmem:[%s9035_s2 + $0x78] sm:$0xff] }
 0xcf5   : > { %v5929_v32 = vpop.eup %5928 }
 0xcf6   : > { %v3756_v37 = vmul.f32 %v5929_v32, %v3755_v7  ;;  %v8763_v7 = vld [vmem:[%s9035_s2 + $0x48] sm:$0xff]  ;;  %v8777_v32 = vld [vmem:[%s9035_s2 + $0x30] sm:$0xff] }
 0xcf8   : > { %v3758_v0 = vadd.f32 %v3757_v14, %v3756_v37  ;;  %v8791_v37 = vld [vmem:[%s9035_s2 + $0x18] sm:$0xff]  ;;  %v8805_v14 = vld [vmem:[%s9035_s2] sm:$0xff] }
 0xcfa   : > { %v8531_v24 = vsel %vm8082_vm2, %v3758_v0, %v7791_v6 }
 0xcfb   : > { %v3761_v8 = vcombine.high %v8531_v24, %v8531_v24  ;;  %v3768_v46 = vrot.slane %v8531_v24, %v6873_v15  ;;  %3895 = vmatmul.mubr.f32.vlgmr.msra.gmra.mxu1 %v8531_v24  ;;  %5680 = vmatmul.mubr.f32.vlgmr.msra.gmra.mxu0 %v8531_v24 }
 0xcfc   : > { %4065 = vmatpush1.msra.mxu1 %v8542_v29  ;;  %5683 = vmatpush3.msra.mxu0 %v8548_v18 }
 0xcfd   : > { %v3775_v25 = vrot.slane %v3761_v8, %v6873_v15  ;;  %v3776_v19 = vcombine.high %v3768_v46, %v3768_v46  ;;  %v3784_v59 = vrot.slane %v3768_v46, %v6873_v15  ;;  %4845 = vst.sshfl [vmem:[%s6236_s16 + $0xc] sm:$0x1 pattern:$0x73625140] %v3768_v46  ;;  %4066 = vmatprep.subr.mxu1 %v8557_v34 }
 0xcfe   : > { %5684 = vmatprep.subr.mxu0 %v9154_v26  ;;  %4067 = vmatpush1.msra.mxu1 %v8564_v16 }
 0xcff   : > { %5685 = vmatpush3.msra.mxu0 %v8570_v49  ;;  %v3777_v43 = vcombine.high %v3775_v25, %v3775_v25  ;;  %v3791_v28 = vrot.slane %v3775_v25, %v6873_v15  ;;  %v3798_v13 = vrot.slane %v3776_v19, %v6873_v15  ;;  %v3806_v22 = vcombine.high %v3784_v59, %v3784_v59 }
 0xd00   : > { %4846 = vst.sshfl [vmem:[%s6236_s16 + $0x1c] sm:$0x1 pattern:$0x73625140] %v3776_v19  ;;  %4068 = vmatprep.subr.mxu1 %v8580_v62  ;;  %5686 = vmatprep.subr.mxu0 %v9154_v26 }
 0xd01   : > { %4847 = vst.sshfl [vmem:[%s6236_s16 + $0x4c] sm:$0x1 pattern:$0x73625140] %v3775_v25  ;;  %4069 = vmatpush1.msra.mxu1 %v8587_v33  ;;  %v3805_v17 = vrot.slane %v3777_v43, %v6873_v15  ;;  %v3807_v27 = vcombine.high %v3791_v28, %v3791_v28  ;;  %v3808_v41 = vcombine.high %v3798_v13, %v3798_v13  ;;  %3820 = vst [vmem:[%s6236_s16 + $0x2c] sm:$0x1] %v3806_v22 }
 0xd02   : > { %4848 = vst.sshfl [vmem:[%s6236_s16 + $0x5c] sm:$0x1 pattern:$0x73625140] %v3777_v43  ;;  %5687 = vmatpush3.msra.mxu0 %v8596_v42  ;;  %4070 = vmatprep.subr.mxu1 %v8602_v48  ;;  %v9270_v28 = vld [vmem:[#allocation15_spill] sm:$0xff] }
 0xd03   : > { %5688 = vmatprep.subr.mxu0 %v9154_v26  ;;  %4071 = vmatpush1.msra.mxu1 %v8609_v50  ;;  %v3809_v51 = vcombine.high %v3805_v17, %v3805_v17  ;;  %3821 = vst [vmem:[%s6236_s16 + $0x3c] sm:$0x1] %v3808_v41  ;;  %3824 = vst [vmem:[%s6236_s16 + $0x6c] sm:$0x1] %v3807_v27  ;;  %v526_v13 = vadd.f32 %v9270_v28, %v6843_v5 }
 0xd04   : > { %5689 = vmatpush3.msra.mxu0 %v8617_v52  ;;  %4072 = vmatprep.subr.mxu1 %v8623_v53 }
 0xd05   : > { %5690 = vmatprep.subr.mxu0 %v9154_v26  ;;  %4073 = vmatpush1.msra.mxu1 %v8630_v54  ;;  %3825 = vst [vmem:[%s6236_s16 + $0x7c] sm:$0x1] %v3809_v51 }
 0xd06   : > { %5691 = vmatpush3.msra.mxu0 %v8637_v55  ;;  %4074 = vmatprep.subr.mxu1 %v8643_v1 }
 0xd07   : > { %5692 = vmatprep.subr.mxu0 %v9154_v26  ;;  %4075 = vmatpush1.msra.mxu1 %v8650_v56 }
 0xd08   : > { %5693 = vmatpush3.msra.mxu0 %v8656_v2  ;;  %4076 = vmatprep.subr.mxu1 %v8662_v57 }
 0xd09   : > { %5694 = vmatprep.subr.mxu0 %v9154_v26  ;;  %4077 = vmatpush1.msra.mxu1 %v8669_v63 }
 0xd0a   : > { %5695 = vmatpush3.msra.mxu0 %v8675_v3  ;;  %4078 = vmatprep.subr.mxu1 %v8681_v10 }
 0xd0b   : > { %5696 = vmatprep.subr.mxu0 %v9154_v26  ;;  %4079 = vmatpush1.msra.mxu1 %v8688_v58 }
 0xd0c   : > { %5697 = vmatpush3.msra.mxu0 %v8694_v11  ;;  %4080 = vmatprep.subr.mxu1 %v8700_v4 }
 0xd0d   : > { %5698 = vmatprep.subr.mxu0 %v9154_v26  ;;  %4081 = vmatpush1.msra.mxu1 %v8707_v9 }
 0xd0e   : > { %5699 = vmatpush3.msra.mxu0 %v8146_v31  ;;  %4082 = vmatprep.subr.mxu1 %v8714_v38  ;;  %v8728_v31 = vld [vmem:[%s9035_s2 + $0x80] sm:$0xff] }
 0xd0f   : > { %5700 = vmatprep.subr.mxu0 %v9154_v26  ;;  %4083 = vmatpush1.msra.mxu1 %v8721_v61 }
 0xd10   : > { %5701 = vmatpush3.msra.mxu0 %v8155_v30  ;;  %4084 = vmatprep.subr.mxu1 %v8728_v31  ;;  %v8742_v30 = vld [vmem:[%s9035_s2 + $0x68] sm:$0xff] }
 0xd11   : > { %5702 = vmatprep.subr.mxu0 %v9154_v26  ;;  %4085 = vmatpush1.msra.mxu1 %v8735_v60 }
 0xd12   : > { %5703 = vmatpush3.msra.mxu0 %v8164_v20  ;;  %4086 = vmatprep.subr.mxu1 %v8742_v30  ;;  %v8756_v20 = vld [vmem:[%s9035_s2 + $0x50] sm:$0xff] }
 0xd13   : > { %5704 = vmatprep.subr.mxu0 %v9154_v26  ;;  %4087 = vmatpush1.msra.mxu1 %v8749_v39 }
 0xd14   : > { %5705 = vmatpush3.msra.mxu0 %v8173_v12  ;;  %4088 = vmatprep.subr.mxu1 %v8756_v20  ;;  %v8770_v12 = vld [vmem:[%s9035_s2 + $0x38] sm:$0xff] }
 0xd15   : > { %5706 = vmatprep.subr.mxu0 %v9154_v26  ;;  %4089 = vmatpush1.msra.mxu1 %v8763_v7 }
 0xd16   : > { %5707 = vmatpush3.msra.mxu0 %v8182_v36  ;;  %4090 = vmatprep.subr.mxu1 %v8770_v12  ;;  %v8784_v36 = vld [vmem:[%s9035_s2 + $0x20] sm:$0xff] }
 0xd17   : > { %5708 = vmatprep.subr.mxu0 %v9154_v26  ;;  %4091 = vmatpush1.msra.mxu1 %v8777_v32 }
 0xd18   : > { %5709 = vmatpush3.msra.mxu0 %v9258_v21  ;;  %4092 = vmatprep.subr.mxu1 %v8784_v36  ;;  %v8798_v21 = vld [vmem:[%s9035_s2 + $0x8] sm:$0xff] }
 0xd19   : > { %5710 = vmatprep.subr.mxu0 %v9154_v26  ;;  %4093 = vmatpush1.msra.mxu1 %v8791_v37 }
 0xd1a   : > { %5711 = vmatpush3.msra.mxu0 %v9261_v40  ;;  %4094 = vmatprep.subr.mxu1 %v8798_v21  ;;  %v9269_v40 = vld [vmem:[#allocation14_spill] sm:$0xff] }
 0xd1b   : > { %5712 = vmatprep.subr.mxu0 %v9154_v26  ;;  %4095 = vmatpush1.msra.mxu1 %v8805_v14  ;;  %v524_v0 = vadd.f32 %v9269_v40, %v9265_v47 }
 0xd1c   : > { %4128 = vmatprep.mubr.f32.mxu1 %v9154_v26  ;;  %5713 = vmatpush3.msra.mxu0 %v9264_v44 }
 0xd1d   : > { %5714 = vmatprep.mubr.msk.f32.mxu0 %vm6149_vm1, %v9154_v26  ;;  %4298 = vmatprep.subr.mxu1 %v8517_v45 }
 0xd1e   : > { %5717 = vmatprep.subr.mxu0 %v9154_v26 }
 0xdbb   : > { %v3896_v8 = vpop.f32.mrf.mxu1  ;;  %v3967_v46 = vpop.f32.mrf.mxu0 }
 0xdbc   : > { %v3971_v25 = vadd.f32 %v3896_v8, %v524_v0  ;;  %v3985_v51 = vadd.f32 %v8322_v23, %v3967_v46  ;;  %v9271_v0 = vld [vmem:[#allocation40_spill] sm:$0xff] }
 0xdbd   : > { %v5681_v19 = vpop.f32.mrf.mxu0  ;;  %v3898_v43 = vpop.f32.mrf.mxu1 }
 0xdbe   : > { %v4849_v59 = vmul.f32 -1.442695, %v3971_v25  ;;  %v3978_v44 = vadd.f32 %v3898_v43, %v526_v13 }
 0xdc0   : > { %5930 = vpow2.f32 %v4849_v59  ;;  %v4850_v22 = vmul.f32 -1.442695, %v3978_v44 }
 0xdc2   : > { %5932 = vpow2.f32 %v4850_v22 }
 0xdcd   : > { %v5931_v17 = vpop.eup %5930 }
 0xdce   : > { %v3975_v45 = vadd.f32 1.0, %v5931_v17 }
 0xdcf   : > { %v5933_v27 = vpop.eup %5932 }
 0xdd0   : > { %5934 = vrcp.f32 %v3975_v45  ;;  %v3982_v41 = vadd.f32 1.0, %v5933_v27 }
 0xdd2   : > { %5936 = vrcp.f32 %v3982_v41 }
 0xddd   : > { %v5935_v40 = vpop.eup %5934 }
 0xdde   : > { %v3986_v47 = vmul.f32 %v5935_v40, %v3985_v51 }
 0xddf   : > { %v5937_v25 = vpop.eup %5936 }
 0xde0   : > { %v3987_v8 = vadd.f32 %v3986_v47, %v9271_v0  ;;  %v3989_v19 = vsub.f32 1.0, %v5937_v25  ;;  %v3991_v28 = vmul.f32 %v5937_v25, %v8531_v24 }
 0xde2   : > { %5938 = vtanh.f32 %v3987_v8 }
 0xdef   : > { %v5939_v59 = vpop.eup %5938 }
 0xdf0   : > { %v3990_v43 = vmul.f32 %v5939_v59, %v3989_v19 }
 0xdf2   : > { %v3992_v13 = vadd.f32 %v3991_v28, %v3990_v43 }
 0xdf4   : > { %v8824_v44 = vsel %vm8082_vm2, %v3992_v13, %v7791_v6 }
 0xdf5   : > { %v3995_v46 = vcombine.high %v8824_v44, %v8824_v44  ;;  %v4002_v47 = vrot.slane %v8824_v44, %v6873_v15  ;;  %4129 = vmatmul.mubr.f32.vlgmr.msra.gmra.mxu1 %v8824_v44  ;;  %5715 = vmatmul.mubr.f32.vlgmr.msra.gmra.mxu0 %v8824_v44 }
 0xdf6   : > { %4299 = vmatpush1.msra.mxu1 %v8542_v29  ;;  %5718 = vmatpush3.msra.mxu0 %v8548_v18 }
 0xdf7   : > { %v4009_v24 = vrot.slane %v3995_v46, %v6873_v15  ;;  %v4010_v22 = vcombine.high %v4002_v47, %v4002_v47  ;;  %v4018_v17 = vrot.slane %v4002_v47, %v6873_v15  ;;  %4851 = vst.sshfl [vmem:[%s6236_s16 + $0xd] sm:$0x1 pattern:$0x73625140] %v4002_v47  ;;  %4300 = vmatprep.subr.mxu1 %v8557_v34 }
 0xdf8   : > { %5719 = vmatprep.subr.mxu0 %v9154_v26  ;;  %4301 = vmatpush1.msra.mxu1 %v8564_v16 }
 0xdf9   : > { %5720 = vmatpush3.msra.mxu0 %v8570_v49  ;;  %v4011_v45 = vcombine.high %v4009_v24, %v4009_v24  ;;  %v4025_v29 = vrot.slane %v4009_v24, %v6873_v15  ;;  %v4032_v18 = vrot.slane %v4010_v22, %v6873_v15  ;;  %v4040_v27 = vcombine.high %v4018_v17, %v4018_v17 }
 0xdfa   : > { %4852 = vst.sshfl [vmem:[%s6236_s16 + $0x1d] sm:$0x1 pattern:$0x73625140] %v4010_v22  ;;  %4302 = vmatprep.subr.mxu1 %v8580_v62  ;;  %5721 = vmatprep.subr.mxu0 %v9154_v26  ;;  %v9276_v22 = vld [vmem:[#allocation20_spill] sm:$0xff] }
 0xdfb   : > { %4853 = vst.sshfl [vmem:[%s6236_s16 + $0x4d] sm:$0x1 pattern:$0x73625140] %v4009_v24  ;;  %4303 = vmatpush1.msra.mxu1 %v8587_v33  ;;  %v4039_v34 = vrot.slane %v4011_v45, %v6873_v15  ;;  %v4041_v16 = vcombine.high %v4025_v29, %v4025_v29  ;;  %v4042_v49 = vcombine.high %v4032_v18, %v4032_v18  ;;  %4054 = vst [vmem:[%s6236_s16 + $0x2d] sm:$0x1] %v4040_v27 }
 0xdfc   : > { %4854 = vst.sshfl [vmem:[%s6236_s16 + $0x5d] sm:$0x1 pattern:$0x73625140] %v4011_v45  ;;  %5722 = vmatpush3.msra.mxu0 %v8596_v42  ;;  %4304 = vmatprep.subr.mxu1 %v8602_v48  ;;  %v6098_v33 = vld [vmem:[%s9035_s2 + $0xb8] sm:$0xff]  ;;  %v6099_v42 = vld [vmem:[%s9035_s2 + $0xa0] sm:$0xff] }
 0xdfd   : > { %5723 = vmatprep.subr.mxu0 %v9154_v26  ;;  %4305 = vmatpush1.msra.mxu1 %v8609_v50  ;;  %v4043_v62 = vcombine.high %v4039_v34, %v4039_v34  ;;  %4055 = vst [vmem:[%s6236_s16 + $0x3d] sm:$0x1] %v4042_v49  ;;  %4058 = vst [vmem:[%s6236_s16 + $0x6d] sm:$0x1] %v4041_v16  ;;  %v6100_v48 = vld [vmem:[%s9035_s2 + $0x88] sm:$0xff]  ;;  %v6101_v50 = vld [vmem:[%s9035_s2 + $0x70] sm:$0xff] }
 0xdfe   : > { %5724 = vmatpush3.msra.mxu0 %v8617_v52  ;;  %4306 = vmatprep.subr.mxu1 %v8623_v53  ;;  %v6102_v52 = vld [vmem:[%s9035_s2 + $0x58] sm:$0xff]  ;;  %v6103_v53 = vld [vmem:[%s9035_s2 + $0x40] sm:$0xff]  ;;  %v9277_v49 = vld [vmem:[#allocation21_spill] sm:$0xff] }
 0xdff   : > { %5725 = vmatprep.subr.mxu0 %v9154_v26  ;;  %4307 = vmatpush1.msra.mxu1 %v8630_v54  ;;  %4059 = vst [vmem:[%s6236_s16 + $0x7d] sm:$0x1] %v4043_v62  ;;  %v6104_v54 = vld [vmem:[%s9035_s2 + $0x28] sm:$0xff]  ;;  %v538_v62 = vadd.f32 %v9277_v49, %v6843_v5 }
 0xe00   : > { %5726 = vmatpush3.msra.mxu0 %v8637_v55  ;;  %4308 = vmatprep.subr.mxu1 %v8643_v1  ;;  %v6105_v55 = vld [vmem:[%s9035_s2 + $0x10] sm:$0xff]  ;;  %v9272_v1 = vld [vmem:[#allocation43_spill] sm:$0xff] }
 0xe01   : > { %5727 = vmatprep.subr.mxu0 %v9154_v26  ;;  %4309 = vmatpush1.msra.mxu1 %v8650_v56  ;;  %v9273_v56 = vld [vmem:[#allocation16_spill] sm:$0xff]  ;;  %v536_v17 = vadd.f32 %v9276_v22, %v9272_v1 }
 0xe02   : > { %5728 = vmatpush3.msra.mxu0 %v8656_v2  ;;  %4310 = vmatprep.subr.mxu1 %v8662_v57  ;;  %v530_v2 = vadd.f32 %v9273_v56, %v9272_v1 }
 0xe03   : > { %5729 = vmatprep.subr.mxu0 %v9154_v26  ;;  %4311 = vmatpush1.msra.mxu1 %v8669_v63 }
 0xe04   : > { %5730 = vmatpush3.msra.mxu0 %v8675_v3  ;;  %4312 = vmatprep.subr.mxu1 %v8681_v10 }
 0xe05   : > { %5731 = vmatprep.subr.mxu0 %v9154_v26  ;;  %4313 = vmatpush1.msra.mxu1 %v8688_v58 }
 0xe06   : > { %5732 = vmatpush3.msra.mxu0 %v8694_v11  ;;  %4314 = vmatprep.subr.mxu1 %v8700_v4  ;;  %v9274_v4 = vld [vmem:[#allocation18_spill] sm:$0xff] }
 0xe07   : > { %5733 = vmatprep.subr.mxu0 %v9154_v26  ;;  %4315 = vmatpush1.msra.mxu1 %v8707_v9  ;;  %v532_v9 = vadd.f32 %v9274_v4, %v6843_v5 }
 0xe08   : > { %5734 = vmatpush3.msra.mxu0 %v6098_v33  ;;  %4316 = vmatprep.subr.mxu1 %v8714_v38 }
 0xe09   : > { %5735 = vmatprep.subr.mxu0 %v9154_v26  ;;  %4317 = vmatpush1.msra.mxu1 %v8721_v61 }
 0xe0a   : > { %5736 = vmatpush3.msra.mxu0 %v6099_v42  ;;  %4318 = vmatprep.subr.mxu1 %v8728_v31 }
 0xe0b   : > { %5737 = vmatprep.subr.mxu0 %v9154_v26  ;;  %4319 = vmatpush1.msra.mxu1 %v8735_v60 }
 0xe0c   : > { %5738 = vmatpush3.msra.mxu0 %v6100_v48  ;;  %4320 = vmatprep.subr.mxu1 %v8742_v30 }
 0xe0d   : > { %5739 = vmatprep.subr.mxu0 %v9154_v26  ;;  %4321 = vmatpush1.msra.mxu1 %v8749_v39 }
 0xe0e   : > { %5740 = vmatpush3.msra.mxu0 %v6101_v50  ;;  %4322 = vmatprep.subr.mxu1 %v8756_v20 }
 0xe0f   : > { %5741 = vmatprep.subr.mxu0 %v9154_v26  ;;  %4323 = vmatpush1.msra.mxu1 %v8763_v7 }
 0xe10   : > { %5742 = vmatpush3.msra.mxu0 %v6102_v52  ;;  %4324 = vmatprep.subr.mxu1 %v8770_v12  ;;  %v9275_v12 = vld [vmem:[#allocation46_spill] sm:$0xff] }
 0xe11   : > { %5743 = vmatprep.subr.mxu0 %v9154_v26  ;;  %4325 = vmatpush1.msra.mxu1 %v8777_v32 }
 0xe12   : > { %5744 = vmatpush3.msra.mxu0 %v6103_v53  ;;  %4326 = vmatprep.subr.mxu1 %v8784_v36 }
 0xe13   : > { %5745 = vmatprep.subr.mxu0 %v9154_v26  ;;  %4327 = vmatpush1.msra.mxu1 %v8791_v37 }
 0xe14   : > { %5746 = vmatpush3.msra.mxu0 %v6104_v54  ;;  %4328 = vmatprep.subr.mxu1 %v8798_v21  ;;  %v6106_v54 = vld [vmem:[%s9037_s4] ss:$0 sm:$0xff] }
 0xe15   : > { %5747 = vmatprep.subr.mxu0 %v9154_v26  ;;  %4329 = vmatpush1.msra.mxu1 %v8805_v14 }
 0xe16   : > { %4362 = vmatprep.mubr.f32.mxu1 %v9154_v26  ;;  %5748 = vmatpush3.msra.mxu0 %v6105_v55 }
 0xe17   : > { %5749 = vmatprep.mubr.msk.f32.mxu0 %vm6149_vm1, %v9154_v26 }
 0xeb5   : > { %v4130_v57 = vpop.f32.mrf.mxu1  ;;  %v4201_v63 = vpop.f32.mrf.mxu0 }
 0xeb6   : > { %v4205_v3 = vadd.f32 %v4130_v57, %v530_v2  ;;  %v4219_v39 = vadd.f32 %v8322_v23, %v4201_v63  ;;  %v9278_v2 = vld [vmem:[#allocation44_spill] sm:$0xff] }
 0xeb7   : > { %v5716_v10 = vpop.f32.mrf.mxu0  ;;  %v4132_v11 = vpop.f32.mrf.mxu1 }
 0xeb8   : > { %v4855_v58 = vmul.f32 -1.442695, %v4205_v3  ;;  %v4212_v38 = vadd.f32 %v4132_v11, %v532_v9 }
 0xeba   : > { %5940 = vpow2.f32 %v4855_v58  ;;  %v4856_v61 = vmul.f32 -1.442695, %v4212_v38 }
 0xebc   : > { %5942 = vpow2.f32 %v4856_v61 }
 0xec7   : > { %v5941_v31 = vpop.eup %5940 }
 0xec8   : > { %v4209_v60 = vadd.f32 1.0, %v5941_v31 }
 0xec9   : > { %v5943_v26 = vpop.eup %5942 }
 0xeca   : > { %5944 = vrcp.f32 %v4209_v60  ;;  %v4216_v30 = vadd.f32 1.0, %v5943_v26 }
 0xecc   : > { %5946 = vrcp.f32 %v4216_v30 }
 0xed7   : > { %v5945_v20 = vpop.eup %5944 }
 0xed8   : > { %v4220_v7 = vmul.f32 %v5945_v20, %v4219_v39 }
 0xed9   : > { %v5947_v36 = vpop.eup %5946 }
 0xeda   : > { %v4221_v32 = vadd.f32 %v4220_v7, %v9275_v12  ;;  %v4223_v37 = vsub.f32 1.0, %v5947_v36  ;;  %v4225_v41 = vmul.f32 %v5947_v36, %v8824_v44  ;;  %v4609_v36 = vld [vmem:[%s6236_s16 + $0x10] sm:$0xff] (%p6215_p3) }
 0xedb   : > { %4610 = vst [vmem:[%s8984_s19 + $0x20] sm:$0xff] (%p6215_p3), %v4609_v36 }
 0xedc   : > { %5948 = vtanh.f32 %v4221_v32 }
 0xee9   : > { %v5949_v21 = vpop.eup %5948 }
 0xeea   : > { %v4224_v14 = vmul.f32 %v5949_v21, %v4223_v37  ;;  %v4613_v21 = vld [vmem:[%s6236_s16 + $0x20] sm:$0xff] (%p6215_p3) }
 0xeeb   : > { %4614 = vst [vmem:[%s8984_s19 + $0x40] sm:$0xff] (%p6215_p3), %v4613_v21 }
 0xeec   : > { %v4226_v51 = vadd.f32 %v4225_v41, %v4224_v14  ;;  %v4617_v41 = vld [vmem:[%s6236_s16 + $0x30] sm:$0xff] (%p6215_p3) }
 0xeed   : > { %4618 = vst [vmem:[%s8984_s19 + $0x60] sm:$0xff] (%p6215_p3), %v4617_v41 }
 0xeee   : > { %v4227_v23 = vsel %vm8082_vm2, %v4226_v51, %v7791_v6 }
 0xeef   : > { %v4229_v40 = vcombine.high %v4227_v23, %v4227_v23  ;;  %v4236_v0 = vrot.slane %v4227_v23, %v6873_v15  ;;  %4363 = vmatmul.mubr.f32.vlgmr.msra.gmra.mxu1 %v4227_v23  ;;  %5750 = vmatmul.mubr.f32.vlgmr.msra.gmra.mxu0 %v4227_v23 }
 0xef1   : > { %v4243_v8 = vrot.slane %v4229_v40, %v6873_v15  ;;  %v4244_v25 = vcombine.high %v4236_v0, %v4236_v0  ;;  %v4252_v19 = vrot.slane %v4236_v0, %v6873_v15  ;;  %4857 = vst.sshfl [vmem:[%s6236_s16 + $0xe] sm:$0x1 pattern:$0x73625140] %v4236_v0  ;;  %v4625_v0 = vld [vmem:[%s6236_s16 + $0x50] sm:$0xff] (%p6215_p3) }
 0xef2   : > { %4626 = vst [vmem:[%s8984_s19 + $0xa0] sm:$0xff] (%p6215_p3), %v4625_v0 }
 0xef3   : > { %v4245_v59 = vcombine.high %v4243_v8, %v4243_v8  ;;  %v4259_v43 = vrot.slane %v4243_v8, %v6873_v15  ;;  %v4266_v28 = vrot.slane %v4244_v25, %v6873_v15  ;;  %v4274_v13 = vcombine.high %v4252_v19, %v4252_v19  ;;  %4858 = vst.sshfl [vmem:[%s6236_s16 + $0x1e] sm:$0x1 pattern:$0x73625140] %v4244_v25  ;;  %v4629_v25 = vld [vmem:[%s6236_s16 + $0x60] sm:$0xff] (%p6215_p3) }
 0xef4   : > { %4859 = vst.sshfl [vmem:[%s6236_s16 + $0x4e] sm:$0x1 pattern:$0x73625140] %v4243_v8  ;;  %4630 = vst [vmem:[%s8984_s19 + $0xc0] sm:$0xff] (%p6215_p3), %v4629_v25 }
 0xef5   : > { %v4273_v44 = vrot.slane %v4245_v59, %v6873_v15  ;;  %v4275_v46 = vcombine.high %v4259_v43, %v4259_v43  ;;  %v4276_v47 = vcombine.high %v4266_v28, %v4266_v28  ;;  %4288 = vst [vmem:[%s6236_s16 + $0x2e] sm:$0x1] %v4274_v13  ;;  %4860 = vst.sshfl [vmem:[%s6236_s16 + $0x5e] sm:$0x1 pattern:$0x73625140] %v4245_v59 }
 0xef6   : > { %v4633_v59 = vld [vmem:[%s6236_s16 + $0x70] sm:$0xff] (%p6215_p3) }
 0xef7   : > { %v4277_v24 = vcombine.high %v4273_v44, %v4273_v44  ;;  %4289 = vst [vmem:[%s6236_s16 + $0x3e] sm:$0x1] %v4276_v47  ;;  %4292 = vst [vmem:[%s6236_s16 + $0x6e] sm:$0x1] %v4275_v46 }
 0xef8   : > { %4634 = vst [vmem:[%s8984_s19 + $0xe0] sm:$0xff] (%p6215_p3), %v4633_v59 }
 0xef9   : > { %4293 = vst [vmem:[%s6236_s16 + $0x7e] sm:$0x1] %v4277_v24 }
 0xfaf   : > { %v4364_v45 = vpop.f32.mrf.mxu1  ;;  %v4435_v29 = vpop.f32.mrf.mxu0 }
 0xfb0   : > { %v4439_v18 = vadd.f32 %v4364_v45, %v536_v17  ;;  %v4453_v55 = vadd.f32 %v6106_v54, %v4435_v29 }
 0xfb1   : > { %v5751_v27 = vpop.f32.mrf.mxu0  ;;  %v4366_v16 = vpop.f32.mrf.mxu1 }
 0xfb2   : > { %v4861_v34 = vmul.f32 -1.442695, %v4439_v18  ;;  %v4446_v33 = vadd.f32 %v4366_v16, %v538_v62 }
 0xfb4   : > { %5950 = vpow2.f32 %v4861_v34  ;;  %v4862_v42 = vmul.f32 -1.442695, %v4446_v33 }
 0xfb6   : > { %5952 = vpow2.f32 %v4862_v42 }
 0xfc1   : > { %v5951_v48 = vpop.eup %5950 }
 0xfc2   : > { %v4443_v50 = vadd.f32 1.0, %v5951_v48 }
 0xfc3   : > { %v5953_v52 = vpop.eup %5952 }
 0xfc4   : > { %5954 = vrcp.f32 %v4443_v50  ;;  %v4450_v53 = vadd.f32 1.0, %v5953_v52 }
 0xfc6   : > { %5956 = vrcp.f32 %v4450_v53 }
 0xfd1   : > { %v5955_v1 = vpop.eup %5954 }
 0xfd2   : > { %v4454_v56 = vmul.f32 %v5955_v1, %v4453_v55 }
 0xfd3   : > { %v5957_v5 = vpop.eup %5956 }
 0xfd4   : > { %v4455_v57 = vadd.f32 %v4454_v56, %v9278_v2  ;;  %v4457_v63 = vsub.f32 1.0, %v5957_v5  ;;  %v4459_v58 = vmul.f32 %v5957_v5, %v4227_v23  ;;  %v4621_v23 = vld [vmem:[%s6236_s16 + $0x40] sm:$0xff] (%p6215_p3) }
 0xfd5   : > { %4622 = vst [vmem:[%s8984_s19 + $0x80] sm:$0xff] (%p6215_p3), %v4621_v23 }
 0xfd6   : > { %5958 = vtanh.f32 %v4455_v57 }
 0xfe3   : > { %v5959_v3 = vpop.eup %5958 }
 0xfe4   : > { %v4458_v10 = vmul.f32 %v5959_v3, %v4457_v63 }
 0xfe6   : > { %v4460_v11 = vadd.f32 %v4459_v58, %v4458_v10 }
 0xfe8   : > { %v4461_v4 = vsel %vm8082_vm2, %v4460_v11, %v7791_v6 }
 0xfe9   : > { %v4463_v9 = vcombine.high %v4461_v4, %v4461_v4  ;;  %v4470_v38 = vrot.slane %v4461_v4, %v6873_v15  ;;  %4528 = vst [vmem:[#allocation2] sm:$0xff] %v4461_v4  ;;  %4529 = vst [vmem:[%s9039_s6] sm:$0xff] %v4461_v4 }
 0xfeb   : > { %v4477_v61 = vrot.slane %v4463_v9, %v6873_v15  ;;  %v4478_v31 = vcombine.high %v4470_v38, %v4470_v38  ;;  %v4486_v60 = vrot.slane %v4470_v38, %v6873_v15  ;;  %4863 = vst.sshfl [vmem:[%s6236_s16 + $0xf] sm:$0x1 pattern:$0x73625140] %v4470_v38 }
 0xfed   : > { %v4479_v6 = vcombine.high %v4477_v61, %v4477_v61  ;;  %v4493_v35 = vrot.slane %v4477_v61, %v6873_v15  ;;  %v4500_v26 = vrot.slane %v4478_v31, %v6873_v15  ;;  %v4508_v30 = vcombine.high %v4486_v60, %v4486_v60  ;;  %4864 = vst.sshfl [vmem:[%s6236_s16 + $0x1f] sm:$0x1 pattern:$0x73625140] %v4478_v31 }
 0xfee   : > { %4865 = vst.sshfl [vmem:[%s6236_s16 + $0x4f] sm:$0x1 pattern:$0x73625140] %v4477_v61 }
 0xfef   : > { %v4507_v39 = vrot.slane %v4479_v6, %v6873_v15  ;;  %v4509_v20 = vcombine.high %v4493_v35, %v4493_v35  ;;  %v4510_v7 = vcombine.high %v4500_v26, %v4500_v26  ;;  %4522 = vst [vmem:[%s6236_s16 + $0x2f] sm:$0x1] %v4508_v30  ;;  %4866 = vst.sshfl [vmem:[%s6236_s16 + $0x5f] sm:$0x1 pattern:$0x73625140] %v4479_v6 }
 0xff0   : > { %4540 = sbr.rel (!%p6215_p3) target bundleno = 4092 (0xffc), region = 48  ;;  %v4605_v15 = vld [vmem:[%s6236_s16] sm:$0xff] (%p6215_p3) }
 0xff1   : > { %v4511_v12 = vcombine.high %v4507_v39, %v4507_v39  ;;  %4523 = vst [vmem:[%s6236_s16 + $0x3f] sm:$0x1] %v4510_v7  ;;  %4526 = vst [vmem:[%s6236_s16 + $0x6f] sm:$0x1] %v4509_v20 }
 0xff2   : > { %v4607_v32 = vld [vmem:[%s6236_s16 + $0x8] sm:$0xff] (%p6215_p3)  ;;  %4606 = vst [vmem:[%s8984_s19] sm:$0xff] (%p6215_p3), %v4605_v15 }
 0xff3   : > { %4527 = vst [vmem:[%s6236_s16 + $0x7f] sm:$0x1] %v4511_v12  ;;  %4608 = vst [vmem:[%s8984_s19 + $0x8] sm:$0xff] (%p6215_p3), %v4607_v32 }
 0xff4   : > { %v4611_v37 = vld [vmem:[%s6236_s16 + $0x18] sm:$0xff] (%p6215_p3) }
 0xff5   : > { %4612 = vst [vmem:[%s8984_s19 + $0x28] sm:$0xff] %v4611_v37  ;;  %v4623_v40 = vld [vmem:[%s6236_s16 + $0x48] sm:$0xff] }
 0xff6   : > { %v4615_v14 = vld [vmem:[%s6236_s16 + $0x28] sm:$0xff]  ;;  %v4627_v8 = vld [vmem:[%s6236_s16 + $0x58] sm:$0xff]  ;;  %4624 = vst [vmem:[%s8984_s19 + $0x88] sm:$0xff] %v4623_v40 }
 0xff7   : > { %4616 = vst [vmem:[%s8984_s19 + $0x48] sm:$0xff] %v4615_v14  ;;  %4628 = vst [vmem:[%s8984_s19 + $0xa8] sm:$0xff] %v4627_v8 }
 0xff8   : > { %v4619_v51 = vld [vmem:[%s6236_s16 + $0x38] sm:$0xff]  ;;  %v4631_v19 = vld [vmem:[%s6236_s16 + $0x68] sm:$0xff] }
 0xff9   : > { %4620 = vst [vmem:[%s8984_s19 + $0x68] sm:$0xff] %v4619_v51  ;;  %4632 = vst [vmem:[%s8984_s19 + $0xc8] sm:$0xff] %v4631_v19 }
 0xffa   : > { %v4635_v43 = vld [vmem:[%s6236_s16 + $0x78] sm:$0xff] }
 0xffb   : > { %4636 = vst [vmem:[%s8984_s19 + $0xe8] sm:$0xff] %v4635_v43 }
 0xffc PF: > { %s17_s25 = sadd.s32 1, %s6145_s25   ;;  %s9279_s21 = smov %s6133_s22 }
 0xffd   : > { %p14_p11 = scmp.ge.s32.totalorder %s17_s25, 4   ;;  %s9280_s22 = smov %s6224_s7 }
 0xffe   : > { %s9281_s23 = smov %s6141_s24  ;;  %s9282_s24 = smov %s9284_s27 }
 0xfff   :  { %16 = sbr.rel (!%p14_p11) target bundleno = 3 (0x3), region = 139 }

</bundles_post_ra>
